<compile_context>
chip_gen: v6e
topology: v6e:2x2x1
jax: 0.10.0
libtpu: 0.0.40
codegen_flags: <defaults>
</compile_context>

<pallas_src>
import functools

import jax
import jax.numpy as jnp
from jax.experimental import pallas as pl
from jax.experimental.pallas import tpu as pltpu

EPS = 1e-5                    # nn.BatchNorm2d default eps
LANES = 128
VMEM_LIMIT = 32 * 1024 * 1024  # safe on v5e/v6e/v7x; working set here is ~1-2 MB


def _round_up(v, m):
    return (v + m - 1) // m * m


# ---------------- Pallas kernels ------------------------------------------------------

def _conv3x3_stats_kernel(xp_ref, w_ref, y_ref, stats_ref, acc_ref):
    """Pass 1: 3x3 SAME conv (9 shifted matmuls, bf16 operands, f32 accum) for one
    batch image, plus per-channel sum / sum-of-squares accumulated over the grid."""
    H, W, Cp = y_ref.shape[1], y_ref.shape[2], y_ref.shape[3]

    @pl.when(pl.program_id(0) == 0)
    def _():
        acc_ref[...] = jnp.zeros_like(acc_ref)

    acc = jnp.zeros((H * W, Cp), jnp.float32)
    for t in range(9):                                  # static 9-tap unroll
        dy, dx = divmod(t, 3)
        xs = xp_ref[0, dy:dy + H, dx:dx + W, :].reshape(H * W, Cp)   # bf16 halo slice
        acc = acc + jnp.dot(xs, w_ref[t], preferred_element_type=jnp.float32)

    y_ref[...] = acc.reshape(1, H, W, Cp)

    s = jnp.sum(acc, axis=0, keepdims=True)             # (1, Cp)
    ss = jnp.sum(acc * acc, axis=0, keepdims=True)      # (1, Cp)
    acc_ref[...] += jnp.concatenate([s, ss], axis=0)    # (2, Cp)

    @pl.when(pl.program_id(0) == pl.num_programs(0) - 1)
    def _():
        stats_ref[...] = acc_ref[...]


def _bn_relu_kernel(y_ref, stats_ref, gb_ref, o_ref, *, inv_m):
    """Pass 2: BN (global batch stats) fused into one FMA + ReLU, per batch image."""
    Cp = y_ref.shape[3]
    mean = stats_ref[0:1, :] * inv_m
    var = stats_ref[1:2, :] * inv_m - mean * mean       # f32 accumulation upstream
    s = gb_ref[0:1, :] * jax.lax.rsqrt(var + EPS)
    t = gb_ref[1:2, :] - mean * s
    s = s.reshape(1, 1, 1, Cp)
    t = t.reshape(1, 1, 1, Cp)
    o_ref[...] = jnp.maximum(y_ref[...] * s + t, 0.0).astype(o_ref.dtype)


def _bn_add_relu_kernel(y_ref, stats_ref, gb_ref, res_ref, o_ref, *, inv_m):
    """Pass 2 for conv2: BN + residual add + ReLU."""
    Cp = y_ref.shape[3]
    mean = stats_ref[0:1, :] * inv_m
    var = stats_ref[1:2, :] * inv_m - mean * mean
    s = gb_ref[0:1, :] * jax.lax.rsqrt(var + EPS)
    t = gb_ref[1:2, :] - mean * s
    s = s.reshape(1, 1, 1, Cp)
    t = t.reshape(1, 1, 1, Cp)
    o_ref[...] = jnp.maximum(y_ref[...] * s + t + res_ref[...], 0.0).astype(o_ref.dtype)


# ---------------- pallas_call wrappers -------------------------------------------------

def conv3x3_stats(xp, w9):
    """xp: (N, H+2, W+2, Cp) bf16 (spatial halo), w9: (9, Cp, Cp) bf16.
    Returns conv output (N, H, W, Cp) f32 and stats (2, Cp) f32 = [sum, sumsq]."""
    N, Hp2, Wp2, Cp = xp.shape
    H, W = Hp2 - 2, Wp2 - 2
    return pl.pallas_call(
        _conv3x3_stats_kernel,
        out_shape=(jax.ShapeDtypeStruct((N, H, W, Cp), jnp.float32),
                   jax.ShapeDtypeStruct((2, Cp), jnp.float32)),
        grid=(N,),
        in_specs=[pl.BlockSpec((1, Hp2, Wp2, Cp), lambda n: (n, 0, 0, 0)),
                  pl.BlockSpec((9, Cp, Cp), lambda n: (0, 0, 0))],
        out_specs=(pl.BlockSpec((1, H, W, Cp), lambda n: (n, 0, 0, 0)),
                   pl.BlockSpec((2, Cp), lambda n: (0, 0))),
        scratch_shapes=[pltpu.VMEM((2, Cp), jnp.float32)],
        compiler_params=pltpu.CompilerParams(
            dimension_semantics=("arbitrary",),      # stats reduce across the grid
            vmem_limit_bytes=VMEM_LIMIT),
    )(xp, w9)


def bn_relu(y, stats, gb, out_dtype):
    N, H, W, Cp = y.shape
    inv_m = 1.0 / float(N * H * W)
    kern = functools.partial(_bn_relu_kernel, inv_m=inv_m)
    return pl.pallas_call(
        kern,
        out_shape=jax.ShapeDtypeStruct((N, H, W, Cp), out_dtype),
        grid=(N,),
        in_specs=[pl.BlockSpec((1, H, W, Cp), lambda n: (n, 0, 0, 0)),
                  pl.BlockSpec((2, Cp), lambda n: (0, 0)),
                  pl.BlockSpec((2, Cp), lambda n: (0, 0))],
        out_specs=pl.BlockSpec((1, H, W, Cp), lambda n: (n, 0, 0, 0)),
        compiler_params=pltpu.CompilerParams(
            dimension_semantics=("parallel",),
            vmem_limit_bytes=VMEM_LIMIT),
    )(y, stats, gb)


def bn_add_relu(y, stats, gb, res):
    N, H, W, Cp = y.shape
    inv_m = 1.0 / float(N * H * W)
    kern = functools.partial(_bn_add_relu_kernel, inv_m=inv_m)
    return pl.pallas_call(
        kern,
        out_shape=jax.ShapeDtypeStruct((N, H, W, Cp), jnp.float32),
        grid=(N,),
        in_specs=[pl.BlockSpec((1, H, W, Cp), lambda n: (n, 0, 0, 0)),
                  pl.BlockSpec((2, Cp), lambda n: (0, 0)),
                  pl.BlockSpec((2, Cp), lambda n: (0, 0)),
                  pl.BlockSpec((1, H, W, Cp), lambda n: (n, 0, 0, 0))],
        out_specs=pl.BlockSpec((1, H, W, Cp), lambda n: (n, 0, 0, 0)),
        compiler_params=pltpu.CompilerParams(
            dimension_semantics=("parallel",),
            vmem_limit_bytes=VMEM_LIMIT),
    )(y, stats, gb, res)


# ---------------- parameter prep / plain-JAX glue --------------------------------------

def _pad_weights(w_hwio, cp):
    """(3,3,Cin,Cout) f32 -> (9, Cp, Cp) bf16, zero-padded channels."""
    kh, kw, cin, cout = w_hwio.shape
    wp = jnp.zeros((kh, kw, cp, cp), jnp.float32).at[:, :, :cin, :cout].set(w_hwio)
    return wp.reshape(kh * kw, cp, cp).astype(jnp.bfloat16)


def _pad_gamma_beta(g, b, cp):
    """-> (2, Cp) f32, padded channels get gamma=0, beta=0 (so padded outputs stay 0)."""
    c = g.shape[0]
    gb = jnp.zeros((2, cp), jnp.float32)
    return gb.at[0, :c].set(g).at[1, :c].set(b)


def make_params(key, inplanes, planes):
    k1, k2, k3, k4, k5, k6 = jax.random.split(key, 6)
    # conv weights stored HWIO (3, 3, Cin, Cout)
    w1 = 0.1 * jax.random.normal(k1, (3, 3, inplanes, planes), jnp.float32)
    w2 = 0.1 * jax.random.normal(k2, (3, 3, planes, planes), jnp.float32)
    g1 = 1.0 + 0.1 * jax.random.normal(k3, (planes,), jnp.float32)
    b1 = 0.1 * jax.random.normal(k4, (planes,), jnp.float32)
    g2 = 1.0 + 0.1 * jax.random.normal(k5, (planes,), jnp.float32)
    b2 = 0.1 * jax.random.normal(k6, (planes,), jnp.float32)
    return (w1, g1, b1, w2, g2, b2)


@jax.jit
def basic_block_forward(x_nchw, params):
    """Pallas-backed BasicBlock.forward (stride=1, downsample=None, use_cbam=False)."""
    w1, g1, b1, w2, g2, b2 = params
    N, C, H, W = x_nchw.shape
    P = w1.shape[-1]
    assert C == P, "residual requires inplanes == planes when downsample is None"
    Cp = _round_up(C, LANES)

    # Layout glue (cheap, fused by XLA): NCHW -> NHWC, lane-dense channel pad, halo pad.
    x = jnp.transpose(x_nchw, (0, 2, 3, 1))                                   # NHWC f32
    x_cp = jnp.pad(x, ((0, 0), (0, 0), (0, 0), (0, Cp - C)))                  # (N,H,W,Cp) f32
    xp1 = jnp.pad(x_cp.astype(jnp.bfloat16), ((0, 0), (1, 1), (1, 1), (0, 0)))  # halo, bf16

    w1p = _pad_weights(w1, Cp)
    w2p = _pad_weights(w2, Cp)
    gb1 = _pad_gamma_beta(g1, b1, Cp)
    gb2 = _pad_gamma_beta(g2, b2, Cp)

    # conv1 -> bn1 -> relu
    y1, st1 = conv3x3_stats(xp1, w1p)                       # pass 1 (conv + stats)
    out1 = bn_relu(y1, st1, gb1, jnp.bfloat16)              # pass 2 (normalize) -> bf16

    # conv2 -> bn2 -> (+residual) -> relu
    out1p = jnp.pad(out1, ((0, 0), (1, 1), (1, 1), (0, 0)))  # halo for conv2
    y2, st2 = conv3x3_stats(out1p, w2p)
    out2 = bn_add_relu(y2, st2, gb2, x_cp)                   # residual = original x

    return jnp.transpose(out2[..., :C], (0, 3, 1, 2))        # back to NCHW


# ---------------- pure-JAX reference (same mixed-precision semantics) ------------------

def _ref_forward(x_nchw, params):
    w1, g1, b1, w2, g2, b2 = params
    x = jnp.transpose(x_nchw, (0, 2, 3, 1))

    def conv(v, w):
        # Match kernel precision: bf16 operands, f32 accumulation.
        return jax.lax.conv_general_dilated(
            v.astype(jnp.bfloat16), w.astype(jnp.bfloat16),
            window_strides=(1, 1), padding="SAME",
            dimension_numbers=("NHWC", "HWIO", "NHWC"),
            preferred_element_type=jnp.float32)

    def bn(y, g, b):
        mean = jnp.mean(y, axis=(0, 1, 2), keepdims=True)
        var = jnp.mean((y - mean) ** 2, axis=(0, 1, 2), keepdims=True)   # biased var
        return (y - mean) * jax.lax.rsqrt(var + EPS) * g + b

    out1 = jax.nn.relu(bn(conv(x, w1), g1, b1))
    out = bn(conv(out1, w2), g2, b2) + x
    return jnp.transpose(jax.nn.relu(out), (0, 3, 1, 2))


if __name__ == "__main__":
    key = jax.random.PRNGKey(0)
    kx, kp = jax.random.split(key)

    N, C, H, W = 2, 4, 16, 16          # inplanes = planes = 4, stride = 1
    x = jax.random.normal(kx, (N, C, H, W), jnp.float32)
    params = make_params(kp, C, C)

    out = jax.block_until_ready(basic_block_forward(x, params))
    ref = jax.block_until_ready(_ref_forward(x, params))

    assert out.shape == (N, C, H, W)
    max_err = float(jnp.max(jnp.abs(out - ref)))
    assert jnp.allclose(out, ref, atol=2e-3, rtol=2e-3), max_err

    print("KERNEL_OK")
</pallas_src>

<mosaic_0001>
module attributes {stable_mosaic.version = 11 : i64} {
  func.func @_conv3x3_stats_kernel(%arg0: i32, %arg1: memref<1x18x18x128xbf16, #tpu.memory_space<vmem>>, %arg2: memref<9x128x128xbf16, #tpu.memory_space<vmem>>, %arg3: memref<1x16x16x128xf32, #tpu.memory_space<vmem>>, %arg4: memref<2x128xf32, #tpu.memory_space<vmem>>, %arg5: memref<2x128xf32, #tpu.memory_space<vmem>>) attributes {dimension_semantics = [#tpu.dimension_semantics<arbitrary>], iteration_bounds = array<i64: 2>, scalar_prefetch = 0 : i64, scratch_operands = 1 : i64, tpu.core_type = #tpu.core_type<tc>, window_params = [{transform_indices = @transform_0, window_bounds = array<i64: 1, 18, 18, 128>}, {pipeline_mode = #tpu.pipeline_mode<synchronous>, transform_indices = @transform_1, window_bounds = array<i64: 9, 128, 128>}, {transform_indices = @transform_2, window_bounds = array<i64: 1, 16, 16, 128>}, {pipeline_mode = #tpu.pipeline_mode<synchronous>, transform_indices = @transform_3, window_bounds = array<i64: 2, 128>}]} {
    %c0_i32 = arith.constant 0 : i32
    %0 = arith.cmpi eq, %arg0, %c0_i32 : i32
    %1 = arith.extui %0 : i1 to i32
    %c0_i32_0 = arith.constant 0 : i32
    %2 = arith.cmpi ne, %1, %c0_i32_0 : i32
    scf.if %2 {
      %cst_75 = arith.constant 0.000000e+00 : f32
      %81 = vector.broadcast %cst_75 : f32 to vector<2x128xf32>
      %c0_76 = arith.constant 0 : index
      %c0_77 = arith.constant 0 : index
      %82 = vector.load %arg5[%c0_76, %c0_77] : memref<2x128xf32, #tpu.memory_space<vmem>>, vector<2x128xf32>
      tpu.vector_store %arg5[%c0_76, %c0_77], %81 {strides = array<i32>} : memref<2x128xf32, #tpu.memory_space<vmem>>, vector<2x128xf32>,
    } else {
    }
    %cst = arith.constant 0.000000e+00 : f32
    %3 = vector.broadcast %cst : f32 to vector<256x128xf32>
    %c0 = arith.constant 0 : index
    %c0_1 = arith.constant 0 : index
    %c0_2 = arith.constant 0 : index
    %c0_3 = arith.constant 0 : index
    %4 = vector.load %arg1[%c0, %c0_1, %c0_2, %c0_3] : memref<1x18x18x128xbf16, #tpu.memory_space<vmem>>, vector<1x16x16x128xbf16>
    %5 = vector.shape_cast %4 : vector<1x16x16x128xbf16> to vector<16x16x128xbf16>
    %6 = vector.shape_cast %5 : vector<16x16x128xbf16> to vector<256x128xbf16>
    %c0_4 = arith.constant 0 : index
    %c0_5 = arith.constant 0 : index
    %c0_6 = arith.constant 0 : index
    %7 = vector.load %arg2[%c0_4, %c0_5, %c0_6] : memref<9x128x128xbf16, #tpu.memory_space<vmem>>, vector<1x128x128xbf16>
    %8 = vector.shape_cast %7 : vector<1x128x128xbf16> to vector<128x128xbf16>
    %cst_7 = arith.constant dense<0.000000e+00> : vector<256x128xf32>
    %9 = tpu.matmul %6, %8, %cst_7 {dimension_numbers = #tpu.dot_dimension_numbers<[1], [0], [0], [1], [0, 0, 1, 1], [], []>} : vector<256x128xbf16>, vector<128x128xbf16>, vector<256x128xf32> -> vector<256x128xf32>
    %10 = arith.addf %3, %9 : vector<256x128xf32>
    %c0_8 = arith.constant 0 : index
    %c0_9 = arith.constant 0 : index
    %c1 = arith.constant 1 : index
    %c0_10 = arith.constant 0 : index
    %11 = vector.load %arg1[%c0_8, %c0_9, %c1, %c0_10] : memref<1x18x18x128xbf16, #tpu.memory_space<vmem>>, vector<1x16x16x128xbf16>
    %12 = vector.shape_cast %11 : vector<1x16x16x128xbf16> to vector<16x16x128xbf16>
    %13 = vector.shape_cast %12 : vector<16x16x128xbf16> to vector<256x128xbf16>
    %c1_11 = arith.constant 1 : index
    %c0_12 = arith.constant 0 : index
    %c0_13 = arith.constant 0 : index
    %14 = vector.load %arg2[%c1_11, %c0_12, %c0_13] : memref<9x128x128xbf16, #tpu.memory_space<vmem>>, vector<1x128x128xbf16>
    %15 = vector.shape_cast %14 : vector<1x128x128xbf16> to vector<128x128xbf16>
    %cst_14 = arith.constant dense<0.000000e+00> : vector<256x128xf32>
    %16 = tpu.matmul %13, %15, %cst_14 {dimension_numbers = #tpu.dot_dimension_numbers<[1], [0], [0], [1], [0, 0, 1, 1], [], []>} : vector<256x128xbf16>, vector<128x128xbf16>, vector<256x128xf32> -> vector<256x128xf32>
    %17 = arith.addf %10, %16 : vector<256x128xf32>
    %c0_15 = arith.constant 0 : index
    %c0_16 = arith.constant 0 : index
    %c2 = arith.constant 2 : index
    %c0_17 = arith.constant 0 : index
    %18 = vector.load %arg1[%c0_15, %c0_16, %c2, %c0_17] : memref<1x18x18x128xbf16, #tpu.memory_space<vmem>>, vector<1x16x16x128xbf16>
    %19 = vector.shape_cast %18 : vector<1x16x16x128xbf16> to vector<16x16x128xbf16>
    %20 = vector.shape_cast %19 : vector<16x16x128xbf16> to vector<256x128xbf16>
    %c2_18 = arith.constant 2 : index
    %c0_19 = arith.constant 0 : index
    %c0_20 = arith.constant 0 : index
    %21 = vector.load %arg2[%c2_18, %c0_19, %c0_20] : memref<9x128x128xbf16, #tpu.memory_space<vmem>>, vector<1x128x128xbf16>
    %22 = vector.shape_cast %21 : vector<1x128x128xbf16> to vector<128x128xbf16>
    %cst_21 = arith.constant dense<0.000000e+00> : vector<256x128xf32>
    %23 = tpu.matmul %20, %22, %cst_21 {dimension_numbers = #tpu.dot_dimension_numbers<[1], [0], [0], [1], [0, 0, 1, 1], [], []>} : vector<256x128xbf16>, vector<128x128xbf16>, vector<256x128xf32> -> vector<256x128xf32>
    %24 = arith.addf %17, %23 : vector<256x128xf32>
    %c0_22 = arith.constant 0 : index
    %c1_23 = arith.constant 1 : index
    %c0_24 = arith.constant 0 : index
    %c0_25 = arith.constant 0 : index
    %25 = vector.load %arg1[%c0_22, %c1_23, %c0_24, %c0_25] : memref<1x18x18x128xbf16, #tpu.memory_space<vmem>>, vector<1x16x16x128xbf16>
    %26 = vector.shape_cast %25 : vector<1x16x16x128xbf16> to vector<16x16x128xbf16>
    %27 = vector.shape_cast %26 : vector<16x16x128xbf16> to vector<256x128xbf16>
    %c3 = arith.constant 3 : index
    %c0_26 = arith.constant 0 : index
    %c0_27 = arith.constant 0 : index
    %28 = vector.load %arg2[%c3, %c0_26, %c0_27] : memref<9x128x128xbf16, #tpu.memory_space<vmem>>, vector<1x128x128xbf16>
    %29 = vector.shape_cast %28 : vector<1x128x128xbf16> to vector<128x128xbf16>
    %cst_28 = arith.constant dense<0.000000e+00> : vector<256x128xf32>
    %30 = tpu.matmul %27, %29, %cst_28 {dimension_numbers = #tpu.dot_dimension_numbers<[1], [0], [0], [1], [0, 0, 1, 1], [], []>} : vector<256x128xbf16>, vector<128x128xbf16>, vector<256x128xf32> -> vector<256x128xf32>
    %31 = arith.addf %24, %30 : vector<256x128xf32>
    %c0_29 = arith.constant 0 : index
    %c1_30 = arith.constant 1 : index
    %c1_31 = arith.constant 1 : index
    %c0_32 = arith.constant 0 : index
    %32 = vector.load %arg1[%c0_29, %c1_30, %c1_31, %c0_32] : memref<1x18x18x128xbf16, #tpu.memory_space<vmem>>, vector<1x16x16x128xbf16>
    %33 = vector.shape_cast %32 : vector<1x16x16x128xbf16> to vector<16x16x128xbf16>
    %34 = vector.shape_cast %33 : vector<16x16x128xbf16> to vector<256x128xbf16>
    %c4 = arith.constant 4 : index
    %c0_33 = arith.constant 0 : index
    %c0_34 = arith.constant 0 : index
    %35 = vector.load %arg2[%c4, %c0_33, %c0_34] : memref<9x128x128xbf16, #tpu.memory_space<vmem>>, vector<1x128x128xbf16>
    %36 = vector.shape_cast %35 : vector<1x128x128xbf16> to vector<128x128xbf16>
    %cst_35 = arith.constant dense<0.000000e+00> : vector<256x128xf32>
    %37 = tpu.matmul %34, %36, %cst_35 {dimension_numbers = #tpu.dot_dimension_numbers<[1], [0], [0], [1], [0, 0, 1, 1], [], []>} : vector<256x128xbf16>, vector<128x128xbf16>, vector<256x128xf32> -> vector<256x128xf32>
    %38 = arith.addf %31, %37 : vector<256x128xf32>
    %c0_36 = arith.constant 0 : index
    %c1_37 = arith.constant 1 : index
    %c2_38 = arith.constant 2 : index
    %c0_39 = arith.constant 0 : index
    %39 = vector.load %arg1[%c0_36, %c1_37, %c2_38, %c0_39] : memref<1x18x18x128xbf16, #tpu.memory_space<vmem>>, vector<1x16x16x128xbf16>
    %40 = vector.shape_cast %39 : vector<1x16x16x128xbf16> to vector<16x16x128xbf16>
    %41 = vector.shape_cast %40 : vector<16x16x128xbf16> to vector<256x128xbf16>
    %c5 = arith.constant 5 : index
    %c0_40 = arith.constant 0 : index
    %c0_41 = arith.constant 0 : index
    %42 = vector.load %arg2[%c5, %c0_40, %c0_41] : memref<9x128x128xbf16, #tpu.memory_space<vmem>>, vector<1x128x128xbf16>
    %43 = vector.shape_cast %42 : vector<1x128x128xbf16> to vector<128x128xbf16>
    %cst_42 = arith.constant dense<0.000000e+00> : vector<256x128xf32>
    %44 = tpu.matmul %41, %43, %cst_42 {dimension_numbers = #tpu.dot_dimension_numbers<[1], [0], [0], [1], [0, 0, 1, 1], [], []>} : vector<256x128xbf16>, vector<128x128xbf16>, vector<256x128xf32> -> vector<256x128xf32>
    %45 = arith.addf %38, %44 : vector<256x128xf32>
    %c0_43 = arith.constant 0 : index
    %c2_44 = arith.constant 2 : index
    %c0_45 = arith.constant 0 : index
    %c0_46 = arith.constant 0 : index
    %46 = vector.load %arg1[%c0_43, %c2_44, %c0_45, %c0_46] : memref<1x18x18x128xbf16, #tpu.memory_space<vmem>>, vector<1x16x16x128xbf16>
    %47 = vector.shape_cast %46 : vector<1x16x16x128xbf16> to vector<16x16x128xbf16>
    %48 = vector.shape_cast %47 : vector<16x16x128xbf16> to vector<256x128xbf16>
    %c6 = arith.constant 6 : index
    %c0_47 = arith.constant 0 : index
    %c0_48 = arith.constant 0 : index
    %49 = vector.load %arg2[%c6, %c0_47, %c0_48] : memref<9x128x128xbf16, #tpu.memory_space<vmem>>, vector<1x128x128xbf16>
    %50 = vector.shape_cast %49 : vector<1x128x128xbf16> to vector<128x128xbf16>
    %cst_49 = arith.constant dense<0.000000e+00> : vector<256x128xf32>
    %51 = tpu.matmul %48, %50, %cst_49 {dimension_numbers = #tpu.dot_dimension_numbers<[1], [0], [0], [1], [0, 0, 1, 1], [], []>} : vector<256x128xbf16>, vector<128x128xbf16>, vector<256x128xf32> -> vector<256x128xf32>
    %52 = arith.addf %45, %51 : vector<256x128xf32>
    %c0_50 = arith.constant 0 : index
    %c2_51 = arith.constant 2 : index
    %c1_52 = arith.constant 1 : index
    %c0_53 = arith.constant 0 : index
    %53 = vector.load %arg1[%c0_50, %c2_51, %c1_52, %c0_53] : memref<1x18x18x128xbf16, #tpu.memory_space<vmem>>, vector<1x16x16x128xbf16>
    %54 = vector.shape_cast %53 : vector<1x16x16x128xbf16> to vector<16x16x128xbf16>
    %55 = vector.shape_cast %54 : vector<16x16x128xbf16> to vector<256x128xbf16>
    %c7 = arith.constant 7 : index
    %c0_54 = arith.constant 0 : index
    %c0_55 = arith.constant 0 : index
    %56 = vector.load %arg2[%c7, %c0_54, %c0_55] : memref<9x128x128xbf16, #tpu.memory_space<vmem>>, vector<1x128x128xbf16>
    %57 = vector.shape_cast %56 : vector<1x128x128xbf16> to vector<128x128xbf16>
    %cst_56 = arith.constant dense<0.000000e+00> : vector<256x128xf32>
    %58 = tpu.matmul %55, %57, %cst_56 {dimension_numbers = #tpu.dot_dimension_numbers<[1], [0], [0], [1], [0, 0, 1, 1], [], []>} : vector<256x128xbf16>, vector<128x128xbf16>, vector<256x128xf32> -> vector<256x128xf32>
    %59 = arith.addf %52, %58 : vector<256x128xf32>
    %c0_57 = arith.constant 0 : index
    %c2_58 = arith.constant 2 : index
    %c2_59 = arith.constant 2 : index
    %c0_60 = arith.constant 0 : index
    %60 = vector.load %arg1[%c0_57, %c2_58, %c2_59, %c0_60] : memref<1x18x18x128xbf16, #tpu.memory_space<vmem>>, vector<1x16x16x128xbf16>
    %61 = vector.shape_cast %60 : vector<1x16x16x128xbf16> to vector<16x16x128xbf16>
    %62 = vector.shape_cast %61 : vector<16x16x128xbf16> to vector<256x128xbf16>
    %c8 = arith.constant 8 : index
    %c0_61 = arith.constant 0 : index
    %c0_62 = arith.constant 0 : index
    %63 = vector.load %arg2[%c8, %c0_61, %c0_62] : memref<9x128x128xbf16, #tpu.memory_space<vmem>>, vector<1x128x128xbf16>
    %64 = vector.shape_cast %63 : vector<1x128x128xbf16> to vector<128x128xbf16>
    %cst_63 = arith.constant dense<0.000000e+00> : vector<256x128xf32>
    %65 = tpu.matmul %62, %64, %cst_63 {dimension_numbers = #tpu.dot_dimension_numbers<[1], [0], [0], [1], [0, 0, 1, 1], [], []>} : vector<256x128xbf16>, vector<128x128xbf16>, vector<256x128xf32> -> vector<256x128xf32>
    %66 = arith.addf %59, %65 : vector<256x128xf32>
    %67 = vector.shape_cast %66 : vector<256x128xf32> to vector<1x16x16x128xf32>
    %c0_64 = arith.constant 0 : index
    %c0_65 = arith.constant 0 : index
    %c0_66 = arith.constant 0 : index
    %c0_67 = arith.constant 0 : index
    %68 = vector.load %arg3[%c0_64, %c0_65, %c0_66, %c0_67] : memref<1x16x16x128xf32, #tpu.memory_space<vmem>>, vector<1x16x16x128xf32>
    tpu.vector_store %arg3[%c0_64, %c0_65, %c0_66, %c0_67], %67 {strides = array<i32>} : memref<1x16x16x128xf32, #tpu.memory_space<vmem>>, vector<1x16x16x128xf32>,
    %cst_68 = arith.constant dense<0.000000e+00> : vector<128xf32>
    %69 = vector.multi_reduction <add>, %66, %cst_68 [0] : vector<256x128xf32> to vector<128xf32>
    %70 = vector.shape_cast %69 : vector<128xf32> to vector<1x128xf32>
    %71 = arith.mulf %66, %66 : vector<256x128xf32>
    %cst_69 = arith.constant dense<0.000000e+00> : vector<128xf32>
    %72 = vector.multi_reduction <add>, %71, %cst_69 [0] : vector<256x128xf32> to vector<128xf32>
    %73 = vector.shape_cast %72 : vector<128xf32> to vector<1x128xf32>
    %c0_70 = arith.constant 0 : index
    %c0_71 = arith.constant 0 : index
    %74 = vector.load %arg5[%c0_70, %c0_71] : memref<2x128xf32, #tpu.memory_space<vmem>>, vector<2x128xf32>
    %75 = tpu.concatenate %70, %73 in 0 : vector<1x128xf32>, vector<1x128xf32> -> vector<2x128xf32>
    %76 = arith.addf %74, %75 : vector<2x128xf32>
    %c0_72 = arith.constant 0 : index
    %c0_73 = arith.constant 0 : index
    %77 = vector.load %arg5[%c0_72, %c0_73] : memref<2x128xf32, #tpu.memory_space<vmem>>, vector<2x128xf32>
    tpu.vector_store %arg5[%c0_72, %c0_73], %76 {strides = array<i32>} : memref<2x128xf32, #tpu.memory_space<vmem>>, vector<2x128xf32>,
    %c1_i32 = arith.constant 1 : i32
    %78 = arith.cmpi eq, %arg0, %c1_i32 : i32
    %79 = arith.extui %78 : i1 to i32
    %c0_i32_74 = arith.constant 0 : i32
    %80 = arith.cmpi ne, %79, %c0_i32_74 : i32
    scf.if %80 {
      %c0_75 = arith.constant 0 : index
      %c0_76 = arith.constant 0 : index
      %81 = vector.load %arg5[%c0_75, %c0_76] : memref<2x128xf32, #tpu.memory_space<vmem>>, vector<2x128xf32>
      %c0_77 = arith.constant 0 : index
      %c0_78 = arith.constant 0 : index
      %82 = vector.load %arg4[%c0_77, %c0_78] : memref<2x128xf32, #tpu.memory_space<vmem>>, vector<2x128xf32>
      tpu.vector_store %arg4[%c0_77, %c0_78], %81 {strides = array<i32>} : memref<2x128xf32, #tpu.memory_space<vmem>>, vector<2x128xf32>,
    } else {
    }
    return
  }
  func.func @transform_0(%arg0: i32) -> (i32, i32, i32, i32) {
    %c0_i32 = arith.constant 0 : i32
    %c0_i32_0 = arith.constant 0 : i32
    %c0_i32_1 = arith.constant 0 : i32
    %c0_i32_2 = arith.constant 0 : i32
    return %arg0, %c0_i32, %c0_i32_0, %c0_i32_1 : i32, i32, i32, i32
  }
  func.func @transform_1(%arg0: i32) -> (i32, i32, i32) {
    %c0_i32 = arith.constant 0 : i32
    %c0_i32_0 = arith.constant 0 : i32
    %c0_i32_1 = arith.constant 0 : i32
    %c0_i32_2 = arith.constant 0 : i32
    return %c0_i32, %c0_i32_0, %c0_i32_1 : i32, i32, i32
  }
  func.func @transform_2(%arg0: i32) -> (i32, i32, i32, i32) {
    %c0_i32 = arith.constant 0 : i32
    %c0_i32_0 = arith.constant 0 : i32
    %c0_i32_1 = arith.constant 0 : i32
    %c0_i32_2 = arith.constant 0 : i32
    return %arg0, %c0_i32, %c0_i32_0, %c0_i32_1 : i32, i32, i32, i32
  }
  func.func @transform_3(%arg0: i32) -> (i32, i32) {
    %c0_i32 = arith.constant 0 : i32
    %c0_i32_0 = arith.constant 0 : i32
    %c0_i32_1 = arith.constant 0 : i32
    return %c0_i32, %c0_i32_0 : i32, i32
  }
}

module attributes {stable_mosaic.version = 11 : i64} {
  func.func @_bn_relu_kernel(%arg0: i32, %arg1: memref<1x16x16x128xf32, #tpu.memory_space<vmem>>, %arg2: memref<2x128xf32, #tpu.memory_space<vmem>>, %arg3: memref<2x128xf32, #tpu.memory_space<vmem>>, %arg4: memref<1x16x16x128xbf16, #tpu.memory_space<vmem>>) attributes {dimension_semantics = [#tpu.dimension_semantics<parallel>], iteration_bounds = array<i64: 2>, scalar_prefetch = 0 : i64, scratch_operands = 0 : i64, tpu.core_type = #tpu.core_type<tc>, window_params = [{transform_indices = @transform_0, window_bounds = array<i64: 1, 16, 16, 128>}, {pipeline_mode = #tpu.pipeline_mode<synchronous>, transform_indices = @transform_1, window_bounds = array<i64: 2, 128>}, {pipeline_mode = #tpu.pipeline_mode<synchronous>, transform_indices = @transform_2, window_bounds = array<i64: 2, 128>}, {transform_indices = @transform_3, window_bounds = array<i64: 1, 16, 16, 128>}]} {
    %c0 = arith.constant 0 : index
    %c0_0 = arith.constant 0 : index
    %0 = vector.load %arg2[%c0, %c0_0] : memref<2x128xf32, #tpu.memory_space<vmem>>, vector<1x128xf32>
    %cst = arith.constant 0.001953125 : f32
    %1 = vector.broadcast %cst : f32 to vector<1x128xf32>
    %2 = arith.mulf %0, %1 : vector<1x128xf32>
    %c1 = arith.constant 1 : index
    %c0_1 = arith.constant 0 : index
    %3 = vector.load %arg2[%c1, %c0_1] : memref<2x128xf32, #tpu.memory_space<vmem>>, vector<1x128xf32>
    %cst_2 = arith.constant 0.001953125 : f32
    %4 = vector.broadcast %cst_2 : f32 to vector<1x128xf32>
    %5 = arith.mulf %3, %4 : vector<1x128xf32>
    %6 = arith.mulf %2, %2 : vector<1x128xf32>
    %7 = arith.subf %5, %6 : vector<1x128xf32>
    %c0_3 = arith.constant 0 : index
    %c0_4 = arith.constant 0 : index
    %8 = vector.load %arg3[%c0_3, %c0_4] : memref<2x128xf32, #tpu.memory_space<vmem>>, vector<1x128xf32>
    %cst_5 = arith.constant 9.99999974E-6 : f32
    %9 = vector.broadcast %cst_5 : f32 to vector<1x128xf32>
    %10 = arith.addf %7, %9 : vector<1x128xf32>
    %11 = math.rsqrt %10 : vector<1x128xf32>
    %12 = arith.mulf %8, %11 : vector<1x128xf32>
    %c1_6 = arith.constant 1 : index
    %c0_7 = arith.constant 0 : index
    %13 = vector.load %arg3[%c1_6, %c0_7] : memref<2x128xf32, #tpu.memory_space<vmem>>, vector<1x128xf32>
    %14 = arith.mulf %2, %12 : vector<1x128xf32>
    %15 = arith.subf %13, %14 : vector<1x128xf32>
    %16 = vector.shape_cast %12 : vector<1x128xf32> to vector<1x1x1x128xf32>
    %17 = vector.shape_cast %15 : vector<1x128xf32> to vector<1x1x1x128xf32>
    %c0_8 = arith.constant 0 : index
    %c0_9 = arith.constant 0 : index
    %c0_10 = arith.constant 0 : index
    %c0_11 = arith.constant 0 : index
    %18 = vector.load %arg1[%c0_8, %c0_9, %c0_10, %c0_11] : memref<1x16x16x128xf32, #tpu.memory_space<vmem>>, vector<1x16x16x128xf32>
    %19 = vector.broadcast %16 : vector<1x1x1x128xf32> to vector<1x16x16x128xf32>
    %20 = arith.mulf %18, %19 : vector<1x16x16x128xf32>
    %21 = vector.broadcast %17 : vector<1x1x1x128xf32> to vector<1x16x16x128xf32>
    %22 = arith.addf %20, %21 : vector<1x16x16x128xf32>
    %cst_12 = arith.constant 0.000000e+00 : f32
    %23 = vector.broadcast %cst_12 : f32 to vector<1x16x16x128xf32>
    %24 = arith.maximumf %22, %23 : vector<1x16x16x128xf32>
    %25 = arith.truncf %24 : vector<1x16x16x128xf32> to vector<1x16x16x128xbf16>
    %c0_13 = arith.constant 0 : index
    %c0_14 = arith.constant 0 : index
    %c0_15 = arith.constant 0 : index
    %c0_16 = arith.constant 0 : index
    %26 = vector.load %arg4[%c0_13, %c0_14, %c0_15, %c0_16] : memref<1x16x16x128xbf16, #tpu.memory_space<vmem>>, vector<1x16x16x128xbf16>
    tpu.vector_store %arg4[%c0_13, %c0_14, %c0_15, %c0_16], %25 {strides = array<i32>} : memref<1x16x16x128xbf16, #tpu.memory_space<vmem>>, vector<1x16x16x128xbf16>,
    return
  }
  func.func @transform_0(%arg0: i32) -> (i32, i32, i32, i32) {
    %c0_i32 = arith.constant 0 : i32
    %c0_i32_0 = arith.constant 0 : i32
    %c0_i32_1 = arith.constant 0 : i32
    %c0_i32_2 = arith.constant 0 : i32
    return %arg0, %c0_i32, %c0_i32_0, %c0_i32_1 : i32, i32, i32, i32
  }
  func.func @transform_1(%arg0: i32) -> (i32, i32) {
    %c0_i32 = arith.constant 0 : i32
    %c0_i32_0 = arith.constant 0 : i32
    %c0_i32_1 = arith.constant 0 : i32
    return %c0_i32, %c0_i32_0 : i32, i32
  }
  func.func @transform_2(%arg0: i32) -> (i32, i32) {
    %c0_i32 = arith.constant 0 : i32
    %c0_i32_0 = arith.constant 0 : i32
    %c0_i32_1 = arith.constant 0 : i32
    return %c0_i32, %c0_i32_0 : i32, i32
  }
  func.func @transform_3(%arg0: i32) -> (i32, i32, i32, i32) {
    %c0_i32 = arith.constant 0 : i32
    %c0_i32_0 = arith.constant 0 : i32
    %c0_i32_1 = arith.constant 0 : i32
    %c0_i32_2 = arith.constant 0 : i32
    return %arg0, %c0_i32, %c0_i32_0, %c0_i32_1 : i32, i32, i32, i32
  }
}

module attributes {stable_mosaic.version = 11 : i64} {
  func.func @_bn_add_relu_kernel(%arg0: i32, %arg1: memref<1x16x16x128xf32, #tpu.memory_space<vmem>>, %arg2: memref<2x128xf32, #tpu.memory_space<vmem>>, %arg3: memref<2x128xf32, #tpu.memory_space<vmem>>, %arg4: memref<1x16x16x128xf32, #tpu.memory_space<vmem>>, %arg5: memref<1x16x16x128xf32, #tpu.memory_space<vmem>>) attributes {dimension_semantics = [#tpu.dimension_semantics<parallel>], iteration_bounds = array<i64: 2>, scalar_prefetch = 0 : i64, scratch_operands = 0 : i64, tpu.core_type = #tpu.core_type<tc>, window_params = [{transform_indices = @transform_0, window_bounds = array<i64: 1, 16, 16, 128>}, {pipeline_mode = #tpu.pipeline_mode<synchronous>, transform_indices = @transform_1, window_bounds = array<i64: 2, 128>}, {pipeline_mode = #tpu.pipeline_mode<synchronous>, transform_indices = @transform_2, window_bounds = array<i64: 2, 128>}, {transform_indices = @transform_3, window_bounds = array<i64: 1, 16, 16, 128>}, {transform_indices = @transform_4, window_bounds = array<i64: 1, 16, 16, 128>}]} {
    %c0 = arith.constant 0 : index
    %c0_0 = arith.constant 0 : index
    %0 = vector.load %arg2[%c0, %c0_0] : memref<2x128xf32, #tpu.memory_space<vmem>>, vector<1x128xf32>
    %cst = arith.constant 0.001953125 : f32
    %1 = vector.broadcast %cst : f32 to vector<1x128xf32>
    %2 = arith.mulf %0, %1 : vector<1x128xf32>
    %c1 = arith.constant 1 : index
    %c0_1 = arith.constant 0 : index
    %3 = vector.load %arg2[%c1, %c0_1] : memref<2x128xf32, #tpu.memory_space<vmem>>, vector<1x128xf32>
    %cst_2 = arith.constant 0.001953125 : f32
    %4 = vector.broadcast %cst_2 : f32 to vector<1x128xf32>
    %5 = arith.mulf %3, %4 : vector<1x128xf32>
    %6 = arith.mulf %2, %2 : vector<1x128xf32>
    %7 = arith.subf %5, %6 : vector<1x128xf32>
    %c0_3 = arith.constant 0 : index
    %c0_4 = arith.constant 0 : index
    %8 = vector.load %arg3[%c0_3, %c0_4] : memref<2x128xf32, #tpu.memory_space<vmem>>, vector<1x128xf32>
    %cst_5 = arith.constant 9.99999974E-6 : f32
    %9 = vector.broadcast %cst_5 : f32 to vector<1x128xf32>
    %10 = arith.addf %7, %9 : vector<1x128xf32>
    %11 = math.rsqrt %10 : vector<1x128xf32>
    %12 = arith.mulf %8, %11 : vector<1x128xf32>
    %c1_6 = arith.constant 1 : index
    %c0_7 = arith.constant 0 : index
    %13 = vector.load %arg3[%c1_6, %c0_7] : memref<2x128xf32, #tpu.memory_space<vmem>>, vector<1x128xf32>
    %14 = arith.mulf %2, %12 : vector<1x128xf32>
    %15 = arith.subf %13, %14 : vector<1x128xf32>
    %16 = vector.shape_cast %12 : vector<1x128xf32> to vector<1x1x1x128xf32>
    %17 = vector.shape_cast %15 : vector<1x128xf32> to vector<1x1x1x128xf32>
    %c0_8 = arith.constant 0 : index
    %c0_9 = arith.constant 0 : index
    %c0_10 = arith.constant 0 : index
    %c0_11 = arith.constant 0 : index
    %18 = vector.load %arg1[%c0_8, %c0_9, %c0_10, %c0_11] : memref<1x16x16x128xf32, #tpu.memory_space<vmem>>, vector<1x16x16x128xf32>
    %19 = vector.broadcast %16 : vector<1x1x1x128xf32> to vector<1x16x16x128xf32>
    %20 = arith.mulf %18, %19 : vector<1x16x16x128xf32>
    %21 = vector.broadcast %17 : vector<1x1x1x128xf32> to vector<1x16x16x128xf32>
    %22 = arith.addf %20, %21 : vector<1x16x16x128xf32>
    %c0_12 = arith.constant 0 : index
    %c0_13 = arith.constant 0 : index
    %c0_14 = arith.constant 0 : index
    %c0_15 = arith.constant 0 : index
    %23 = vector.load %arg4[%c0_12, %c0_13, %c0_14, %c0_15] : memref<1x16x16x128xf32, #tpu.memory_space<vmem>>, vector<1x16x16x128xf32>
    %24 = arith.addf %22, %23 : vector<1x16x16x128xf32>
    %cst_16 = arith.constant 0.000000e+00 : f32
    %25 = vector.broadcast %cst_16 : f32 to vector<1x16x16x128xf32>
    %26 = arith.maximumf %24, %25 : vector<1x16x16x128xf32>
    %c0_17 = arith.constant 0 : index
    %c0_18 = arith.constant 0 : index
    %c0_19 = arith.constant 0 : index
    %c0_20 = arith.constant 0 : index
    %27 = vector.load %arg5[%c0_17, %c0_18, %c0_19, %c0_20] : memref<1x16x16x128xf32, #tpu.memory_space<vmem>>, vector<1x16x16x128xf32>
    tpu.vector_store %arg5[%c0_17, %c0_18, %c0_19, %c0_20], %26 {strides = array<i32>} : memref<1x16x16x128xf32, #tpu.memory_space<vmem>>, vector<1x16x16x128xf32>,
    return
  }
  func.func @transform_0(%arg0: i32) -> (i32, i32, i32, i32) {
    %c0_i32 = arith.constant 0 : i32
    %c0_i32_0 = arith.constant 0 : i32
    %c0_i32_1 = arith.constant 0 : i32
    %c0_i32_2 = arith.constant 0 : i32
    return %arg0, %c0_i32, %c0_i32_0, %c0_i32_1 : i32, i32, i32, i32
  }
  func.func @transform_1(%arg0: i32) -> (i32, i32) {
    %c0_i32 = arith.constant 0 : i32
    %c0_i32_0 = arith.constant 0 : i32
    %c0_i32_1 = arith.constant 0 : i32
    return %c0_i32, %c0_i32_0 : i32, i32
  }
  func.func @transform_2(%arg0: i32) -> (i32, i32) {
    %c0_i32 = arith.constant 0 : i32
    %c0_i32_0 = arith.constant 0 : i32
    %c0_i32_1 = arith.constant 0 : i32
    return %c0_i32, %c0_i32_0 : i32, i32
  }
  func.func @transform_3(%arg0: i32) -> (i32, i32, i32, i32) {
    %c0_i32 = arith.constant 0 : i32
    %c0_i32_0 = arith.constant 0 : i32
    %c0_i32_1 = arith.constant 0 : i32
    %c0_i32_2 = arith.constant 0 : i32
    return %arg0, %c0_i32, %c0_i32_0, %c0_i32_1 : i32, i32, i32, i32
  }
  func.func @transform_4(%arg0: i32) -> (i32, i32, i32, i32) {
    %c0_i32 = arith.constant 0 : i32
    %c0_i32_0 = arith.constant 0 : i32
    %c0_i32_1 = arith.constant 0 : i32
    %c0_i32_2 = arith.constant 0 : i32
    return %arg0, %c0_i32, %c0_i32_0, %c0_i32_1 : i32, i32, i32, i32
  }
}

</mosaic_0001>

<bundles_post_ra>
// kernel: basic_block_forward.5
= control target key start
LH: loop header
LB: loop body
LE: loop exit
PB: predicated region body
PF: predicated region fallthrough
CT: control target
= control target key end

     0   :  { %s745_s12 = smov 0   ;;  %s898_s0 = inlined_call_operand.vmem [shape: f32[2,16,16,128], index: 0, kind: input, shape index: {}]   ;;  %s899_s1 = inlined_call_operand.vmem [shape: f32[2,128], index: 1, kind: input, shape index: {}]   ;;  %s900_s2 = inlined_call_operand.vmem [shape: f32[2,128], index: 2, kind: input, shape index: {}]   ;;  %s901_s3 = inlined_call_operand.vmem [shape: bf16[2,16,16,128], index: 3, kind: output, shape index: {}]  }
   0x1 LB: > { %s535_s13 = sadd.s32 4294967295, %s723_s12   ;;  %p539_p0 = scmp.ge.s32.totalorder %s723_s12, 1  ;;  %s723_s12 = sphi %s745_s12, %s13_s12  }
   0x2   : > { %p137_p1 = scmp.lt.s32.totalorder %s723_s12, 3 }
   0x4   : > { %p138_p2 = pnand %p539_p0, %p137_p1 }
   0x5   : > { %p161_p3 = scmp.lt.s32.totalorder (!%p138_p2), %s535_s13, 1 }
   0x6   : > { %141 = sbr.rel (%p138_p2) target bundleno = 72 (0x48), region = 32 }
   0xb   : > { %v171_v0 = vld [vmem:[%s899_s1] sm:$0x1]  ;;  %v173_v1 = vld [vmem:[%s899_s1 + $0x1] sm:$0x1]  ;;  %s903_s13 = smov (!%p161_p3, %s535_s13), 1  ;;  %v216_v7 = vlaneseq }
   0xc   : > { %v172_v2 = vmul.f32 0.001953125, %v171_v0  ;;  %v174_v3 = vmul.f32 0.001953125, %v173_v1  ;;  %s578_s18 = sshll.u32 %s903_s13, 8  ;;  %v177_v9 = vld [vmem:[%s900_s2] sm:$0x1]  ;;  %s579_s26 = sshll.u32 %s903_s13, 7 }
   0xd   : > { %v217_v8 = vshrl.u32 %v216_v7, 7  ;;  %s765_s21 = scalar_lea.vmem %s898_s0, %s578_s18  ;;  %v181_v13 = vld [vmem:[%s900_s2 + $0x1] sm:$0x1]  ;;  %s817_s29 = scalar_lea.vmem %s901_s3, %s579_s26 }
   0xe   : > { %v175_v4 = vmul.f32 %v172_v2, %v172_v2  ;;  %v184_v14 = vld [vmem:[%s765_s21] sm:$0xff]  ;;  %v185_v15 = vld [vmem:[%s765_s21 + $0x8] sm:$0xff]  ;;  %v186_v16 = vld [vmem:[%s765_s21 + $0x10] sm:$0xff] }
   0xf   : > { %v218_v10 = vsub.s32 0, %v217_v8  ;;  %v187_v17 = vld [vmem:[%s765_s21 + $0x18] sm:$0xff]  ;;  %v188_v18 = vld [vmem:[%s765_s21 + $0x20] sm:$0xff]  ;;  %v189_v21 = vld [vmem:[%s765_s21 + $0x28] sm:$0xff] }
  0x10   : > { %v176_v5 = vsub.f32 %v174_v3, %v175_v4  ;;  %v190_v22 = vld [vmem:[%s765_s21 + $0x30] sm:$0xff]  ;;  %v191_v23 = vld [vmem:[%s765_s21 + $0x38] sm:$0xff]  ;;  %v192_v24 = vld [vmem:[%s765_s21 + $0x40] sm:$0xff] }
  0x11   : > { %v193_v25 = vld [vmem:[%s765_s21 + $0x48] sm:$0xff]  ;;  %v194_v26 = vld [vmem:[%s765_s21 + $0x50] sm:$0xff]  ;;  %v195_v31 = vld [vmem:[%s765_s21 + $0x58] sm:$0xff] }
  0x12   : > { %v178_v6 = vadd.f32 1e-05, %v176_v5  ;;  %v196_v32 = vld [vmem:[%s765_s21 + $0x60] sm:$0xff]  ;;  %v197_v33 = vld [vmem:[%s765_s21 + $0x68] sm:$0xff]  ;;  %v199_v3 = vld [vmem:[%s765_s21 + $0x78] sm:$0xff] }
  0x13   : > { %v200_v8 = vld [vmem:[%s765_s21 + $0x80] sm:$0xff] }
  0x14   : > { %715 = vrsqrt.f32 %v178_v6 }
  0x21   : > { %v716_v11 = vpop.eup %715 }
  0x22   : > { %v180_v12 = vmul.f32 %v716_v11, %v177_v9 }
  0x24   : > { %v182_v19 = vmul.f32 %v180_v12, %v172_v2  ;;  %v778_v20 = vrot.slane %v180_v12, %v218_v10  ;;  %v198_v2 = vld [vmem:[%s765_s21 + $0x70] sm:$0xff] }
  0x26   : > { %v183_v27 = vsub.f32 %v181_v13, %v182_v19  ;;  %v220_v28 = vmul.f32 %v778_v20, %v184_v14  ;;  %v221_v29 = vmul.f32 %v778_v20, %v185_v15  ;;  %v222_v30 = vmul.f32 %v778_v20, %v186_v16  ;;  %v201_v13 = vld [vmem:[%s765_s21 + $0x88] sm:$0xff]  ;;  %v203_v19 = vld [vmem:[%s765_s21 + $0x98] sm:$0xff] }
  0x27   : > { %v223_v34 = vmul.f32 %v778_v20, %v187_v17  ;;  %v224_v35 = vmul.f32 %v778_v20, %v188_v18  ;;  %v225_v36 = vmul.f32 %v778_v20, %v189_v21  ;;  %v226_v37 = vmul.f32 %v778_v20, %v190_v22  ;;  %v202_v18 = vld [vmem:[%s765_s21 + $0x90] sm:$0xff] }
  0x28   : > { %v796_v38 = vrot.slane %v183_v27, %v218_v10  ;;  %v227_v39 = vmul.f32 %v778_v20, %v191_v23  ;;  %v228_v40 = vmul.f32 %v778_v20, %v192_v24  ;;  %v229_v41 = vmul.f32 %v778_v20, %v193_v25  ;;  %v204_v25 = vld [vmem:[%s765_s21 + $0xa0] sm:$0xff] }
  0x29   : > { %v230_v42 = vmul.f32 %v778_v20, %v194_v26  ;;  %v231_v43 = vmul.f32 %v778_v20, %v195_v31  ;;  %v232_v44 = vmul.f32 %v778_v20, %v196_v32  ;;  %v233_v45 = vmul.f32 %v778_v20, %v197_v33 }
  0x2a   : > { %v256_v46 = vadd.f32 %v796_v38, %v220_v28  ;;  %v257_v47 = vadd.f32 %v796_v38, %v221_v29  ;;  %v258_v48 = vadd.f32 %v796_v38, %v222_v30  ;;  %v259_v49 = vadd.f32 %v796_v38, %v223_v34  ;;  %v205_v30 = vld [vmem:[%s765_s21 + $0xa8] sm:$0xff] }
  0x2b   : > { %v260_v50 = vadd.f32 %v796_v38, %v224_v35  ;;  %v261_v51 = vadd.f32 %v796_v38, %v225_v36  ;;  %v262_v52 = vadd.f32 %v796_v38, %v226_v37  ;;  %v263_v53 = vadd.f32 %v796_v38, %v227_v39  ;;  %v206_v35 = vld [vmem:[%s765_s21 + $0xb0] sm:$0xff] }
  0x2c   : > { %v288_v54 = vmax.f32 %v256_v46, 0.0  ;;  %v289_v55 = vmax.f32 %v257_v47, 0.0  ;;  %v290_v56 = vmax.f32 %v258_v48, 0.0  ;;  %v291_v57 = vmax.f32 %v259_v49, 0.0  ;;  %v208_v46 = vld [vmem:[%s765_s21 + $0xc0] sm:$0xff] }
  0x2d   : > { %v292_v58 = vmax.f32 %v260_v50, 0.0  ;;  %v293_v59 = vmax.f32 %v261_v51, 0.0  ;;  %v294_v60 = vmax.f32 %v262_v52, 0.0  ;;  %v295_v61 = vmax.f32 %v263_v53, 0.0  ;;  %v209_v51 = vld [vmem:[%s765_s21 + $0xc8] sm:$0xff] }
  0x2e   : > { %v615_v62 = vpack.c.bf16 %v289_v55, %v288_v54  ;;  %v620_v63 = vpack.c.bf16 %v291_v57, %v290_v56  ;;  %v264_v0 = vadd.f32 %v796_v38, %v228_v40  ;;  %v265_v1 = vadd.f32 %v796_v38, %v229_v41  ;;  %v207_v41 = vld [vmem:[%s765_s21 + $0xb8] sm:$0xff]  ;;  %v210_v56 = vld [vmem:[%s765_s21 + $0xd0] sm:$0xff] }
  0x2f   : > { %v625_v4 = vpack.c.bf16 %v293_v59, %v292_v58  ;;  %v630_v5 = vpack.c.bf16 %v295_v61, %v294_v60  ;;  %v266_v6 = vadd.f32 %v796_v38, %v230_v42  ;;  %v267_v7 = vadd.f32 %v796_v38, %v231_v43  ;;  %v211_v57 = vld [vmem:[%s765_s21 + $0xd8] sm:$0xff] }
  0x30   : > { %616 = vst [vmem:[%s817_s29] sm:$0xff] %v615_v62   ;;  %692 = vst [vmem:[%s817_s29 + $0x8] sm:$0xff] %v620_v63   ;;  %v296_v9 = vmax.f32 %v264_v0, 0.0  ;;  %v297_v10 = vmax.f32 %v265_v1, 0.0  ;;  %v268_v11 = vadd.f32 %v796_v38, %v232_v44  ;;  %v269_v12 = vadd.f32 %v796_v38, %v233_v45  ;;  %v212_v62 = vld [vmem:[%s765_s21 + $0xe0] sm:$0xff] }
  0x31   : > { %693 = vst [vmem:[%s817_s29 + $0x10] sm:$0xff] %v625_v4   ;;  %694 = vst [vmem:[%s817_s29 + $0x18] sm:$0xff] %v630_v5   ;;  %v298_v14 = vmax.f32 %v266_v6, 0.0  ;;  %v299_v15 = vmax.f32 %v267_v7, 0.0  ;;  %v234_v16 = vmul.f32 %v778_v20, %v198_v2  ;;  %v235_v17 = vmul.f32 %v778_v20, %v199_v3  ;;  %v213_v3 = vld [vmem:[%s765_s21 + $0xe8] sm:$0xff] }
  0x32   : > { %v635_v21 = vpack.c.bf16 %v297_v10, %v296_v9  ;;  %v300_v22 = vmax.f32 %v268_v11, 0.0  ;;  %v301_v23 = vmax.f32 %v269_v12, 0.0  ;;  %v236_v24 = vmul.f32 %v778_v20, %v200_v8  ;;  %v214_v8 = vld [vmem:[%s765_s21 + $0xf0] sm:$0xff] }
  0x33   : > { %v640_v26 = vpack.c.bf16 %v299_v15, %v298_v14  ;;  %v270_v27 = vadd.f32 %v796_v38, %v234_v16  ;;  %v271_v28 = vadd.f32 %v796_v38, %v235_v17  ;;  %v237_v29 = vmul.f32 %v778_v20, %v201_v13  ;;  %v215_v13 = vld [vmem:[%s765_s21 + $0xf8] sm:$0xff] }
  0x34   : > { %695 = vst [vmem:[%s817_s29 + $0x20] sm:$0xff] %v635_v21   ;;  %v645_v31 = vpack.c.bf16 %v301_v23, %v300_v22  ;;  %v272_v32 = vadd.f32 %v796_v38, %v236_v24  ;;  %v238_v33 = vmul.f32 %v778_v20, %v202_v18  ;;  %v239_v34 = vmul.f32 %v778_v20, %v203_v19 }
  0x35   : > { %696 = vst [vmem:[%s817_s29 + $0x28] sm:$0xff] %v640_v26   ;;  %v302_v36 = vmax.f32 %v270_v27, 0.0  ;;  %v303_v37 = vmax.f32 %v271_v28, 0.0  ;;  %v273_v39 = vadd.f32 %v796_v38, %v237_v29  ;;  %v240_v40 = vmul.f32 %v778_v20, %v204_v25 }
  0x36   : > { %697 = vst [vmem:[%s817_s29 + $0x30] sm:$0xff] %v645_v31   ;;  %v304_v42 = vmax.f32 %v272_v32, 0.0  ;;  %v274_v43 = vadd.f32 %v796_v38, %v238_v33  ;;  %v275_v44 = vadd.f32 %v796_v38, %v239_v34  ;;  %v241_v45 = vmul.f32 %v778_v20, %v205_v30 }
  0x37   : > { %v650_v47 = vpack.c.bf16 %v303_v37, %v302_v36  ;;  %v305_v48 = vmax.f32 %v273_v39, 0.0  ;;  %v276_v49 = vadd.f32 %v796_v38, %v240_v40  ;;  %v242_v50 = vmul.f32 %v778_v20, %v206_v35 }
  0x38   : > { %v306_v52 = vmax.f32 %v274_v43, 0.0  ;;  %v307_v53 = vmax.f32 %v275_v44, 0.0  ;;  %v277_v54 = vadd.f32 %v796_v38, %v241_v45  ;;  %v243_v55 = vmul.f32 %v778_v20, %v207_v41 }
  0x39   : > { %698 = vst [vmem:[%s817_s29 + $0x38] sm:$0xff] %v650_v47   ;;  %v655_v58 = vpack.c.bf16 %v305_v48, %v304_v42  ;;  %v308_v59 = vmax.f32 %v276_v49, 0.0  ;;  %v278_v60 = vadd.f32 %v796_v38, %v242_v50  ;;  %v244_v61 = vmul.f32 %v778_v20, %v208_v46 }
  0x3a   : > { %v660_v63 = vpack.c.bf16 %v307_v53, %v306_v52  ;;  %v309_v0 = vmax.f32 %v277_v54, 0.0  ;;  %v279_v1 = vadd.f32 %v796_v38, %v243_v55  ;;  %v245_v2 = vmul.f32 %v778_v20, %v209_v51 }
  0x3b   : > { %699 = vst [vmem:[%s817_s29 + $0x40] sm:$0xff] %v655_v58   ;;  %v310_v4 = vmax.f32 %v278_v60, 0.0  ;;  %v280_v5 = vadd.f32 %v796_v38, %v244_v61  ;;  %v246_v6 = vmul.f32 %v778_v20, %v210_v56  ;;  %v247_v7 = vmul.f32 %v778_v20, %v211_v57 }
  0x3c   : > { %700 = vst [vmem:[%s817_s29 + $0x48] sm:$0xff] %v660_v63   ;;  %v665_v9 = vpack.c.bf16 %v309_v0, %v308_v59  ;;  %v311_v10 = vmax.f32 %v279_v1, 0.0  ;;  %v281_v11 = vadd.f32 %v796_v38, %v245_v2  ;;  %v248_v12 = vmul.f32 %v778_v20, %v212_v62 }
  0x3d   : > { %v312_v14 = vmax.f32 %v280_v5, 0.0  ;;  %v282_v15 = vadd.f32 %v796_v38, %v246_v6  ;;  %v283_v16 = vadd.f32 %v796_v38, %v247_v7  ;;  %v249_v17 = vmul.f32 %v778_v20, %v213_v3 }
  0x3e   : > { %701 = vst [vmem:[%s817_s29 + $0x50] sm:$0xff] %v665_v9   ;;  %v670_v18 = vpack.c.bf16 %v311_v10, %v310_v4  ;;  %v313_v19 = vmax.f32 %v281_v11, 0.0  ;;  %v284_v21 = vadd.f32 %v796_v38, %v248_v12  ;;  %v250_v22 = vmul.f32 %v778_v20, %v214_v8 }
  0x3f   : > { %v314_v23 = vmax.f32 %v282_v15, 0.0  ;;  %v315_v24 = vmax.f32 %v283_v16, 0.0  ;;  %v285_v25 = vadd.f32 %v796_v38, %v249_v17  ;;  %v251_v26 = vmul.f32 %v778_v20, %v215_v13 }
  0x40   : > { %702 = vst [vmem:[%s817_s29 + $0x58] sm:$0xff] %v670_v18   ;;  %v675_v27 = vpack.c.bf16 %v313_v19, %v312_v14  ;;  %v316_v28 = vmax.f32 %v284_v21, 0.0  ;;  %v286_v29 = vadd.f32 %v796_v38, %v250_v22 }
  0x41   : > { %v680_v30 = vpack.c.bf16 %v315_v24, %v314_v23  ;;  %v317_v31 = vmax.f32 %v285_v25, 0.0  ;;  %v287_v32 = vadd.f32 %v796_v38, %v251_v26 }
  0x42   : > { %703 = vst [vmem:[%s817_s29 + $0x60] sm:$0xff] %v675_v27   ;;  %v318_v33 = vmax.f32 %v286_v29, 0.0 }
  0x43   : > { %704 = vst [vmem:[%s817_s29 + $0x68] sm:$0xff] %v680_v30   ;;  %v685_v34 = vpack.c.bf16 %v317_v31, %v316_v28  ;;  %v319_v35 = vmax.f32 %v287_v32, 0.0 }
  0x45   : > { %705 = vst [vmem:[%s817_s29 + $0x70] sm:$0xff] %v685_v34   ;;  %v690_v36 = vpack.c.bf16 %v319_v35, %v318_v33 }
  0x47   : > { %706 = vst [vmem:[%s817_s29 + $0x78] sm:$0xff] %v690_v36  }
  0x48 PF: > { %s13_s12 = sadd.s32 1, %s723_s12  }
  0x49   : > { %p10_p4 = scmp.ge.s32.totalorder %s13_s12, 4  }
  0x4b   :  { %12 = sbr.rel (!%p10_p4) target bundleno = 1 (0x1), region = 62 }

// kernel: basic_block_forward.7
= control target key start
LH: loop header
LB: loop body
LE: loop exit
PB: predicated region body
PF: predicated region fallthrough
CT: control target
= control target key end

     0   :  { %s589_s15 = smov 0   ;;  %s796_s0 = inlined_call_operand.vmem [shape: f32[2,16,16,128], index: 0, kind: input, shape index: {}]   ;;  %s797_s1 = inlined_call_operand.vmem [shape: f32[2,128], index: 1, kind: input, shape index: {}]   ;;  %s798_s2 = inlined_call_operand.vmem [shape: f32[2,128], index: 2, kind: input, shape index: {}]   ;;  %s799_s3 = inlined_call_operand.vmem [shape: f32[2,16,16,128], index: 3, kind: input, shape index: {}]   ;;  %s800_s4 = inlined_call_operand.vmem [shape: f32[2,16,16,128], index: 4, kind: output, shape index: {}]  }
   0x1 LB: > { %s530_s16 = sadd.s32 4294967295, %s562_s15   ;;  %p534_p0 = scmp.ge.s32.totalorder %s562_s15, 1  ;;  %s562_s15 = sphi %s589_s15, %s14_s15  }
   0x2   : > { %p172_p1 = scmp.lt.s32.totalorder %s562_s15, 3 }
   0x4   : > { %p173_p2 = pnand %p534_p0, %p172_p1 }
   0x5   : > { %p203_p3 = scmp.lt.s32.totalorder (!%p173_p2), %s530_s16, 1 }
   0x6   : > { %176 = sbr.rel (%p173_p2) target bundleno = 77 (0x4d), region = 36 }
   0xb   : > { %v218_v0 = vld [vmem:[%s797_s1] sm:$0x1]  ;;  %v220_v1 = vld [vmem:[%s797_s1 + $0x1] sm:$0x1]  ;;  %s802_s16 = smov (!%p203_p3, %s530_s16), 1  ;;  %v263_v7 = vlaneseq }
   0xc   : > { %v219_v2 = vmul.f32 0.001953125, %v218_v0  ;;  %v221_v3 = vmul.f32 0.001953125, %v220_v1  ;;  %s603_s21 = sshll.u32 %s802_s16, 8  ;;  %v224_v9 = vld [vmem:[%s798_s2] sm:$0x1] }
   0xd   : > { %v264_v8 = vshrl.u32 %v263_v7, 7  ;;  %s609_s24 = scalar_lea.vmem %s796_s0, %s603_s21  ;;  %v228_v13 = vld [vmem:[%s798_s2 + $0x1] sm:$0x1]  ;;  %s631_s5 = scalar_lea.vmem %s799_s3, %s603_s21 }
   0xe   : > { %v222_v4 = vmul.f32 %v219_v2, %v219_v2  ;;  %v231_v14 = vld [vmem:[%s609_s24] sm:$0xff]  ;;  %v232_v15 = vld [vmem:[%s609_s24 + $0x8] sm:$0xff]  ;;  %v233_v16 = vld [vmem:[%s609_s24 + $0x10] sm:$0xff]  ;;  %s675_s8 = scalar_lea.vmem %s800_s4, %s603_s21 }
   0xf   : > { %v265_v10 = vsub.s32 0, %v264_v8  ;;  %v234_v17 = vld [vmem:[%s609_s24 + $0x18] sm:$0xff]  ;;  %v235_v18 = vld [vmem:[%s609_s24 + $0x20] sm:$0xff]  ;;  %v236_v21 = vld [vmem:[%s609_s24 + $0x28] sm:$0xff] }
  0x10   : > { %v223_v5 = vsub.f32 %v221_v3, %v222_v4  ;;  %v237_v22 = vld [vmem:[%s609_s24 + $0x30] sm:$0xff]  ;;  %v238_v23 = vld [vmem:[%s609_s24 + $0x38] sm:$0xff]  ;;  %v239_v24 = vld [vmem:[%s609_s24 + $0x40] sm:$0xff] }
  0x11   : > { %v240_v25 = vld [vmem:[%s609_s24 + $0x48] sm:$0xff]  ;;  %v241_v26 = vld [vmem:[%s609_s24 + $0x50] sm:$0xff]  ;;  %v242_v31 = vld [vmem:[%s609_s24 + $0x58] sm:$0xff] }
  0x12   : > { %v225_v6 = vadd.f32 1e-05, %v223_v5  ;;  %v243_v32 = vld [vmem:[%s609_s24 + $0x60] sm:$0xff]  ;;  %v244_v33 = vld [vmem:[%s609_s24 + $0x68] sm:$0xff]  ;;  %v337_v44 = vld [vmem:[%s631_s5 + $0x10] sm:$0xff] }
  0x13   : > { %v335_v39 = vld [vmem:[%s631_s5] sm:$0xff]  ;;  %v336_v40 = vld [vmem:[%s631_s5 + $0x8] sm:$0xff]  ;;  %v338_v45 = vld [vmem:[%s631_s5 + $0x18] sm:$0xff] }
  0x14   : > { %554 = vrsqrt.f32 %v225_v6  ;;  %v339_v46 = vld [vmem:[%s631_s5 + $0x20] sm:$0xff]  ;;  %v340_v55 = vld [vmem:[%s631_s5 + $0x28] sm:$0xff]  ;;  %v341_v56 = vld [vmem:[%s631_s5 + $0x30] sm:$0xff] }
  0x15   : > { %v342_v57 = vld [vmem:[%s631_s5 + $0x38] sm:$0xff]  ;;  %v343_v6 = vld [vmem:[%s631_s5 + $0x40] sm:$0xff]  ;;  %v344_v7 = vld [vmem:[%s631_s5 + $0x48] sm:$0xff] }
  0x21   : > { %v555_v11 = vpop.eup %554 }
  0x22   : > { %v227_v12 = vmul.f32 %v555_v11, %v224_v9 }
  0x24   : > { %v229_v19 = vmul.f32 %v227_v12, %v219_v2  ;;  %v622_v20 = vrot.slane %v227_v12, %v265_v10  ;;  %v245_v12 = vld [vmem:[%s609_s24 + $0x70] sm:$0xff] }
  0x26   : > { %v230_v27 = vsub.f32 %v228_v13, %v229_v19  ;;  %v267_v28 = vmul.f32 %v622_v20, %v231_v14  ;;  %v268_v29 = vmul.f32 %v622_v20, %v232_v15  ;;  %v269_v30 = vmul.f32 %v622_v20, %v233_v16  ;;  %v246_v13 = vld [vmem:[%s609_s24 + $0x78] sm:$0xff] }
  0x27   : > { %v270_v34 = vmul.f32 %v622_v20, %v234_v17  ;;  %v271_v35 = vmul.f32 %v622_v20, %v235_v18  ;;  %v272_v36 = vmul.f32 %v622_v20, %v236_v21  ;;  %v273_v37 = vmul.f32 %v622_v20, %v237_v22  ;;  %v345_v18 = vld [vmem:[%s631_s5 + $0x50] sm:$0xff]  ;;  %v346_v19 = vld [vmem:[%s631_s5 + $0x58] sm:$0xff] }
  0x28   : > { %v646_v38 = vrot.slane %v230_v27, %v265_v10  ;;  %v274_v41 = vmul.f32 %v622_v20, %v238_v23  ;;  %v275_v42 = vmul.f32 %v622_v20, %v239_v24  ;;  %v276_v43 = vmul.f32 %v622_v20, %v240_v25  ;;  %v347_v25 = vld [vmem:[%s631_s5 + $0x60] sm:$0xff] }
  0x29   : > { %v277_v47 = vmul.f32 %v622_v20, %v241_v26  ;;  %v278_v48 = vmul.f32 %v622_v20, %v242_v31  ;;  %v279_v49 = vmul.f32 %v622_v20, %v243_v32  ;;  %v280_v50 = vmul.f32 %v622_v20, %v244_v33  ;;  %v348_v26 = vld [vmem:[%s631_s5 + $0x68] sm:$0xff] }
  0x2a   : > { %v303_v51 = vadd.f32 %v646_v38, %v267_v28  ;;  %v304_v52 = vadd.f32 %v646_v38, %v268_v29  ;;  %v305_v53 = vadd.f32 %v646_v38, %v269_v30  ;;  %v306_v54 = vadd.f32 %v646_v38, %v270_v34 }
  0x2b   : > { %v307_v58 = vadd.f32 %v646_v38, %v271_v35  ;;  %v308_v59 = vadd.f32 %v646_v38, %v272_v36  ;;  %v309_v60 = vadd.f32 %v646_v38, %v273_v37  ;;  %v310_v61 = vadd.f32 %v646_v38, %v274_v41  ;;  %v349_v35 = vld [vmem:[%s631_s5 + $0x70] sm:$0xff]  ;;  %v350_v36 = vld [vmem:[%s631_s5 + $0x78] sm:$0xff]  ;;  %v247_v37 = vld [vmem:[%s609_s24 + $0x80] sm:$0xff] }
  0x2c   : > { %v367_v62 = vadd.f32 %v335_v39, %v303_v51  ;;  %v368_v63 = vadd.f32 %v336_v40, %v304_v52  ;;  %v369_v0 = vadd.f32 %v337_v44, %v305_v53  ;;  %v370_v1 = vadd.f32 %v338_v45, %v306_v54  ;;  %v249_v44 = vld [vmem:[%s609_s24 + $0x90] sm:$0xff]  ;;  %v250_v45 = vld [vmem:[%s609_s24 + $0x98] sm:$0xff]  ;;  %v252_v51 = vld [vmem:[%s609_s24 + $0xa8] sm:$0xff] }
  0x2d   : > { %v371_v2 = vadd.f32 %v339_v46, %v307_v58  ;;  %v372_v3 = vadd.f32 %v340_v55, %v308_v59  ;;  %v373_v4 = vadd.f32 %v341_v56, %v309_v60  ;;  %v374_v5 = vadd.f32 %v342_v57, %v310_v61  ;;  %v351_v57 = vld [vmem:[%s631_s5 + $0x80] sm:$0xff]  ;;  %v253_v61 = vld [vmem:[%s609_s24 + $0xb0] sm:$0xff] }
  0x2e   : > { %v399_v8 = vmax.f32 %v367_v62, 0.0  ;;  %v400_v9 = vmax.f32 %v368_v63, 0.0  ;;  %v401_v10 = vmax.f32 %v369_v0, 0.0  ;;  %v402_v11 = vmax.f32 %v370_v1, 0.0  ;;  %v254_v62 = vld [vmem:[%s609_s24 + $0xb8] sm:$0xff]  ;;  %v352_v1 = vld [vmem:[%s631_s5 + $0x88] sm:$0xff] }
  0x2f   : > { %v403_v14 = vmax.f32 %v371_v2, 0.0  ;;  %v404_v15 = vmax.f32 %v372_v3, 0.0  ;;  %v405_v16 = vmax.f32 %v373_v4, 0.0  ;;  %v406_v17 = vmax.f32 %v374_v5, 0.0  ;;  %v353_v2 = vld [vmem:[%s631_s5 + $0x90] sm:$0xff]  ;;  %v354_v3 = vld [vmem:[%s631_s5 + $0x98] sm:$0xff] }
  0x30   : > { %431 = vst [vmem:[%s675_s8] sm:$0xff] %v399_v8  ;;  %432 = vst [vmem:[%s675_s8 + $0x8] sm:$0xff] %v400_v9  ;;  %v311_v21 = vadd.f32 %v646_v38, %v275_v42  ;;  %v312_v22 = vadd.f32 %v646_v38, %v276_v43  ;;  %v313_v23 = vadd.f32 %v646_v38, %v277_v47  ;;  %v248_v43 = vld [vmem:[%s609_s24 + $0x88] sm:$0xff] }
  0x31   : > { %433 = vst [vmem:[%s675_s8 + $0x10] sm:$0xff] %v401_v10  ;;  %434 = vst [vmem:[%s675_s8 + $0x18] sm:$0xff] %v402_v11  ;;  %v314_v24 = vadd.f32 %v646_v38, %v278_v48  ;;  %v315_v27 = vadd.f32 %v646_v38, %v279_v49  ;;  %v316_v28 = vadd.f32 %v646_v38, %v280_v50  ;;  %v251_v50 = vld [vmem:[%s609_s24 + $0xa0] sm:$0xff]  ;;  %v356_v11 = vld [vmem:[%s631_s5 + $0xa8] sm:$0xff] }
  0x32   : > { %435 = vst [vmem:[%s675_s8 + $0x20] sm:$0xff] %v403_v14  ;;  %436 = vst [vmem:[%s675_s8 + $0x28] sm:$0xff] %v404_v15  ;;  %v281_v29 = vmul.f32 %v622_v20, %v245_v12  ;;  %v282_v30 = vmul.f32 %v622_v20, %v246_v13  ;;  %v375_v31 = vadd.f32 %v343_v6, %v311_v21  ;;  %v355_v10 = vld [vmem:[%s631_s5 + $0xa0] sm:$0xff]  ;;  %v357_v21 = vld [vmem:[%s631_s5 + $0xb0] sm:$0xff] }
  0x33   : > { %437 = vst [vmem:[%s675_s8 + $0x30] sm:$0xff] %v405_v16  ;;  %438 = vst [vmem:[%s675_s8 + $0x38] sm:$0xff] %v406_v17  ;;  %v376_v32 = vadd.f32 %v344_v7, %v312_v22  ;;  %v377_v33 = vadd.f32 %v345_v18, %v313_v23  ;;  %v378_v34 = vadd.f32 %v346_v19, %v314_v24  ;;  %v358_v22 = vld [vmem:[%s631_s5 + $0xb8] sm:$0xff]  ;;  %v255_v23 = vld [vmem:[%s609_s24 + $0xc0] sm:$0xff] }
  0x34   : > { %v379_v39 = vadd.f32 %v347_v25, %v315_v27  ;;  %v380_v40 = vadd.f32 %v348_v26, %v316_v28  ;;  %v317_v41 = vadd.f32 %v646_v38, %v281_v29  ;;  %v318_v42 = vadd.f32 %v646_v38, %v282_v30  ;;  %v256_v28 = vld [vmem:[%s609_s24 + $0xc8] sm:$0xff]  ;;  %v257_v29 = vld [vmem:[%s609_s24 + $0xd0] sm:$0xff]  ;;  %v258_v30 = vld [vmem:[%s609_s24 + $0xd8] sm:$0xff] }
  0x35   : > { %v407_v46 = vmax.f32 %v375_v31, 0.0  ;;  %v408_v47 = vmax.f32 %v376_v32, 0.0  ;;  %v409_v48 = vmax.f32 %v377_v33, 0.0  ;;  %v410_v49 = vmax.f32 %v378_v34, 0.0 }
  0x36   : > { %v411_v52 = vmax.f32 %v379_v39, 0.0  ;;  %v412_v53 = vmax.f32 %v380_v40, 0.0  ;;  %v381_v54 = vadd.f32 %v349_v35, %v317_v41  ;;  %v382_v55 = vadd.f32 %v350_v36, %v318_v42  ;;  %v259_v35 = vld [vmem:[%s609_s24 + $0xe0] sm:$0xff]  ;;  %v260_v36 = vld [vmem:[%s609_s24 + $0xe8] sm:$0xff] }
  0x37   : > { %439 = vst [vmem:[%s675_s8 + $0x40] sm:$0xff] %v407_v46  ;;  %440 = vst [vmem:[%s675_s8 + $0x48] sm:$0xff] %v408_v47  ;;  %v283_v56 = vmul.f32 %v622_v20, %v247_v37  ;;  %v284_v58 = vmul.f32 %v622_v20, %v248_v43  ;;  %v285_v59 = vmul.f32 %v622_v20, %v249_v44  ;;  %v359_v43 = vld [vmem:[%s631_s5 + $0xc0] sm:$0xff]  ;;  %v261_v47 = vld [vmem:[%s609_s24 + $0xf0] sm:$0xff] }
  0x38   : > { %441 = vst [vmem:[%s675_s8 + $0x50] sm:$0xff] %v409_v48  ;;  %442 = vst [vmem:[%s675_s8 + $0x58] sm:$0xff] %v410_v49  ;;  %v286_v60 = vmul.f32 %v622_v20, %v250_v45  ;;  %v413_v63 = vmax.f32 %v381_v54, 0.0  ;;  %v414_v0 = vmax.f32 %v382_v55, 0.0  ;;  %v287_v4 = vmul.f32 %v622_v20, %v251_v50  ;;  %v262_v48 = vld [vmem:[%s609_s24 + $0xf8] sm:$0xff] }
  0x39   : > { %443 = vst [vmem:[%s675_s8 + $0x60] sm:$0xff] %v411_v52  ;;  %444 = vst [vmem:[%s675_s8 + $0x68] sm:$0xff] %v412_v53  ;;  %v288_v5 = vmul.f32 %v622_v20, %v252_v51  ;;  %v319_v6 = vadd.f32 %v646_v38, %v283_v56  ;;  %v320_v7 = vadd.f32 %v646_v38, %v284_v58  ;;  %v360_v51 = vld [vmem:[%s631_s5 + $0xc8] sm:$0xff]  ;;  %v361_v52 = vld [vmem:[%s631_s5 + $0xd0] sm:$0xff] }
  0x3a   : > { %v321_v8 = vadd.f32 %v646_v38, %v285_v59  ;;  %v322_v9 = vadd.f32 %v646_v38, %v286_v60  ;;  %445 = vst [vmem:[%s675_s8 + $0x70] sm:$0xff] %v413_v63  ;;  %446 = vst [vmem:[%s675_s8 + $0x78] sm:$0xff] %v414_v0  ;;  %v323_v12 = vadd.f32 %v646_v38, %v287_v4  ;;  %v362_v53 = vld [vmem:[%s631_s5 + $0xd8] sm:$0xff]  ;;  %v363_v60 = vld [vmem:[%s631_s5 + $0xe0] sm:$0xff] }
  0x3b   : > { %v324_v13 = vadd.f32 %v646_v38, %v288_v5  ;;  %v289_v14 = vmul.f32 %v622_v20, %v253_v61  ;;  %v290_v15 = vmul.f32 %v622_v20, %v254_v62  ;;  %v383_v16 = vadd.f32 %v351_v57, %v319_v6  ;;  %v364_v61 = vld [vmem:[%s631_s5 + $0xe8] sm:$0xff]  ;;  %v365_v6 = vld [vmem:[%s631_s5 + $0xf0] sm:$0xff] }
  0x3c   : > { %v384_v17 = vadd.f32 %v352_v1, %v320_v7  ;;  %v385_v18 = vadd.f32 %v353_v2, %v321_v8  ;;  %v386_v19 = vadd.f32 %v354_v3, %v322_v9  ;;  %v387_v24 = vadd.f32 %v355_v10, %v323_v12  ;;  %v366_v7 = vld [vmem:[%s631_s5 + $0xf8] sm:$0xff] }
  0x3d   : > { %v388_v25 = vadd.f32 %v356_v11, %v324_v13  ;;  %v325_v26 = vadd.f32 %v646_v38, %v289_v14  ;;  %v326_v27 = vadd.f32 %v646_v38, %v290_v15  ;;  %v415_v31 = vmax.f32 %v383_v16, 0.0 }
  0x3e   : > { %v416_v32 = vmax.f32 %v384_v17, 0.0  ;;  %v417_v33 = vmax.f32 %v385_v18, 0.0  ;;  %v418_v34 = vmax.f32 %v386_v19, 0.0  ;;  %v419_v37 = vmax.f32 %v387_v24, 0.0 }
  0x3f   : > { %v420_v39 = vmax.f32 %v388_v25, 0.0  ;;  %v389_v40 = vadd.f32 %v357_v21, %v325_v26  ;;  %v390_v41 = vadd.f32 %v358_v22, %v326_v27  ;;  %447 = vst [vmem:[%s675_s8 + $0x80] sm:$0xff] %v415_v31  ;;  %v291_v42 = vmul.f32 %v622_v20, %v255_v23 }
  0x40   : > { %448 = vst [vmem:[%s675_s8 + $0x88] sm:$0xff] %v416_v32  ;;  %449 = vst [vmem:[%s675_s8 + $0x90] sm:$0xff] %v417_v33  ;;  %v292_v44 = vmul.f32 %v622_v20, %v256_v28  ;;  %v293_v45 = vmul.f32 %v622_v20, %v257_v29  ;;  %v294_v46 = vmul.f32 %v622_v20, %v258_v30 }
  0x41   : > { %450 = vst [vmem:[%s675_s8 + $0x98] sm:$0xff] %v418_v34  ;;  %451 = vst [vmem:[%s675_s8 + $0xa0] sm:$0xff] %v419_v37  ;;  %v421_v49 = vmax.f32 %v389_v40, 0.0  ;;  %v422_v50 = vmax.f32 %v390_v41, 0.0  ;;  %v295_v54 = vmul.f32 %v622_v20, %v259_v35  ;;  %v296_v55 = vmul.f32 %v622_v20, %v260_v36 }
  0x42   : > { %452 = vst [vmem:[%s675_s8 + $0xa8] sm:$0xff] %v420_v39  ;;  %v327_v56 = vadd.f32 %v646_v38, %v291_v42  ;;  %v328_v57 = vadd.f32 %v646_v38, %v292_v44  ;;  %v329_v58 = vadd.f32 %v646_v38, %v293_v45  ;;  %v330_v59 = vadd.f32 %v646_v38, %v294_v46 }
  0x43   : > { %453 = vst [vmem:[%s675_s8 + $0xb0] sm:$0xff] %v421_v49  ;;  %454 = vst [vmem:[%s675_s8 + $0xb8] sm:$0xff] %v422_v50  ;;  %v331_v62 = vadd.f32 %v646_v38, %v295_v54  ;;  %v332_v63 = vadd.f32 %v646_v38, %v296_v55  ;;  %v297_v0 = vmul.f32 %v622_v20, %v261_v47 }
  0x44   : > { %v298_v1 = vmul.f32 %v622_v20, %v262_v48  ;;  %v391_v2 = vadd.f32 %v359_v43, %v327_v56  ;;  %v392_v3 = vadd.f32 %v360_v51, %v328_v57  ;;  %v393_v4 = vadd.f32 %v361_v52, %v329_v58 }
  0x45   : > { %v394_v5 = vadd.f32 %v362_v53, %v330_v59  ;;  %v395_v8 = vadd.f32 %v363_v60, %v331_v62  ;;  %v396_v9 = vadd.f32 %v364_v61, %v332_v63  ;;  %v333_v10 = vadd.f32 %v646_v38, %v297_v0 }
  0x46   : > { %v334_v11 = vadd.f32 %v646_v38, %v298_v1  ;;  %v423_v12 = vmax.f32 %v391_v2, 0.0  ;;  %v424_v20 = vmax.f32 %v392_v3, 0.0  ;;  %v425_v13 = vmax.f32 %v393_v4, 0.0 }
  0x47   : > { %v426_v14 = vmax.f32 %v394_v5, 0.0  ;;  %v427_v15 = vmax.f32 %v395_v8, 0.0  ;;  %v428_v16 = vmax.f32 %v396_v9, 0.0  ;;  %v397_v17 = vadd.f32 %v365_v6, %v333_v10 }
  0x48   : > { %v398_v18 = vadd.f32 %v366_v7, %v334_v11  ;;  %455 = vst [vmem:[%s675_s8 + $0xc0] sm:$0xff] %v423_v12  ;;  %456 = vst [vmem:[%s675_s8 + $0xc8] sm:$0xff] %v424_v20 }
  0x49   : > { %457 = vst [vmem:[%s675_s8 + $0xd0] sm:$0xff] %v425_v13  ;;  %458 = vst [vmem:[%s675_s8 + $0xd8] sm:$0xff] %v426_v14  ;;  %v429_v19 = vmax.f32 %v397_v17, 0.0 }
  0x4a   : > { %459 = vst [vmem:[%s675_s8 + $0xe0] sm:$0xff] %v427_v15  ;;  %460 = vst [vmem:[%s675_s8 + $0xe8] sm:$0xff] %v428_v16  ;;  %v430_v21 = vmax.f32 %v398_v18, 0.0 }
  0x4b   : > { %461 = vst [vmem:[%s675_s8 + $0xf0] sm:$0xff] %v429_v19 }
  0x4c   : > { %462 = vst [vmem:[%s675_s8 + $0xf8] sm:$0xff] %v430_v21 }
  0x4d PF: > { %s14_s15 = sadd.s32 1, %s562_s15  }
  0x4e   : > { %p11_p4 = scmp.ge.s32.totalorder %s14_s15, 4  }
  0x50   :  { %13 = sbr.rel (!%p11_p4) target bundleno = 1 (0x1), region = 69 }

// kernel: basic_block_forward.4
= control target key start
LH: loop header
LB: loop body
LE: loop exit
PB: predicated region body
PF: predicated region fallthrough
CT: control target
= control target key end

     0   :  { %s6623_s12 = smov 0   ;;  %s9313_s0 = inlined_call_operand.vmem [shape: bf16[2,18,18,128], index: 0, kind: input, shape index: {}]   ;;  %s9314_s1 = inlined_call_operand.vmem [shape: bf16[9,128,128], index: 1, kind: input, shape index: {}]   ;;  %s9315_s2 = inlined_call_operand.vmem [shape: f32[2,16,16,128], index: 2, kind: output, shape index: {0}]   ;;  %s9316_s3 = inlined_call_operand.vmem [shape: f32[2,128], index: 3, kind: output, shape index: {1}]  }
   0x1 LB: > { %s6629_s13 = sadd.s32 4294967295, %s6600_s12   ;;  %p5198_p0 = scmp.ge.s32.totalorder %s6600_s12, 1  ;;  %s6600_s12 = sphi %s6623_s12, %s14_s12  }
   0x2   : > { %p135_p1 = scmp.lt.s32.totalorder %s6600_s12, 3 }
   0x4   : > { %p136_p2 = pnand %p5198_p0, %p135_p1 }
   0x6   : > { %139 = sbr.rel (%p136_p2) target bundleno = 592 (0x250), region = 28 }
   0xb   : > { %p159_p3 = scmp.lt.s32.totalorder %s6629_s13, 1  ;;  %p5202_p4 = scmp.ne.s32.totalorder %s6629_s13, 0 }
   0xd   : > { %s160_s14 = scalar_select %p159_p3, %s6629_s13, 1 }
   0xe   : > { %173 = sbr.rel (%p5202_p4) target bundleno = 21 (0x15), region = 32 }
   0xf   : > { %s6455_s15 = smul.u32 216, %s160_s14  ;;  %s5790_s16 = sshll.u32 %s160_s14, 8 }
  0x10   : > { %s6638_s19 = scalar_lea.vmem %s9315_s2, %s5790_s16 }
  0x11   : > { %s6643_s22 = scalar_lea.vmem %s9313_s0, %s6455_s15 }
  0x13   : > { %v6602_v0 = vmov 0.0  }
  0x14   : > { %174 = vst [vmem:[#allocation2] sm:$0x3] %v6602_v0 }
  0x15 PF: > { %v6465_v1 = vld [vmem:[%s9314_s1 + $0x78] sm:$0xff]   ;;  %v6466_v2 = vld [vmem:[%s9314_s1 + $0x70] sm:$0xff]   ;;  %v6467_v3 = vld [vmem:[%s9314_s1 + $0x68] sm:$0xff]   ;;  %vm239_vm0 = vsmask.f32 3328  ;;  %vm1269_vm3 = vcmask 1042432  }
  0x16   : > { %6007 = vmatprep.subr.bf16.mxu0 %v6465_v1  ;;  %6439 = vmatprep.subr.bf16.mxu1 %v6465_v1  ;;  %v6468_v4 = vld [vmem:[%s9314_s1 + $0x60] sm:$0xff]   ;;  %v6665_v7 = vld [vmem:[%s6643_s22 + $0x8] sm:$0x1]  ;;  %vm240_vm1 = vsmask.f32 7440  ;;  %v6469_v18 = vld [vmem:[%s9314_s1 + $0x58] sm:$0xff]  }
  0x17   : > { %6008 = vmatpush3.bf16.msra.mxu0 %v6465_v1  ;;  %6447 = vmatpush3.bf16.msra.mxu1 %v6465_v1  ;;  %v6659_v5 = vld [vmem:[%s6643_s22] sm:$0xf]  ;;  %v6662_v6 = vld [vmem:[%s6643_s22 + $0x4] sm:$0xf]  ;;  %v262_v12 = vshll.u32 %v6665_v7, 16  ;;  %vm6684_vm2 = vmor %vm239_vm0, %vm240_vm1  ;;  %vm1270_vm4 = vcmask 1046532  }
  0x18   : > { %6009 = vmatprep.subr.bf16.mxu0 %v6466_v2  ;;  %6440 = vmatprep.subr.bf16.mxu1 %v6466_v2  ;;  %v243_v8 = vshrl.u32 %v6659_v5, 16  ;;  %v246_v9 = vshll.u32 %v6659_v5, 16  ;;  %v252_v10 = vshll.u32 %v6662_v6, 16  ;;  %v256_v11 = vshrl.u32 %v6662_v6, 16  ;;  %v191_v13 = vld [vmem:[%s6643_s22 + $0x60] sm:$0xf]  ;;  %vm6995_vm5 = vmor %vm1269_vm3, %vm1270_vm4 }
  0x19   : > { %v192_v16 = vld [vmem:[%s6643_s22 + $0x64] sm:$0xf]  ;;  %v231_v17 = vld [vmem:[%s6643_s22 + $0x68] sm:$0x1]  ;;  %v435_v22 = vshrl.u32 %v191_v13, 16  ;;  %v438_v24 = vshll.u32 %v191_v13, 16 }
  0x1a   : > { %v245_v14 = vrot.slane %v243_v8, 4  ;;  %v248_v15 = vrot.slane %v246_v9, 5  ;;  %v254_v19 = vrot.slane %v252_v10, 5  ;;  %v258_v20 = vrot.slane %v256_v11, 4  ;;  %v6680_v27 = vld [vmem:[%s6643_s22 + $0xc] sm:$0xf] }
  0x1b   : > { %6010 = vmatpush3.bf16.msra.mxu0 %v6466_v2  ;;  %6448 = vmatpush3.bf16.msra.mxu1 %v6466_v2  ;;  %v444_v25 = vshll.u32 %v192_v16, 16  ;;  %v448_v26 = vshrl.u32 %v192_v16, 16  ;;  %v264_v30 = vrot.slane %v262_v12, 5  ;;  %v437_v31 = vrot.slane %v435_v22, 4  ;;  %v6689_v33 = vld [vmem:[%s6643_s22 + $0x10] sm:$0xf] }
  0x1c   : > { %6011 = vmatprep.subr.bf16.mxu0 %v6467_v3  ;;  %6441 = vmatprep.subr.bf16.mxu1 %v6467_v3  ;;  %v249_v23 = vor.u32 %v248_v15, %v245_v14  ;;  %v259_v29 = vor.u32 %v258_v20, %v254_v19  ;;  %v454_v32 = vshll.u32 %v231_v17, 16  ;;  %v6470_v34 = vld [vmem:[%s9314_s1 + $0x50] sm:$0xff]   ;;  %v440_v36 = vrot.slane %v438_v24, 5  ;;  %v193_v48 = vld [vmem:[%s6643_s22 + $0x6c] sm:$0xf]  ;;  %v6472_v16 = vld [vmem:[%s9314_s1 + $0x40] sm:$0xff]  }
  0x1d   : > { %v446_v37 = vrot.slane %v444_v25, 5  ;;  %v450_v38 = vrot.slane %v448_v26, 4  ;;  %v6695_v41 = vld [vmem:[%s6643_s22 + $0x14] sm:$0x1]  ;;  %v267_v42 = vshrl.u32 %v6680_v27, 16  ;;  %v270_v43 = vshll.u32 %v6680_v27, 16 }
  0x1e   : > { %v250_v35 = vrot.slane %v249_v23, 4  ;;  %v260_v39 = vrot.slane %v259_v29, 4  ;;  %v456_v40 = vrot.slane %v454_v32, 5  ;;  %v441_v45 = vor.u32 %v440_v36, %v437_v31  ;;  %v194_v53 = vld [vmem:[%s6643_s22 + $0x70] sm:$0xf]  ;;  %v6471_v59 = vld [vmem:[%s9314_s1 + $0x48] sm:$0xff]  }
  0x1f   : > { %6012 = vmatpush3.bf16.msra.mxu0 %v6467_v3  ;;  %6449 = vmatpush3.bf16.msra.mxu1 %v6467_v3  ;;  %v451_v46 = vor.u32 %v450_v38, %v446_v37  ;;  %v276_v47 = vshll.u32 %v6689_v33, 16  ;;  %v269_v50 = vrot.slane %v267_v42, 4  ;;  %v272_v51 = vrot.slane %v270_v43, 5  ;;  %v232_v58 = vld [vmem:[%s6643_s22 + $0x74] sm:$0x1]  ;;  %v6473_v42 = vld [vmem:[%s9314_s1 + $0x38] sm:$0xff]  }
  0x20   : > { %6013 = vmatprep.subr.bf16.mxu0 %v6468_v4  ;;  %6442 = vmatprep.subr.bf16.mxu1 %v6468_v4  ;;  %v255_v44 = vsel %vm6684_vm2, %v250_v35, %v254_v19  ;;  %v265_v49 = vsel %vm6684_vm2, %v260_v39, %v264_v30  ;;  %v280_v52 = vshrl.u32 %v6689_v33, 16  ;;  %v442_v55 = vrot.slane %v441_v45, 4  ;;  %v6718_v15 = vld [vmem:[%s6643_s22 + $0x18] sm:$0xf]  ;;  %v6726_v20 = vld [vmem:[%s6643_s22 + $0x1c] sm:$0xf] }
  0x21   : > { %v5219_v54 = vcombine.low %v255_v44, %v265_v49  ;;  %v452_v56 = vrot.slane %v451_v46, 4  ;;  %v278_v57 = vrot.slane %v276_v47, 5  ;;  %v273_v60 = vor.u32 %v272_v51, %v269_v50  ;;  %v6731_v26 = vld [vmem:[%s6643_s22 + $0x20] sm:$0x1]  ;;  %v195_v35 = vld [vmem:[%s6643_s22 + $0x78] sm:$0xf] }
  0x22   : > { %v282_v61 = vrot.slane %v280_v52, 4  ;;  %v286_v62 = vshll.u32 %v6695_v41, 16  ;;  %v447_v0 = vsel %vm6684_vm2, %v442_v55, %v446_v37  ;;  %v459_v2 = vshrl.u32 %v193_v48, 16  ;;  %v6474_v43 = vld [vmem:[%s9314_s1 + $0xb8] sm:$0xff]   ;;  %v233_v50 = vld [vmem:[%s6643_s22 + $0x80] sm:$0x1] }
  0x23   : > { %6014 = vmatpush3.bf16.msra.mxu0 %v6468_v4  ;;  %6450 = vmatpush3.bf16.msra.mxu1 %v6468_v4  ;;  %v457_v1 = vsel %vm6684_vm2, %v452_v56, %v456_v40  ;;  %v462_v3 = vshll.u32 %v193_v48, 16  ;;  %v274_v8 = vrot.slane %v273_v60, 4  ;;  %v468_v13 = vshll.u32 %v194_v53, 16  ;;  %v6740_v40 = vld [vmem:[%s6643_s22 + $0x7c] sm:$0xf]  ;;  %v6476_v60 = vld [vmem:[%s9314_s1 + $0xb0] sm:$0xff]  }
  0x24   : > { %6015 = vmatprep.subr.bf16.mxu0 %v6469_v18  ;;  %6443 = vmatprep.subr.bf16.mxu1 %v6469_v18  ;;  %v5227_v4 = vcombine.low %v447_v0, %v457_v1  ;;  %v283_v9 = vor.u32 %v282_v61, %v278_v57  ;;  %v288_v10 = vrot.slane %v286_v62, 5  ;;  %v461_v11 = vrot.slane %v459_v2, 4  ;;  %v6767_v1 = vld [vmem:[%s6643_s22 + $0x28] sm:$0xf]  ;;  %p5787_p5 = scmp.ne.s32.totalorder %s6629_s13, 1 }
  0x25   : > { %6023 = vmatprep.mubr.bf16.mxu0 %v5219_v54  ;;  %v464_v12 = vrot.slane %v462_v3, 5  ;;  %v472_v14 = vshrl.u32 %v194_v53, 16  ;;  %v279_v17 = vsel %vm6684_vm2, %v274_v8, %v278_v57  ;;  %v478_v19 = vshll.u32 %v232_v58, 16  ;;  %v6475_v53 = vld [vmem:[%s9314_s1 + $0x30] sm:$0xff]   ;;  %v6758_v58 = vld [vmem:[%s6643_s22 + $0x24] sm:$0xf] }
  0x26   : > { %6039 = vmatprep.mubr.bf16.mxu1 %v5227_v4  ;;  %v470_v24 = vrot.slane %v468_v13, 5  ;;  %v291_v29 = vshrl.u32 %v6718_v15, 16  ;;  %v294_v32 = vshll.u32 %v6718_v15, 16  ;;  %v304_v46 = vshrl.u32 %v6726_v20, 16 }
  0x27   : > { %6016 = vmatpush3.bf16.msra.mxu0 %v6469_v18  ;;  %6451 = vmatpush3.bf16.msra.mxu1 %v6469_v18  ;;  %v284_v18 = vrot.slane %v283_v9, 4  ;;  %v465_v23 = vor.u32 %v464_v12, %v461_v11  ;;  %v474_v25 = vrot.slane %v472_v14, 4  ;;  %v480_v31 = vrot.slane %v478_v19, 5  ;;  %v6770_v9 = vld [vmem:[%s6643_s22 + $0x2c] sm:$0x1] }
  0x28   : > { %6017 = vmatprep.subr.bf16.mxu0 %v6470_v34  ;;  %6444 = vmatprep.subr.bf16.mxu1 %v6470_v34  ;;  %v293_v39 = vrot.slane %v291_v29, 4  ;;  %v296_v44 = vrot.slane %v294_v32, 5  ;;  %v310_v47 = vshll.u32 %v6731_v26, 16  ;;  %v483_v51 = vshrl.u32 %v195_v35, 16  ;;  %v6774_v14 = vld [vmem:[%s6643_s22 + $0x84] sm:$0xf] }
  0x29   : > { %v289_v30 = vsel %vm6684_vm2, %v284_v18, %v288_v10  ;;  %v466_v37 = vrot.slane %v465_v23, 4  ;;  %v475_v38 = vor.u32 %v474_v25, %v470_v24  ;;  %v486_v52 = vshll.u32 %v195_v35, 16  ;;  %v6781_v23 = vld [vmem:[%s6643_s22 + $0x88] sm:$0xf] }
  0x2a   : > { %v5220_v36 = vcombine.low %v279_v17, %v289_v30  ;;  %v297_v54 = vor.u32 %v296_v44, %v293_v39  ;;  %v306_v55 = vrot.slane %v304_v46, 4  ;;  %v312_v56 = vrot.slane %v310_v47, 5 }
  0x2b   : > { %6018 = vmatpush3.bf16.msra.mxu0 %v6470_v34  ;;  %6452 = vmatpush3.bf16.msra.mxu1 %v6470_v34  ;;  %v300_v34 = vshll.u32 %v6726_v20, 16  ;;  %v471_v48 = vsel %vm6684_vm2, %v466_v37, %v470_v24  ;;  %v476_v49 = vrot.slane %v475_v38, 4  ;;  %v492_v57 = vshll.u32 %v6740_v40, 16  ;;  %v6790_v37 = vld [vmem:[%s6643_s22 + $0x8c] sm:$0x1] }
  0x2c   : > { %6019 = vmatprep.subr.bf16.mxu0 %v6471_v59  ;;  %6445 = vmatprep.subr.bf16.mxu1 %v6471_v59  ;;  %v485_v61 = vrot.slane %v483_v51, 4  ;;  %v488_v62 = vrot.slane %v486_v52, 5  ;;  %v496_v0 = vshrl.u32 %v6740_v40, 16  ;;  %v298_v3 = vrot.slane %v297_v54, 4  ;;  %v6478_v38 = vld [vmem:[%s9314_s1 + $0xa8] sm:$0xff]  }
  0x2d   : > { %v302_v45 = vrot.slane %v300_v34, 5  ;;  %v494_v8 = vrot.slane %v492_v57, 5  ;;  %v502_v12 = vshll.u32 %v233_v50, 16  ;;  %v315_v13 = vshrl.u32 %v6758_v58, 16  ;;  %v6805_v54 = vld [vmem:[%s6643_s22 + $0x30] sm:$0xf] }
  0x2e   : > { %v489_v10 = vor.u32 %v488_v62, %v485_v61  ;;  %v498_v11 = vrot.slane %v496_v0, 4  ;;  %v318_v18 = vshll.u32 %v6758_v58, 16  ;;  %v324_v19 = vshll.u32 %v6767_v1, 16  ;;  %v6814_v61 = vld [vmem:[%s6643_s22 + $0x34] sm:$0xf] }
  0x2f   : > { %6020 = vmatpush3.bf16.msra.mxu0 %v6471_v59  ;;  %6453 = vmatpush3.bf16.msra.mxu1 %v6471_v59  ;;  %v481_v59 = vsel %vm6684_vm2, %v476_v49, %v480_v31  ;;  %v307_v4 = vor.u32 %v306_v55, %v302_v45  ;;  %v504_v29 = vrot.slane %v502_v12, 5  ;;  %v317_v30 = vrot.slane %v315_v13, 4  ;;  %v6477_v31 = vld [vmem:[%s9314_s1 + $0x28] sm:$0xff]  }
  0x30   : > { %6021 = vmatprep.subr.bf16.mxu0 %v6472_v16  ;;  %6446 = vmatprep.subr.bf16.mxu1 %v6472_v16  ;;  %v5228_v2 = vcombine.low %v471_v48, %v481_v59  ;;  %v490_v24 = vrot.slane %v489_v10, 4  ;;  %v499_v25 = vor.u32 %v498_v11, %v494_v8  ;;  %v320_v34 = vrot.slane %v318_v18, 5 }
  0x31   : > { %v308_v17 = vrot.slane %v307_v4, 4  ;;  %v326_v35 = vrot.slane %v324_v19, 5  ;;  %v334_v44 = vshll.u32 %v6770_v9, 16  ;;  %v507_v47 = vshrl.u32 %v6774_v14, 16  ;;  %v6826_v19 = vld [vmem:[%s6643_s22 + $0x90] sm:$0xf] }
  0x32   : > { %v510_v48 = vshll.u32 %v6774_v14, 16  ;;  %v516_v51 = vshll.u32 %v6781_v23, 16  ;;  %v520_v52 = vshrl.u32 %v6781_v23, 16  ;;  %v339_v10 = vshrl.u32 %v6805_v54, 16 }
  0x33   : > { %6022 = vmatpush3.bf16.msra.mxu0 %v6472_v16  ;;  %6454 = vmatpush3.bf16.msra.mxu1 %v6472_v16  ;;  %v303_v16 = vsel %vm6684_vm2, %v298_v3, %v302_v45  ;;  %v313_v32 = vsel %vm6684_vm2, %v308_v17, %v312_v56  ;;  %v321_v45 = vor.u32 %v320_v34, %v317_v30  ;;  %v336_v50 = vrot.slane %v334_v44, 5  ;;  %v6822_v17 = vld [vmem:[%s6643_s22 + $0x38] sm:$0x1] }
  0x34   : > { %6055 = vmatprep.subr.bf16.mxu1 %v6473_v42  ;;  %6103 = vmatprep.subr.bf16.mxu0 %v6474_v43  ;;  %v5221_v39 = vcombine.low %v303_v16, %v313_v32  ;;  %v509_v59 = vrot.slane %v507_v47, 4  ;;  %v512_v62 = vrot.slane %v510_v48, 5  ;;  %v518_v0 = vrot.slane %v516_v51, 5  ;;  %v6832_v32 = vld [vmem:[%s6643_s22 + $0x94] sm:$0xf] }
  0x35   : > { %v322_v56 = vrot.slane %v321_v45, 4  ;;  %v526_v3 = vshll.u32 %v6790_v37, 16  ;;  %v342_v11 = vshll.u32 %v6805_v54, 16  ;;  %v348_v18 = vshll.u32 %v6814_v61, 16  ;;  %v6842_v45 = vld [vmem:[%s6643_s22 + $0x98] sm:$0x1] }
  0x36   : > { %6024 = vmatmul.mubr.bf16.vlgmr.msra.gmra.mxu0 %v5220_v36  ;;  %6040 = vmatmul.mubr.bf16.vlgmr.msra.gmra.mxu1 %v5228_v2  ;;  %v328_v36 = vshrl.u32 %v6767_v1, 16  ;;  %v522_v2 = vrot.slane %v520_v52, 4  ;;  %v513_v12 = vor.u32 %v512_v62, %v509_v59  ;;  %v352_v30 = vshrl.u32 %v6814_v61, 16  ;;  %v6483_v47 = vld [vmem:[%s9314_s1 + $0x10] sm:$0xff]   ;;  %v6855_v52 = vld [vmem:[%s6643_s22 + $0x3c] sm:$0xf] }
  0x37   : > { %6056 = vmatpush3.bf16.msra.mxu1 %v6473_v42  ;;  %6104 = vmatpush3.bf16.msra.mxu0 %v6474_v43  ;;  %v495_v42 = vsel %vm6684_vm2, %v490_v24, %v494_v8  ;;  %v500_v43 = vrot.slane %v499_v25, 4  ;;  %v327_v4 = vsel %vm6684_vm2, %v322_v56, %v326_v35  ;;  %v528_v16 = vrot.slane %v526_v3, 5  ;;  %v6484_v56 = vld [vmem:[%s9314_s1 + $0x90] sm:$0xff]  }
  0x38   : > { %6057 = vmatprep.subr.bf16.mxu1 %v6475_v53  ;;  %6105 = vmatprep.subr.bf16.mxu0 %v6476_v60  ;;  %v330_v46 = vrot.slane %v328_v36, 4  ;;  %v523_v13 = vor.u32 %v522_v2, %v518_v0  ;;  %v341_v25 = vrot.slane %v339_v10, 4  ;;  %v358_v44 = vshll.u32 %v6822_v17, 16  ;;  %v6868_v10 = vld [vmem:[%s6643_s22 + $0x9c] sm:$0xf] }
  0x39   : > { %v505_v49 = vsel %vm6684_vm2, %v500_v43, %v504_v29  ;;  %6027 = vmatprep.mubr.bf16.mxu0 %v5221_v39  ;;  %v344_v29 = vrot.slane %v342_v11, 5  ;;  %v6482_v39 = vld [vmem:[%s9314_s1 + $0x98] sm:$0xff]   ;;  %v354_v43 = vrot.slane %v352_v30, 4  ;;  %v540_v51 = vshll.u32 %v6832_v32, 16  ;;  %v6485_v30 = vld [vmem:[%s9314_s1 + $0x8] sm:$0xff]  }
  0x3a   : > { %v5229_v55 = vcombine.low %v495_v42, %v505_v49  ;;  %v331_v57 = vor.u32 %v330_v46, %v326_v35  ;;  %v514_v35 = vrot.slane %v513_v12, 4  ;;  %v524_v36 = vrot.slane %v523_v13, 4 }
  0x3b   : > { %6058 = vmatpush3.bf16.msra.mxu1 %v6475_v53  ;;  %6106 = vmatpush3.bf16.msra.mxu0 %v6476_v60  ;;  %v6479_v53 = vld [vmem:[%s9314_s1 + $0x20] sm:$0xff]   ;;  %v345_v42 = vor.u32 %v344_v29, %v341_v25  ;;  %v531_v46 = vshrl.u32 %v6826_v19, 16  ;;  %v542_v3 = vrot.slane %v540_v51, 5  ;;  %v550_v12 = vshll.u32 %v6842_v45, 16 }
  0x3c   : > { %6059 = vmatprep.subr.bf16.mxu1 %v6477_v31  ;;  %v6480_v60 = vld [vmem:[%s9314_s1 + $0xa0] sm:$0xff]   ;;  %6107 = vmatprep.subr.bf16.mxu0 %v6478_v38  ;;  %v332_v8 = vrot.slane %v331_v57, 4  ;;  %v519_v48 = vsel %vm6684_vm2, %v514_v35, %v518_v0  ;;  %v529_v49 = vsel %vm6684_vm2, %v524_v36, %v528_v16  ;;  %v360_v0 = vrot.slane %v358_v44, 5 }
  0x3d   : > { %6043 = vmatprep.mubr.bf16.mxu1 %v5229_v55  ;;  %v6858_v55 = vld [vmem:[%s6643_s22 + $0x40] sm:$0xf]  ;;  %v5230_v57 = vcombine.low %v519_v48, %v529_v49  ;;  %v346_v59 = vrot.slane %v345_v42, 4  ;;  %v363_v13 = vshrl.u32 %v6855_v52, 16  ;;  %v552_v35 = vrot.slane %v550_v12, 5  ;;  %v6486_v42 = vld [vmem:[%s9314_s1 + $0x88] sm:$0xff]  }
  0x3e   : > { %v337_v24 = vsel %vm6684_vm2, %v332_v8, %v336_v50  ;;  %v534_v50 = vshll.u32 %v6826_v19, 16  ;;  %v6865_v8 = vld [vmem:[%s6643_s22 + $0x44] sm:$0x1]  ;;  %v372_v25 = vshll.u32 %v6858_v55, 16  ;;  %v6877_v29 = vld [vmem:[%s6643_s22 + $0xa0] sm:$0xf] }
  0x3f   : > { %6060 = vmatpush3.bf16.msra.mxu1 %v6477_v31  ;;  %6108 = vmatpush3.bf16.msra.mxu0 %v6478_v38  ;;  %v6481_v31 = vld [vmem:[%s9314_s1 + $0x18] sm:$0xff]   ;;  %v5222_v34 = vcombine.low %v327_v4, %v337_v24  ;;  %v350_v38 = vrot.slane %v348_v18, 5  ;;  %v544_v4 = vshrl.u32 %v6832_v32, 16  ;;  %v366_v24 = vshll.u32 %v6855_v52, 16 }
  0x40   : > { %6061 = vmatprep.subr.bf16.mxu1 %v6479_v53  ;;  %6109 = vmatprep.subr.bf16.mxu0 %v6480_v60  ;;  %v536_v2 = vrot.slane %v534_v50, 5  ;;  %v365_v36 = vrot.slane %v363_v13, 4  ;;  %v374_v48 = vrot.slane %v372_v25, 5  ;;  %v382_v50 = vshll.u32 %v6865_v8, 16 }
  0x41   : > { %6028 = vmatmul.mubr.bf16.gmra.mxu0 %v5222_v34  ;;  %v355_v62 = vor.u32 %v354_v43, %v350_v38  ;;  %6044 = vmatmul.mubr.bf16.gmra.mxu1 %v5230_v57  ;;  %v351_v11 = vsel %vm6684_vm2, %v346_v59, %v350_v38  ;;  %v546_v18 = vrot.slane %v544_v4, 4  ;;  %v376_v38 = vshrl.u32 %v6858_v55, 16 }
  0x42   : > { %v555_v51 = vshrl.u32 %v6868_v10, 16  ;;  %vm5123_vm6 = vcmask 1040384  }
  0x43   : > { %6062 = vmatpush3.bf16.msra.mxu1 %v6479_v53  ;;  %6110 = vmatpush3.bf16.msra.mxu0 %v6480_v60  ;;  %v533_v53 = vrot.slane %v531_v46, 4  ;;  %v356_v60 = vrot.slane %v355_v62, 4  ;;  %v547_v44 = vor.u32 %v546_v18, %v542_v3  ;;  %v368_v46 = vrot.slane %v366_v24, 5  ;;  %v6893_v62 = vld [vmem:[%s6643_s22 + $0xa4] sm:$0x1] }
  0x44   : > { %6063 = vmatprep.subr.bf16.mxu1 %v6481_v31  ;;  %6111 = vmatprep.subr.bf16.mxu0 %v6482_v39  ;;  %v378_v49 = vrot.slane %v376_v38, 4  ;;  %v557_v4 = vrot.slane %v555_v51, 4  ;;  %v6907_v18 = vld [vmem:[%s6643_s22 + $0x4c] sm:$0xf] }
  0x45   : > { %v537_v16 = vor.u32 %v536_v2, %v533_v53  ;;  %v361_v34 = vsel %vm6684_vm2, %v356_v60, %v360_v0  ;;  %v548_v57 = vrot.slane %v547_v44, 4  ;;  %v369_v59 = vor.u32 %v368_v46, %v365_v36  ;;  %v6898_v60 = vld [vmem:[%s6643_s22 + $0x48] sm:$0xf] }
  0x46   : > { %v5223_v43 = vcombine.low %v351_v11, %v361_v34  ;;  %v558_v0 = vshll.u32 %v6868_v10, 16  ;;  %v379_v53 = vor.u32 %v378_v49, %v374_v48  ;;  %v384_v2 = vrot.slane %v382_v50, 5 }
  0x47   : > { %6064 = vmatpush3.bf16.msra.mxu1 %v6481_v31  ;;  %6112 = vmatpush3.bf16.msra.mxu0 %v6482_v39  ;;  %v538_v31 = vrot.slane %v537_v16, 4  ;;  %v564_v11 = vshll.u32 %v6877_v29, 16  ;;  %v553_v12 = vsel %vm6684_vm2, %v548_v57, %v552_v35  ;;  %v370_v13 = vrot.slane %v369_v59, 4 }
  0x48   : > { %6065 = vmatprep.subr.bf16.mxu1 %v6483_v47  ;;  %6113 = vmatprep.subr.bf16.mxu0 %v6484_v56  ;;  %v560_v16 = vrot.slane %v558_v0, 5  ;;  %v380_v25 = vrot.slane %v379_v53, 4  ;;  %v574_v36 = vshll.u32 %v6893_v62, 16  ;;  %v387_v44 = vshrl.u32 %v6898_v60, 16  ;;  %v6932_v53 = vld [vmem:[%s6643_s22 + $0xac] sm:$0xf] }
  0x49   : > { %6031 = vmatprep.mubr.bf16.mxu0 %v5223_v43  ;;  %v543_v39 = vsel %vm6684_vm2, %v538_v31, %v542_v3  ;;  %v6487_v3 = vld [vmem:[%s9314_s1] sm:$0xff]   ;;  %v566_v34 = vrot.slane %v564_v11, 5  ;;  %v375_v35 = vsel %vm6684_vm2, %v370_v13, %v374_v48  ;;  %v6916_v31 = vld [vmem:[%s6643_s22 + $0x50] sm:$0x1]  ;;  %v390_v50 = vshll.u32 %v6898_v60, 16  ;;  %v6929_v48 = vld [vmem:[%s9314_s1 + $0xf8] sm:$0xff]  }
  0x4a   : > { %v5231_v24 = vcombine.low %v543_v39, %v553_v12  ;;  %v561_v38 = vor.u32 %v560_v16, %v557_v4  ;;  %v385_v46 = vsel %vm6684_vm2, %v380_v25, %v384_v2  ;;  %v576_v49 = vrot.slane %v574_v36, 5  ;;  %v6924_v39 = vld [vmem:[%s6643_s22 + $0xa8] sm:$0xf]  ;;  %v6937_v2 = vld [vmem:[%s9314_s1 + $0x138] sm:$0xff]   ;;  %v6942_v13 = vld [vmem:[%s6643_s22 + $0xb0] sm:$0x1] }
  0x4b   : > { %6066 = vmatpush3.bf16.msra.mxu1 %v6483_v47  ;;  %6114 = vmatpush3.bf16.msra.mxu0 %v6484_v56  ;;  %v568_v47 = vshrl.u32 %v6877_v29, 16  ;;  %v6488_v56 = vld [vmem:[%s9314_s1 + $0x80] sm:$0xff]   ;;  %v396_v51 = vshll.u32 %v6907_v18, 16  ;;  %9343 = vst [vmem:[#allocation3_spill] sm:$0xff] %v6924_v39  ;;  %v389_v0 = vrot.slane %v387_v44, 4  ;;  %v400_v11 = vshrl.u32 %v6907_v18, 16 }
  0x4c   : > { %6067 = vmatprep.subr.bf16.mxu1 %v6485_v30  ;;  %6115 = vmatprep.subr.bf16.mxu0 %v6486_v42  ;;  %v562_v57 = vrot.slane %v561_v38, 4  ;;  %v406_v12 = vshll.u32 %v6916_v31, 16  ;;  %9344 = vst [vmem:[#allocation4_spill] sm:$0xff] %v6942_v13  ;;  %v6945_v16 = vld [vmem:[%s6643_s22 + $0x54] sm:$0xf]  ;;  %v579_v25 = vshrl.u32 %v6924_v39, 16 }
  0x4d   : > { %v570_v43 = vrot.slane %v568_v47, 4  ;;  %6047 = vmatprep.mubr.bf16.mxu1 %v5231_v24  ;;  %v398_v4 = vrot.slane %v396_v51, 5  ;;  %v582_v36 = vshll.u32 %v6924_v39, 16  ;;  %v411_v22 = vshrl.u32 %v6945_v16, 16 }
  0x4e   : > { %v567_v47 = vsel %vm6684_vm2, %v562_v57, %v566_v34  ;;  %v408_v44 = vrot.slane %v406_v12, 5  ;;  %v598_v12 = vshll.u32 %v6942_v13, 16 }
  0x4f   : > { %6068 = vmatpush3.bf16.msra.mxu1 %v6485_v30  ;;  %6116 = vmatpush3.bf16.msra.mxu0 %v6486_v42  ;;  %v5224_v30 = vcombine.low %v375_v35, %v385_v46  ;;  %v571_v59 = vor.u32 %v570_v43, %v566_v34  ;;  %v392_v42 = vrot.slane %v390_v50, 5  ;;  %v6952_v35 = vld [vmem:[%s6643_s22 + $0x58] sm:$0xf]  ;;  %v402_v43 = vrot.slane %v400_v11, 4 }
  0x50   : > { %6069 = vmatprep.subr.bf16.mxu1 %v6487_v3  ;;  %6117 = vmatprep.subr.bf16.mxu0 %v6488_v56  ;;  %v588_v46 = vshll.u32 %v6932_v53, 16  ;;  %v581_v50 = vrot.slane %v579_v25, 4  ;;  %v584_v51 = vrot.slane %v582_v36, 5  ;;  %v420_v36 = vshll.u32 %v6952_v35, 16 }
  0x51   : > { %6032 = vmatmul.mubr.bf16.gmra.mxu0 %v5224_v30  ;;  %v572_v24 = vrot.slane %v571_v59, 4  ;;  %v393_v38 = vor.u32 %v392_v42, %v389_v0  ;;  %v592_v30 = vshrl.u32 %v6932_v53, 16  ;;  %v403_v59 = vor.u32 %v402_v43, %v398_v4 }
  0x52   : > { %v590_v0 = vrot.slane %v588_v46, 5  ;;  %v585_v42 = vor.u32 %v584_v51, %v581_v50  ;;  %v413_v50 = vrot.slane %v411_v22, 4  ;;  %v424_v63 = vshrl.u32 %v6952_v35, 16 }
  0x53   : > { %6070 = vmatpush3.bf16.msra.mxu1 %v6487_v3  ;;  %6118 = vmatpush3.bf16.msra.mxu0 %v6488_v56  ;;  %v577_v34 = vsel %vm6684_vm2, %v572_v24, %v576_v49  ;;  %v394_v57 = vrot.slane %v393_v38, 4  ;;  %v6961_v56 = vld [vmem:[%s6643_s22 + $0x5c] sm:$0x1]  ;;  %v594_v11 = vrot.slane %v592_v30, 4  ;;  %v6966_v49 = vld [vmem:[%s6643_s22 + $0xb4] sm:$0xf] }
  0x54   : > { %6151 = vmatprep.subr.bf16.mxu1 %v6929_v48  ;;  %6199 = vmatprep.subr.bf16.mxu0 %v6937_v2  ;;  %v5232_v3 = vcombine.low %v567_v47, %v577_v34  ;;  %9345 = vst [vmem:[#allocation5_spill] sm:$0xff] %v6966_v49  ;;  %v404_v25 = vrot.slane %v403_v59, 4  ;;  %v414_v47 = vshll.u32 %v6945_v16, 16  ;;  %v6973_v38 = vld [vmem:[%s6643_s22 + $0xb8] sm:$0xf]  ;;  %v586_v43 = vrot.slane %v585_v42, 4 }
  0x55   : > { %v399_v24 = vsel %vm6684_vm2, %v394_v57, %v398_v4  ;;  %9346 = vst [vmem:[#allocation6_spill] sm:$0xff] %v6973_v38  ;;  %v595_v46 = vor.u32 %v594_v11, %v590_v0  ;;  %v600_v34 = vrot.slane %v598_v12, 5  ;;  %v6979_v4 = vld [vmem:[%s6643_s22 + $0xbc] sm:$0x1]  ;;  %v430_v42 = vshll.u32 %v6961_v56, 16 }
  0x56   : > { %6048 = vmatmul.mubr.bf16.gmra.mxu1 %v5232_v3  ;;  %v409_v51 = vsel %vm6684_vm2, %v404_v25, %v408_v44  ;;  %v416_v30 = vrot.slane %v414_v47, 5  ;;  %v422_v3 = vrot.slane %v420_v36, 5  ;;  %9347 = vst [vmem:[#allocation7_spill] sm:$0xff] %v6979_v4  ;;  %v591_v59 = vsel %vm6684_vm2, %v586_v43, %v590_v0  ;;  %v1221_v11 = vld [vmem:[%s6643_s22] sm:$0xe] }
  0x57   : > { %v5225_v57 = vcombine.low %v399_v24, %v409_v51  ;;  %v596_v21 = vrot.slane %v595_v46, 4  ;;  %v426_v22 = vrot.slane %v424_v63, 4  ;;  %v603_v13 = vshrl.u32 %v6966_v49, 16 }
  0x58   : > { %v417_v12 = vor.u32 %v416_v30, %v413_v50  ;;  %v606_v44 = vshll.u32 %v6966_v49, 16  ;;  %v432_v24 = vrot.slane %v430_v42, 5  ;;  %v612_v47 = vshll.u32 %v6973_v38, 16  ;;  %v1222_v50 = vld [vmem:[%s6643_s22 + $0xc] sm:$0xe] }
  0x59   : > { %6035 = vmatprep.mubr.bf16.mxu0 %v5225_v57  ;;  %v601_v25 = vsel %vm6684_vm2, %v596_v21, %v600_v34  ;;  %v616_v0 = vshrl.u32 %v6973_v38, 16  ;;  %v427_v46 = vor.u32 %v426_v22, %v422_v3  ;;  %v605_v51 = vrot.slane %v603_v13, 4  ;;  %v1223_v21 = vld [vmem:[%s6643_s22 + $0x18] sm:$0xe] }
  0x5a   : > { %v5233_v36 = vcombine.low %v591_v59, %v601_v25  ;;  %v418_v43 = vrot.slane %v417_v12, 4  ;;  %v608_v63 = vrot.slane %v606_v44, 5  ;;  %v614_v30 = vrot.slane %v612_v47, 5 }
  0x5b   : > { %v618_v39 = vrot.slane %v616_v0, 4  ;;  %v622_v49 = vshll.u32 %v6979_v4, 16  ;;  %v428_v59 = vrot.slane %v427_v46, 4  ;;  %v5267_v42 = vrot.slane %v1221_v11, 9 }
  0x5c   : > { %6051 = vmatprep.mubr.bf16.mxu1 %v5233_v36  ;;  %v423_v34 = vsel %vm6684_vm2, %v418_v43, %v422_v3  ;;  %v1274_v13 = vrot.slane %v6662_v6, 5  ;;  %v609_v12 = vor.u32 %v608_v63, %v605_v51  ;;  %v5268_v25 = vrot.slane %v1222_v50, 9 }
  0x5d   : > { %v619_v22 = vor.u32 %v618_v39, %v614_v30  ;;  %v624_v44 = vrot.slane %v622_v49, 5  ;;  %v433_v47 = vsel %vm6684_vm2, %v428_v59, %v432_v24  ;;  %v1281_v36 = vrot.slane %v6689_v33, 5 }
  0x5e   : > { %v1275_v0 = vsel %vm6995_vm5, %v5267_v42, %v1274_v13  ;;  %v1276_v4 = vrot.slane %v1274_v13, 4  ;;  %v5226_v38 = vcombine.low %v423_v34, %v433_v47  ;;  %v610_v3 = vrot.slane %v609_v12, 4  ;;  %v1225_v13 = vld [vmem:[%s6643_s22 + $0x30] sm:$0xe]  ;;  %v1227_v47 = vld [vmem:[%s6643_s22 + $0x48] sm:$0xe] }
  0x5f   : > { %v620_v43 = vrot.slane %v619_v22, 4  ;;  %v5243_v11 = vcombine.low %v6659_v5, %v6662_v6  ;;  %v9350_v39 = vrot.slane %v6665_v7, 5  ;;  %v1283_v46 = vrot.slane %v1281_v36, 4 }
  0x60   : > { %v5269_v24 = vrot.slane %v1223_v21, 9  ;;  %6036 = vmatmul.mubr.bf16.gmra.mxu0 %v5226_v38  ;;  %v615_v51 = vsel %vm6684_vm2, %v610_v3, %v614_v30  ;;  %v1288_v34 = vrot.slane %v6726_v20, 5  ;;  %v1282_v5 = vsel %vm6995_vm5, %v5268_v25, %v1281_v36  ;;  %v1226_v25 = vld [vmem:[%s6643_s22 + $0x3c] sm:$0xe] }
  0x61   : > { %v1278_v49 = vsel %vm6995_vm5, %v1276_v4, %v9350_v39  ;;  %v625_v50 = vsel %vm6684_vm2, %v620_v43, %v624_v44  ;;  %v9351_v6 = vrot.slane %v6695_v41, 5  ;;  %v1291_v38 = vrot.slane %v6731_v26, 5  ;;  %v1224_v4 = vld [vmem:[%s6643_s22 + $0x24] sm:$0xe]  ;;  %v6496_v26 = vld [vmem:[%s9314_s1 + $0x130] sm:$0xff]  }
  0x62   : > { %v5299_v63 = vcombine.low %v1275_v0, %v1278_v49  ;;  %v5234_v59 = vcombine.low %v615_v51, %v625_v50  ;;  %v1289_v30 = vsel %vm6995_vm5, %v5269_v24, %v1288_v34  ;;  %v1290_v21 = vrot.slane %v1288_v34, 4  ;;  %v6495_v24 = vld [vmem:[%s9314_s1 + $0xf0] sm:$0xff]  }
  0x63   : > { %v1285_v7 = vsel %vm6995_vm5, %v1283_v46, %v9351_v6  ;;  %v1295_v42 = vrot.slane %v6767_v1, 5  ;;  %v5270_v22 = vrot.slane %v1224_v4, 9  ;;  %v1302_v44 = vrot.slane %v6814_v61, 5  ;;  %v7070_v4 = vld [vmem:[%s6643_s22 + $0x68] sm:$0x1] }
  0x64   : > { %6119 = vmatprep.mubr.bf16.mxu0 %v5299_v63  ;;  %6052 = vmatmul.mubr.bf16.gmra.mxu1 %v5234_v59  ;;  %v5300_v12 = vcombine.low %v1282_v5, %v1285_v7  ;;  %v1292_v41 = vsel %vm6995_vm5, %v1290_v21, %v1291_v38  ;;  %v1298_v3 = vrot.slane %v6770_v9, 5  ;;  %v5271_v43 = vrot.slane %v1225_v13, 9  ;;  %v1228_v38 = vld [vmem:[%s6643_s22 + $0x54] sm:$0xe]  ;;  %v7094_v13 = vld [vmem:[%s6643_s22 + $0x60] sm:$0xe] }
  0x65   : > { %6071 = vmatprep.mubr.bf16.mxu1 %v5243_v11  ;;  %v5301_v0 = vcombine.low %v1289_v30, %v1292_v41  ;;  %v1297_v36 = vrot.slane %v1295_v42, 4  ;;  %v1304_v39 = vrot.slane %v1302_v44, 4  ;;  %v1305_v11 = vrot.slane %v6822_v17, 5 }
  0x66   : > { %v1309_v49 = vrot.slane %v6858_v55, 5  ;;  %v5245_v46 = vcombine.low %v6718_v15, %v6726_v20  ;;  %v1316_v51 = vrot.slane %v6907_v18, 5  ;;  %v5272_v50 = vrot.slane %v1226_v25, 9  ;;  %v6504_v25 = vld [vmem:[%s9314_s1 + $0x120] sm:$0xff]  }
  0x67   : > { %v1312_v9 = vrot.slane %v6865_v8, 5  ;;  %v5273_v34 = vrot.slane %v1227_v47, 9  ;;  %v1296_v15 = vsel %vm6995_vm5, %v5270_v22, %v1295_v42  ;;  %v1299_v20 = vsel %vm6995_vm5, %v1297_v36, %v1298_v3  ;;  %v7106_v47 = vld [vmem:[%s6643_s22 + $0x78] sm:$0xe]  ;;  %v6503_v3 = vld [vmem:[%s9314_s1 + $0xe0] sm:$0xff]  }
  0x68   : > { %6120 = vmatmul.mubr.bf16.vlgmr.msra.gmra.mxu0 %v5300_v12  ;;  %v1311_v63 = vrot.slane %v1309_v49, 4  ;;  %v1318_v17 = vrot.slane %v1316_v51, 4  ;;  %v1319_v59 = vrot.slane %v6916_v31, 5  ;;  %v1303_v5 = vsel %vm6995_vm5, %v5271_v43, %v1302_v44  ;;  %v7097_v12 = vld [vmem:[%s6643_s22 + $0x6c] sm:$0xe] }
  0x69   : > { %6200 = vmatpush3.bf16.msra.mxu0 %v6937_v2  ;;  %6123 = vmatprep.mubr.bf16.mxu0 %v5301_v0  ;;  %v1306_v8 = vsel %vm6995_vm5, %v1304_v39, %v1305_v11  ;;  %v6500_v2 = vld [vmem:[%s9314_s1 + $0x128] sm:$0xff]   ;;  %v1323_v6 = vrot.slane %v6952_v35, 5  ;;  %v9352_v7 = vcombine.low %v6680_v27, %v6689_v33  ;;  %v5246_v31 = vcombine.low %v6758_v58, %v6767_v1  ;;  %v1232_v0 = vld [vmem:[%s6643_s22 + $0x84] sm:$0xe]  ;;  %v1233_v43 = vld [vmem:[%s6643_s22 + $0x90] sm:$0xe] }
  0x6a   : > { %6201 = vmatprep.subr.bf16.mxu0 %v6496_v26  ;;  %v1333_v30 = vrot.slane %v7070_v4, 5  ;;  %v5302_v21 = vcombine.low %v1296_v15, %v1299_v20  ;;  %v7076_v42 = vsel %vm6995_vm5, %v5272_v50, %v1309_v49  ;;  %v7080_v27 = vsel %vm6995_vm5, %v1311_v63, %v1312_v9  ;;  %v6499_v33 = vld [vmem:[%s9314_s1 + $0xe8] sm:$0xff]   ;;  %v7125_v49 = vld [vmem:[%s6643_s22 + $0x64] sm:$0xf]  ;;  %v1234_v50 = vld [vmem:[%s6643_s22 + $0x9c] sm:$0xe] }
  0x6b   : > { %v5303_v58 = vcombine.low %v1303_v5, %v1306_v8  ;;  %v7087_v1 = vsel %vm6995_vm5, %v5273_v34, %v1316_v51  ;;  %v5247_v41 = vcombine.low %v6805_v54, %v6814_v61  ;;  %v5274_v22 = vrot.slane %v1228_v38, 9  ;;  %v7147_v5 = vld [vmem:[%s6643_s22 + $0x74] sm:$0x1] }
  0x6c   : > { %6072 = vmatmul.mubr.bf16.vlgmr.msra.gmra.mxu1 %v9352_v7  ;;  %v1326_v44 = vrot.slane %v6961_v56, 5  ;;  %v5248_v36 = vcombine.low %v6855_v52, %v6858_v55  ;;  %v5304_v54 = vcombine.low %v7076_v42, %v7080_v27  ;;  %v5249_v61 = vcombine.low %v6898_v60, %v6907_v18  ;;  %v6589_v55 = vld [vmem:[%s6643_s22 + $0x80] sm:$0x1] }
  0x6d   : > { %6152 = vmatpush3.bf16.msra.mxu1 %v6929_v48  ;;  %6075 = vmatprep.mubr.bf16.mxu1 %v5245_v46  ;;  %v7091_v48 = vsel %vm6995_vm5, %v1318_v17, %v1319_v59  ;;  %v5250_v56 = vcombine.low %v6945_v16, %v6952_v35  ;;  %v5275_v11 = vrot.slane %v7094_v13, 9  ;;  %v1330_v46 = vrot.slane %v7125_v49, 5  ;;  %v7143_v17 = vld [vmem:[%s6643_s22 + $0x70] sm:$0xf]  ;;  %v6590_v18 = vld [vmem:[%s6643_s22 + $0x60] sm:$0xf] }
  0x6e   : > { %6153 = vmatprep.subr.bf16.mxu1 %v6495_v24  ;;  %6202 = vmatpush3.bf16.msra.mxu0 %v6496_v26  ;;  %v1325_v26 = vrot.slane %v1323_v6, 4  ;;  %v5305_v39 = vcombine.low %v7087_v1, %v7091_v48  ;;  %v5276_v63 = vrot.slane %v7097_v12, 9  ;;  %v1351_v9 = vrot.slane %v6781_v23, 5  ;;  %v1235_v1 = vld [vmem:[%s6643_s22 + $0xa8] sm:$0xe]  ;;  %v7327_v16 = vld [vmem:[%s9314_s1 + $0x1b8] sm:$0xff]  }
  0x6f   : > { %6203 = vmatprep.subr.bf16.mxu0 %v6500_v2  ;;  %v1354_v34 = vrot.slane %v6790_v37, 5  ;;  %v7136_v15 = vsel %vm6995_vm5, %v5274_v22, %v1323_v6  ;;  %v1337_v59 = vrot.slane %v7143_v17, 5  ;;  %v1340_v8 = vrot.slane %v7147_v5, 5  ;;  %v6507_v37 = vld [vmem:[%s9314_s1 + $0xd8] sm:$0xff]  }
  0x70   : > { %6124 = vmatmul.mubr.bf16.gmra.mxu0 %v5302_v21  ;;  %v7140_v20 = vsel %vm6995_vm5, %v1325_v26, %v1326_v44  ;;  %v5277_v6 = vrot.slane %v7106_v47, 9  ;;  %v1353_v38 = vrot.slane %v1351_v9, 4  ;;  %v5279_v42 = vrot.slane %v1233_v43, 9  ;;  %v5395_v43 = vld [vmem:[%s6643_s22 + $0xc] sm:$0xf] }
  0x71   : > { %6154 = vmatpush3.bf16.msra.mxu1 %v6495_v24  ;;  %6127 = vmatprep.mubr.bf16.mxu0 %v5303_v58  ;;  %v5278_v24 = vrot.slane %v1232_v0, 9  ;;  %v1358_v27 = vrot.slane %v6832_v32, 5  ;;  %v1361_v58 = vrot.slane %v6842_v45, 5  ;;  %v1344_v48 = vrot.slane %v6740_v40, 5 }
  0x72   : > { %6155 = vmatprep.subr.bf16.mxu1 %v6499_v33  ;;  %6204 = vmatpush3.bf16.msra.mxu0 %v6500_v2  ;;  %v6508_v2 = vld [vmem:[%s9314_s1 + $0x118] sm:$0xff]   ;;  %v7171_v22 = vsel %vm6995_vm5, %v1353_v38, %v1354_v34  ;;  %v1365_v0 = vrot.slane %v6877_v29, 5  ;;  %v5281_v34 = vrot.slane %v1235_v1, 9  ;;  %v1372_v38 = vrot.slane %v6932_v53, 5  ;;  %v6511_v1 = vld [vmem:[%s9314_s1 + $0xd0] sm:$0xff]  }
  0x73   : > { %6205 = vmatprep.subr.bf16.mxu0 %v6504_v25  ;;  %v7159_v7 = vsel %vm6995_vm5, %v5278_v24, %v1351_v9  ;;  %v7179_v45 = vsel %vm6995_vm5, %v5279_v42, %v1358_v27  ;;  %v1360_v44 = vrot.slane %v1358_v27, 4  ;;  %v6512_v24 = vld [vmem:[%s9314_s1 + $0x110] sm:$0xff]   ;;  %v1368_v9 = vrot.slane %v6893_v62, 5 }
  0x74   : > { %6076 = vmatmul.mubr.bf16.gmra.mxu1 %v5246_v31  ;;  %v1332_v31 = vrot.slane %v1330_v46, 4  ;;  %v1367_v21 = vrot.slane %v1365_v0, 4  ;;  %v9354_v62 = vld [vmem:[#allocation4_spill] sm:$0xff]  ;;  %v2142_v13 = vshrl.u32 %v5395_v43, 16  ;;  %v1339_v52 = vrot.slane %v1337_v59, 4 }
  0x75   : > { %6079 = vmatprep.mubr.bf16.mxu1 %v5247_v41  ;;  %6156 = vmatpush3.bf16.msra.mxu1 %v6499_v33  ;;  %v5280_v41 = vrot.slane %v1234_v50, 9  ;;  %v7191_v33 = vld [vmem:[%s6643_s22 + $0x10] sm:$0xf]  ;;  %v7195_v42 = vsel %vm6995_vm5, %v1360_v44, %v1361_v58  ;;  %v1375_v51 = vrot.slane %v9354_v62, 5  ;;  %v1374_v58 = vrot.slane %v1372_v38, 4 }
  0x76   : > { %6157 = vmatprep.subr.bf16.mxu1 %v6503_v3  ;;  %6206 = vmatpush3.bf16.msra.mxu0 %v6504_v25  ;;  %v9353_v25 = vld [vmem:[#allocation3_spill] sm:$0xff]  ;;  %v9356_v44 = vld [vmem:[#allocation5_spill] sm:$0xff]  ;;  %v1331_v62 = vsel %vm6995_vm5, %v5275_v11, %v1330_v46  ;;  %v2145_v11 = vshll.u32 %v5395_v43, 16  ;;  %v2151_v60 = vshll.u32 %v7191_v33, 16  ;;  %v1341_v12 = vsel %vm6995_vm5, %v1339_v52, %v1340_v8 }
  0x77   : > { %6207 = vmatprep.subr.bf16.mxu0 %v6508_v2  ;;  %v7199_v27 = vsel %vm6995_vm5, %v5280_v41, %v1365_v0  ;;  %v9355_v41 = vld [vmem:[#allocation6_spill] sm:$0xff]  ;;  %v7265_v43 = vld [vmem:[%s6643_s22 + $0x14] sm:$0x1]  ;;  %v2144_v0 = vrot.slane %v2142_v13, 4  ;;  %v1345_v5 = vsel %vm6995_vm5, %v5277_v6, %v1344_v48  ;;  %v9358_v6 = vld [vmem:[#allocation7_spill] sm:$0xff] }
  0x78   : > { %6128 = vmatmul.mubr.bf16.gmra.mxu0 %v5304_v54  ;;  %v5398_v46 = vld [vmem:[%s6643_s22 + $0x18] sm:$0xf]  ;;  %v2147_v50 = vrot.slane %v2145_v11, 5  ;;  %v5401_v54 = vld [vmem:[%s6643_s22 + $0x24] sm:$0xf] }
  0x79   : > { %6158 = vmatpush3.bf16.msra.mxu1 %v6503_v3  ;;  %6131 = vmatprep.mubr.bf16.mxu0 %v5305_v39  ;;  %v7209_v3 = vsel %vm6995_vm5, %v5281_v34, %v1372_v38  ;;  %v5306_v39 = vcombine.low %v7136_v15, %v7140_v20  ;;  %v1334_v34 = vsel %vm6995_vm5, %v1332_v31, %v1333_v30  ;;  %v6516_v15 = vld [vmem:[%s9314_s1 + $0x108] sm:$0xff]   ;;  %v6520_v31 = vld [vmem:[%s9314_s1 + $0x100] sm:$0xff]   ;;  %v7284_v20 = vrot.slane %v2151_v60, 5 }
  0x7a   : > { %6159 = vmatprep.subr.bf16.mxu1 %v6507_v37  ;;  %6208 = vmatpush3.bf16.msra.mxu0 %v6508_v2  ;;  %v7227_v38 = vsel %vm6995_vm5, %v1367_v21, %v1368_v9  ;;  %v7239_v30 = vsel %vm6995_vm5, %v1374_v58, %v1375_v51  ;;  %v6515_v51 = vld [vmem:[%s9314_s1 + $0xc8] sm:$0xff]   ;;  %v7254_v2 = vld [vmem:[%s6643_s22 + $0xb4] sm:$0xe]  ;;  %v5307_v21 = vcombine.low %v1331_v62, %v1334_v34  ;;  %v2155_v9 = vshrl.u32 %v7191_v33, 16  ;;  %v7282_v62 = vld [vmem:[%s6643_s22 + $0x1c] sm:$0xf] }
  0x7b   : > { %6209 = vmatprep.subr.bf16.mxu0 %v6512_v24  ;;  %v7269_v58 = vld [vmem:[%s6643_s22 + $0x6c] sm:$0xf]  ;;  %v2166_v34 = vshrl.u32 %v5398_v46, 16  ;;  %v2175_v52 = vshll.u32 %v7282_v62, 16  ;;  %v2179_v40 = vshrl.u32 %v7282_v62, 16  ;;  %v2190_v60 = vshrl.u32 %v5401_v54, 16 }
  0x7c   : > { %6080 = vmatmul.mubr.bf16.gmra.mxu1 %v5248_v36  ;;  %v1347_v36 = vrot.slane %v6589_v55, 5  ;;  %v5252_v55 = vcombine.low %v7269_v58, %v7143_v17  ;;  %v2157_v4 = vrot.slane %v2155_v9, 4  ;;  %v2193_v47 = vshll.u32 %v5401_v54, 16  ;;  %v6593_v9 = vld [vmem:[%s6643_s22 + $0x7c] sm:$0xf] }
  0x7d   : > { %6083 = vmatprep.mubr.bf16.mxu1 %v5249_v61  ;;  %6160 = vmatpush3.bf16.msra.mxu1 %v6507_v37  ;;  %v5251_v61 = vcombine.low %v6590_v18, %v7125_v49  ;;  %v1346_v37 = vrot.slane %v1344_v48, 4  ;;  %v7279_v49 = vsel %vm6995_vm5, %v5276_v63, %v1337_v59  ;;  %v2169_v18 = vshll.u32 %v5398_v46, 16  ;;  %v6519_v59 = vld [vmem:[%s9314_s1 + $0xc0] sm:$0xff]   ;;  %v7309_v46 = vld [vmem:[%s6643_s22 + $0x28] sm:$0xf] }
  0x7e   : > { %6161 = vmatprep.subr.bf16.mxu1 %v6511_v1  ;;  %6210 = vmatpush3.bf16.msra.mxu0 %v6512_v24  ;;  %v9326_v63 = vrot.slane %v9355_v41, 5  ;;  %v7296_v24 = vld [vmem:[%s6643_s22 + $0x20] sm:$0x1]  ;;  %v2168_v13 = vrot.slane %v2166_v34, 4  ;;  %9357 = vst [vmem:[#allocation3_spill] sm:$0xff] %v7309_v46  ;;  %v5308_v35 = vcombine.low %v7279_v49, %v1341_v12  ;;  %v2199_v54 = vshll.u32 %v7309_v46, 16 }
  0x7f   : > { %6211 = vmatprep.subr.bf16.mxu0 %v6516_v15  ;;  %v2171_v11 = vrot.slane %v2169_v18, 5  ;;  %v1348_v8 = vsel %vm6995_vm5, %v1346_v37, %v1347_v36  ;;  %v2148_v36 = vor.u32 %v2147_v50, %v2144_v0  ;;  %v7322_v37 = vld [vmem:[%s9314_s1 + $0x178] sm:$0xff]   ;;  %v5404_v0 = vld [vmem:[%s6643_s22 + $0x30] sm:$0xf]  ;;  %v7343_v49 = vld [vmem:[%s6643_s22 + $0x34] sm:$0xf] }
  0x80   : > { %6132 = vmatmul.mubr.bf16.gmra.mxu0 %v5306_v39  ;;  %v2161_v39 = vshll.u32 %v7265_v43, 16  ;;  %v5309_v18 = vcombine.low %v1345_v5, %v1348_v8  ;;  %9360 = vst [vmem:[#allocation6_spill] sm:$0xff] %v7343_v49  ;;  %v7345_v12 = vrot.slane %v2175_v52, 5  ;;  %v2195_v48 = vrot.slane %v2193_v47, 5  ;;  %v7364_v47 = vld [vmem:[%s6643_s22 + $0x40] sm:$0xf] }
  0x81   : > { %6162 = vmatpush3.bf16.msra.mxu1 %v6511_v1  ;;  %6135 = vmatprep.mubr.bf16.mxu0 %v5307_v21  ;;  %v2158_v21 = vor.u32 %v2157_v4, %v7284_v20  ;;  %v2172_v50 = vor.u32 %v2171_v11, %v2168_v13  ;;  %v6592_v4 = vld [vmem:[%s6643_s22 + $0x78] sm:$0xf]  ;;  %v2181_v13 = vrot.slane %v2179_v40, 4  ;;  %v2192_v11 = vrot.slane %v2190_v60, 4  ;;  %9361 = vst [vmem:[#allocation5_spill] sm:$0xff] %v7364_v47 }
  0x82   : > { %6163 = vmatprep.subr.bf16.mxu1 %v6515_v51  ;;  %6212 = vmatpush3.bf16.msra.mxu0 %v6516_v15  ;;  %v2185_v15 = vshll.u32 %v7296_v24, 16  ;;  %v5253_v34 = vcombine.low %v6592_v4, %v6593_v9  ;;  %v7336_v26 = vrot.slane %v2161_v39, 5  ;;  %v7348_v1 = vld [vmem:[%s6643_s22 + $0x38] sm:$0x1]  ;;  %v7350_v5 = vrot.slane %v2148_v36, 4 }
  0x83   : > { %6213 = vmatprep.subr.bf16.mxu0 %v6520_v31  ;;  %v7352_v8 = vrot.slane %v2158_v21, 4  ;;  %v2214_v4 = vshrl.u32 %v5404_v0, 16  ;;  %v5407_v9 = vld [vmem:[%s6643_s22 + $0x3c] sm:$0xf]  ;;  %v7360_v52 = vrot.slane %v2199_v54, 5  ;;  %v2217_v40 = vshll.u32 %v5404_v0, 16 }
  0x84   : > { %6084 = vmatmul.mubr.bf16.gmra.mxu1 %v5250_v56  ;;  %v1381_v56 = vrot.slane %v9326_v63, 4  ;;  %v7354_v39 = vrot.slane %v2185_v15, 5  ;;  %v2223_v60 = vshll.u32 %v7343_v49, 16  ;;  %v2227_v21 = vshrl.u32 %v7343_v49, 16 }
  0x85   : > { %6087 = vmatprep.mubr.bf16.mxu1 %v5251_v61  ;;  %6164 = vmatpush3.bf16.msra.mxu1 %v6515_v51  ;;  %v7339_v61 = vld [vmem:[%s6643_s22 + $0x2c] sm:$0x1]  ;;  %v2203_v51 = vshrl.u32 %v7309_v46, 16  ;;  %v2182_v15 = vor.u32 %v2181_v13, %v7345_v12  ;;  %v2216_v54 = vrot.slane %v2214_v4, 4  ;;  %v2219_v0 = vrot.slane %v2217_v40, 5 }
  0x86   : > { %6165 = vmatprep.subr.bf16.mxu1 %v6519_v59  ;;  %9359 = vst [vmem:[#allocation4_spill] sm:$0xff] %v7339_v61  ;;  %6214 = vmatpush3.bf16.msra.mxu0 %v6520_v31  ;;  %v7358_v31 = vrot.slane %v2172_v50, 4  ;;  %v2238_v50 = vshrl.u32 %v5407_v9, 16  ;;  %v2241_v63 = vshll.u32 %v5407_v9, 16  ;;  %v2229_v49 = vrot.slane %v2227_v21, 4 }
  0x87   : > { %6295 = vmatprep.subr.bf16.mxu0 %v7327_v16  ;;  %v2205_v36 = vrot.slane %v2203_v51, 4  ;;  %v7374_v51 = vrot.slane %v2223_v60, 5  ;;  %v7377_v46 = vld [vmem:[%s6643_s22 + $0x44] sm:$0x1]  ;;  %v2251_v13 = vshrl.u32 %v7364_v47, 16  ;;  %v9362_v17 = vrot.slane %v9355_v41, 5 }
  0x88   : > { %6136 = vmatmul.mubr.bf16.gmra.mxu0 %v5308_v35  ;;  %v2209_v35 = vshll.u32 %v7339_v61, 16  ;;  %v9363_v58 = vrot.slane %v7254_v2, 9  ;;  %v7398_v40 = vld [vmem:[%s6643_s22 + $0x4c] sm:$0xf]  ;;  %v2240_v60 = vrot.slane %v2238_v50, 4  ;;  %v2243_v21 = vrot.slane %v2241_v63, 5 }
  0x89   : > { %6166 = vmatpush3.bf16.msra.mxu1 %v6519_v59  ;;  %6139 = vmatprep.mubr.bf16.mxu0 %v5309_v18  ;;  %v2196_v59 = vor.u32 %v2195_v48, %v2192_v11  ;;  %v2233_v18 = vshll.u32 %v7348_v1, 16  ;;  %v2247_v48 = vshll.u32 %v7364_v47, 16  ;;  %v5410_v11 = vld [vmem:[%s6643_s22 + $0x48] sm:$0xf]  ;;  %v2206_v9 = vor.u32 %v2205_v36, %v7360_v52 }
  0x8a   : > { %6247 = vmatprep.subr.bf16.mxu1 %v7322_v37  ;;  %v2253_v2 = vrot.slane %v2251_v13, 4  ;;  %v7402_v47 = vrot.slane %v2182_v15, 4  ;;  %v2154_v63 = vsel %vm6684_vm2, %v7350_v5, %v7284_v20  ;;  %v2164_v36 = vsel %vm6684_vm2, %v7352_v8, %v7336_v26  ;;  %v5413_v5 = vld [vmem:[%s6643_s22 + $0x54] sm:$0xf] }
  0x8b   : > { %v7400_v61 = vrot.slane %v2247_v48, 5  ;;  %v2265_v15 = vshll.u32 %v5410_v11, 16  ;;  %v2257_v50 = vshll.u32 %v7377_v46, 16  ;;  %v2275_v20 = vshrl.u32 %v7398_v40, 16 }
  0x8c   : > { %6088 = vmatmul.mubr.bf16.gmra.mxu1 %v5252_v55  ;;  %v7388_v55 = vsel %vm6995_vm5, %v9363_v58, %v9362_v17  ;;  %v7404_v17 = vrot.slane %v2196_v59, 4  ;;  %v7406_v58 = vrot.slane %v2209_v35, 5  ;;  %v2271_v59 = vshll.u32 %v7398_v40, 16 }
  0x8d   : > { %6091 = vmatprep.mubr.bf16.mxu1 %v5253_v34  ;;  %v9364_v34 = vrot.slane %v9358_v6, 5  ;;  %v2262_v6 = vshrl.u32 %v5410_v11, 16  ;;  %v9366_v35 = vcombine.low %v7179_v45, %v7195_v42  ;;  %v7427_v48 = vrot.slane %v2206_v9, 4  ;;  %v7433_v11 = vld [vmem:[%s6643_s22 + $0x58] sm:$0xf] }
  0x8e   : > { %v7429_v13 = vrot.slane %v2233_v18, 5  ;;  %v2244_v26 = vor.u32 %v2243_v21, %v2240_v60  ;;  %v2254_v8 = vor.u32 %v2253_v2, %v7400_v61  ;;  %v9367_v45 = vcombine.low %v6774_v14, %v6781_v23  ;;  %v7439_v42 = vld [vmem:[%s6643_s22 + $0x50] sm:$0x1] }
  0x8f   : > { %v7394_v4 = vsel %vm6995_vm5, %v1381_v56, %v9364_v34  ;;  %v9365_v56 = vcombine.low %v7159_v7, %v7171_v22  ;;  %v2220_v7 = vor.u32 %v2219_v0, %v2216_v54  ;;  %v2230_v22 = vor.u32 %v2229_v49, %v7374_v51 }
  0x90   : > { %v2264_v49 = vrot.slane %v2262_v6, 4  ;;  %v2267_v54 = vrot.slane %v2265_v15, 5  ;;  %v7441_v0 = vrot.slane %v2271_v59, 5  ;;  %v2277_v18 = vrot.slane %v2275_v20, 4  ;;  %v5416_v6 = vld [vmem:[%s6643_s22 + $0x60] sm:$0xf] }
  0x91   : > { %6140 = vmatmul.mubr.bf16.gmra.mxu0 %v9365_v56  ;;  %v9368_v34 = vcombine.low %v6826_v19, %v6832_v32  ;;  %v2286_v9 = vshrl.u32 %v5413_v5, 16  ;;  %v2289_v60 = vshll.u32 %v5413_v5, 16  ;;  %v7446_v21 = vrot.slane %v2220_v7, 4  ;;  %v7463_v32 = vld [vmem:[%s6643_s22 + $0x64] sm:$0xf] }
  0x92   : > { %6143 = vmatprep.mubr.bf16.mxu0 %v9366_v35  ;;  %v7448_v2 = vrot.slane %v2230_v22, 4  ;;  %v7450_v14 = vrot.slane %v2257_v50, 5  ;;  %v2295_v23 = vshll.u32 %v7433_v11, 16  ;;  %v5314_v56 = vcombine.low %v7388_v55, %v7394_v4  ;;  %v7459_v35 = vld [vmem:[%s6643_s22 + $0x5c] sm:$0x1] }
  0x93   : > { %v5459_v15 = vcombine.low %v2154_v63, %v2164_v36  ;;  %v7456_v59 = vrot.slane %v2244_v26, 4  ;;  %v2299_v19 = vshrl.u32 %v7433_v11, 16  ;;  %v7465_v7 = vrot.slane %v2254_v8, 4 }
  0x94   : > { %6092 = vmatmul.mubr.bf16.gmra.mxu1 %v9367_v45  ;;  %v2281_v22 = vshll.u32 %v7439_v42, 16  ;;  %v2310_v50 = vshrl.u32 %v5416_v6, 16  ;;  %v2313_v20 = vshll.u32 %v5416_v6, 16  ;;  %v9369_v5 = vcombine.low %v7199_v27, %v7227_v38 }
  0x95   : > { %6095 = vmatprep.mubr.bf16.mxu1 %v9368_v34  ;;  %v2268_v55 = vor.u32 %v2267_v54, %v2264_v49  ;;  %v2278_v4 = vor.u32 %v2277_v18, %v7441_v0  ;;  %v2288_v63 = vrot.slane %v2286_v9, 4  ;;  %v2291_v36 = vrot.slane %v2289_v60, 5  ;;  %v7503_v9 = vld [vmem:[%s6643_s22 + $0x70] sm:$0xf] }
  0x96   : > { %v9370_v26 = vcombine.low %v7209_v3, %v7239_v30  ;;  %v7475_v8 = vrot.slane %v2295_v23, 5  ;;  %v2301_v45 = vrot.slane %v2299_v19, 4  ;;  %v2305_v34 = vshll.u32 %v7459_v35, 16 }
  0x97   : > { %v2319_v27 = vshll.u32 %v7463_v32, 16  ;;  %v2178_v38 = vsel %vm6684_vm2, %v7358_v31, %v7345_v12  ;;  %v2188_v3 = vsel %vm6684_vm2, %v7402_v47, %v7354_v39  ;;  %v2312_v30 = vrot.slane %v2310_v50, 4  ;;  %v5419_v47 = vld [vmem:[%s6643_s22 + $0x6c] sm:$0xf] }
  0x98   : > { %v2315_v49 = vrot.slane %v2313_v20, 5  ;;  %v9371_v54 = vcombine.low %v6868_v10, %v6877_v29  ;;  %v2202_v18 = vsel %vm6684_vm2, %v7404_v17, %v7360_v52  ;;  %v2212_v12 = vsel %vm6684_vm2, %v7427_v48, %v7406_v58  ;;  %v7511_v17 = vld [vmem:[%s6643_s22 + $0x68] sm:$0x1] }
  0x99   : > { %6144 = vmatmul.mubr.bf16.gmra.mxu0 %v9369_v5  ;;  %v7498_v31 = vrot.slane %v2281_v22, 5  ;;  %v2323_v39 = vshrl.u32 %v7463_v32, 16  ;;  %v9372_v10 = vcombine.low %v9353_v25, %v6932_v53  ;;  %v7508_v29 = vrot.slane %v2268_v55, 4  ;;  %v6521_v53 = vld [vmem:[%s6643_s22 + $0xc] sm:$0xff]  }
  0x9a   : > { %6147 = vmatprep.mubr.bf16.mxu0 %v9370_v26  ;;  %v2292_v52 = vor.u32 %v2291_v36, %v2288_v63  ;;  %v2334_v60 = vshrl.u32 %v5419_v47, 16  ;;  %v2337_v58 = vshll.u32 %v5419_v47, 16  ;;  %v7513_v48 = vrot.slane %v2278_v4, 4  ;;  %v7524_v63 = vld [vmem:[%s6643_s22 + $0x74] sm:$0x1] }
  0x9b   : > { %v2302_v23 = vor.u32 %v2301_v45, %v7475_v8  ;;  %v7516_v6 = vrot.slane %v2305_v34, 5  ;;  %v2343_v19 = vshll.u32 %v7503_v9, 16  ;;  %v2316_v25 = vor.u32 %v2315_v49, %v2312_v30  ;;  %v5422_v26 = vld [vmem:[%s6643_s22 + $0x78] sm:$0xf]  ;;  %v7528_v45 = vld [vmem:[%s6643_s22 + $0x7c] sm:$0xf] }
  0x9c   : > { %6096 = vmatmul.mubr.bf16.gmra.mxu1 %v9371_v54  ;;  %v7520_v22 = vrot.slane %v2319_v27, 5  ;;  %v2325_v50 = vrot.slane %v2323_v39, 4  ;;  %v2347_v20 = vshrl.u32 %v7503_v9, 16  ;;  %v5460_v5 = vcombine.low %v2178_v38, %v2188_v3  ;;  %v7535_v27 = vld [vmem:[%s6643_s22 + $0x80] sm:$0x1] }
  0x9d   : > { %6099 = vmatprep.mubr.bf16.mxu1 %v9372_v10  ;;  %v5461_v55 = vcombine.low %v2202_v18, %v2212_v12  ;;  %v2336_v4 = vrot.slane %v2334_v60, 4  ;;  %v2339_v36 = vrot.slane %v2337_v58, 5  ;;  %v7530_v34 = vrot.slane %v2292_v52, 4 }
  0x9e   : > { %v7532_v54 = vrot.slane %v2343_v19, 5  ;;  %v2349_v30 = vrot.slane %v2347_v20, 4  ;;  %v2358_v49 = vshrl.u32 %v5422_v26, 16  ;;  %v2329_v38 = vshll.u32 %v7511_v17, 16  ;;  %v5425_v20 = vld [vmem:[%s6643_s22 + $0x84] sm:$0xf] }
  0x9f   : > { %v2361_v3 = vshll.u32 %v5422_v26, 16  ;;  %v2367_v18 = vshll.u32 %v7528_v45, 16  ;;  %v2371_v12 = vshrl.u32 %v7528_v45, 16  ;;  %v7540_v39 = vrot.slane %v2302_v23, 4  ;;  %v6525_v26 = vld [vmem:[%s6643_s22 + $0x24] sm:$0xff]  }
  0xa0   : > { %v7542_v47 = vrot.slane %v2316_v25, 4  ;;  %v2360_v10 = vrot.slane %v2358_v49, 4  ;;  %v9373_v52 = vcombine.low %v9356_v44, %v9355_v41  ;;  %v2226_v23 = vsel %vm6684_vm2, %v7446_v21, %v7374_v51 }
  0xa1   : > { %6148 = vmatmul.mubr.bf16.gmra.mxu0 %v5314_v56  ;;  %v2326_v56 = vor.u32 %v2325_v50, %v7520_v22  ;;  %v2363_v60 = vrot.slane %v2361_v3, 5  ;;  %v7548_v58 = vrot.slane %v2367_v18, 5  ;;  %v2373_v19 = vrot.slane %v2371_v12, 4  ;;  %v7597_v18 = vld [vmem:[%s6643_s22 + $0x8c] sm:$0x1] }
  0xa2   : > { %6215 = vmatprep.mubr.bf16.mxu0 %v5459_v15  ;;  %v2340_v15 = vor.u32 %v2339_v36, %v2336_v4  ;;  %v2350_v25 = vor.u32 %v2349_v30, %v7532_v54  ;;  %v2353_v50 = vshll.u32 %v7524_v63, 16  ;;  %v2377_v41 = vshll.u32 %v7535_v27, 16  ;;  %v7571_v4 = vld [vmem:[%s6643_s22 + $0x88] sm:$0xf]  ;;  %v6522_v36 = vld [vmem:[%s6643_s22 + $0x18] sm:$0xff]  }
  0xa3   : > { %v2236_v44 = vsel %vm6684_vm2, %v7448_v2, %v7429_v13  ;;  %v2260_v51 = vsel %vm6684_vm2, %v7465_v7, %v7450_v14  ;;  %v2364_v21 = vor.u32 %v2363_v60, %v2360_v10  ;;  %v6528_v13 = vld [vmem:[%s9314_s1 + $0x1b0] sm:$0xff]   ;;  %v7578_v2 = vrot.slane %v2329_v38, 5  ;;  %v7602_v12 = vld [vmem:[%s9314_s1 + $0x1a8] sm:$0xff]  }
  0xa4   : > { %6100 = vmatmul.mubr.bf16.gmra.mxu1 %v9373_v52  ;;  %v2385_v30 = vshll.u32 %v5425_v20, 16  ;;  %v6527_v14 = vld [vmem:[%s9314_s1 + $0x170] sm:$0xff]   ;;  %v2274_v7 = vsel %vm6684_vm2, %v7508_v29, %v7441_v0  ;;  %v2284_v49 = vsel %vm6684_vm2, %v7513_v48, %v7498_v31  ;;  %v7592_v38 = vrot.slane %v2326_v56, 4 }
  0xa5   : > { %6167 = vmatprep.mubr.bf16.mxu1 %v6521_v53  ;;  %v2250_v53 = vsel %vm6684_vm2, %v7456_v59, %v7400_v61  ;;  %v2374_v61 = vor.u32 %v2373_v19, %v7548_v58  ;;  %v2382_v59 = vshrl.u32 %v5425_v20, 16  ;;  %v7594_v3 = vrot.slane %v2340_v15, 4  ;;  %v5428_v15 = vld [vmem:[%s6643_s22 + $0x90] sm:$0xf]  ;;  %v7625_v60 = vld [vmem:[%s6643_s22 + $0x94] sm:$0xf] }
  0xa6   : > { %v7604_v0 = vrot.slane %v2350_v25, 4  ;;  %v7606_v29 = vrot.slane %v2353_v50, 5  ;;  %v2391_v31 = vshll.u32 %v7571_v4, 16  ;;  %v2395_v48 = vshrl.u32 %v7571_v4, 16  ;;  %9374 = vst [vmem:[#allocation7_spill] sm:$0xff] %v7625_v60 }
  0xa7   : > { %v2308_v56 = vsel %vm6684_vm2, %v7540_v39, %v7516_v6  ;;  %v7619_v10 = vrot.slane %v2364_v21, 4  ;;  %v7621_v52 = vrot.slane %v2377_v41, 5  ;;  %v2387_v19 = vrot.slane %v2385_v30, 5  ;;  %v6531_v6 = vld [vmem:[%s9314_s1 + $0x168] sm:$0xff]  }
  0xa8   : > { %v2409_v39 = vshll.u32 %v5428_v15, 16  ;;  %v2415_v25 = vshll.u32 %v7625_v60, 16  ;;  %v2419_v50 = vshrl.u32 %v7625_v60, 16  ;;  %v5462_v41 = vcombine.low %v2226_v23, %v2236_v44 }
  0xa9   : > { %6216 = vmatmul.mubr.bf16.vlgmr.msra.gmra.mxu0 %v5460_v5  ;;  %v2298_v5 = vsel %vm6684_vm2, %v7530_v34, %v7475_v8  ;;  %v2401_v8 = vshll.u32 %v7597_v18, 16  ;;  %v2406_v34 = vshrl.u32 %v5428_v15, 16  ;;  %v5463_v21 = vcombine.low %v2250_v53, %v2260_v51 }
  0xaa   : > { %6296 = vmatpush3.bf16.msra.mxu0 %v7327_v16  ;;  %6219 = vmatprep.mubr.bf16.mxu0 %v5461_v55  ;;  %v7627_v16 = vrot.slane %v2374_v61, 4  ;;  %v2384_v55 = vrot.slane %v2382_v59, 4  ;;  %v7636_v20 = vrot.slane %v2391_v31, 5  ;;  %v6526_v61 = vld [vmem:[%s6643_s22 + $0x30] sm:$0xff]   ;;  %v6536_v59 = vld [vmem:[%s9314_s1 + $0x1a0] sm:$0xff]   ;;  %v2411_v15 = vrot.slane %v2409_v39, 5 }
  0xab   : > { %6297 = vmatprep.subr.bf16.mxu0 %v6528_v13  ;;  %v2408_v30 = vrot.slane %v2406_v34, 4  ;;  %v2421_v23 = vrot.slane %v2419_v50, 4  ;;  %v7644_v44 = vcombine.low %v2274_v7, %v2284_v49  ;;  %v7647_v53 = vcombine.low %v2298_v5, %v2308_v56  ;;  %v5431_v31 = vld [vmem:[%s6643_s22 + $0x9c] sm:$0xf]  ;;  %v7669_v5 = vld [vmem:[%s6643_s22 + $0xa4] sm:$0x1] }
  0xac   : > { %6168 = vmatmul.mubr.bf16.vlgmr.msra.gmra.mxu1 %v6522_v36  ;;  %v2397_v36 = vrot.slane %v2395_v48, 4  ;;  %v2388_v49 = vor.u32 %v2387_v19, %v2384_v55  ;;  %v7666_v48 = vld [vmem:[%s6643_s22 + $0xa0] sm:$0xf]  ;;  %9377 = vst [vmem:[#allocation10_spill] sm:$0xff] %v7669_v5  ;;  %v2430_v56 = vshrl.u32 %v5431_v31, 16  ;;  %v2433_v34 = vshll.u32 %v5431_v31, 16 }
  0xad   : > { %6248 = vmatpush3.bf16.msra.mxu1 %v7322_v37  ;;  %6171 = vmatprep.mubr.bf16.mxu1 %v6525_v26  ;;  %v7642_v37 = vrot.slane %v2415_v25, 5  ;;  %v2332_v26 = vsel %vm6684_vm2, %v7592_v38, %v7578_v2  ;;  %9376 = vst [vmem:[#allocation9_spill] sm:$0xff] %v7666_v48  ;;  %v6529_v39 = vld [vmem:[%s6643_s22 + $0x3c] sm:$0xff]   ;;  %v2439_v38 = vshll.u32 %v7666_v48, 16  ;;  %v2443_v25 = vshrl.u32 %v7666_v48, 16 }
  0xae   : > { %6249 = vmatprep.subr.bf16.mxu1 %v6527_v14  ;;  %6298 = vmatpush3.bf16.msra.mxu0 %v6528_v13  ;;  %v7658_v13 = vld [vmem:[%s6643_s22 + $0x98] sm:$0x1]  ;;  %v2398_v2 = vor.u32 %v2397_v36, %v7636_v20  ;;  %v6535_v55 = vld [vmem:[%s9314_s1 + $0x160] sm:$0xff]   ;;  %v2412_v19 = vor.u32 %v2411_v15, %v2408_v30  ;;  %v2432_v31 = vrot.slane %v2430_v56, 4  ;;  %v2435_v50 = vrot.slane %v2433_v34, 5 }
  0xaf   : > { %6299 = vmatprep.subr.bf16.mxu0 %v7602_v12  ;;  %9375 = vst [vmem:[#allocation8_spill] sm:$0xff] %v7658_v13  ;;  %v2425_v36 = vshll.u32 %v7658_v13, 16  ;;  %v2445_v7 = vrot.slane %v2443_v25, 4  ;;  %v2449_v51 = vshll.u32 %v7669_v5, 16  ;;  %v5434_v48 = vld [vmem:[%s6643_s22 + $0xa8] sm:$0xf] }
  0xb0   : > { %v6539_v30 = vld [vmem:[%s9314_s1 + $0x158] sm:$0xff]   ;;  %v7692_v15 = vrot.slane %v2388_v49, 4  ;;  %v2454_v56 = vshrl.u32 %v5434_v48, 16  ;;  %v2457_v34 = vshll.u32 %v5434_v48, 16  ;;  %v7705_v5 = vld [vmem:[%s6643_s22 + $0xb0] sm:$0x1] }
  0xb1   : > { %6220 = vmatmul.mubr.bf16.gmra.mxu0 %v5462_v41  ;;  %6250 = vmatpush3.bf16.msra.mxu1 %v6527_v14  ;;  %v6540_v14 = vld [vmem:[%s9314_s1 + $0x198] sm:$0xff]   ;;  %v2422_v41 = vor.u32 %v2421_v23, %v7642_v37  ;;  %v7694_v23 = vrot.slane %v2401_v8, 5  ;;  %v6530_v49 = vld [vmem:[%s6643_s22 + $0x48] sm:$0xff]   ;;  %v7708_v8 = vrot.slane %v2398_v2, 4  ;;  %v7710_v13 = vrot.slane %v2412_v19, 4 }
  0xb2   : > { %6223 = vmatprep.mubr.bf16.mxu0 %v5463_v21  ;;  %6251 = vmatprep.subr.bf16.mxu1 %v6531_v6  ;;  %v7685_v21 = vrot.slane %v2439_v38, 5  ;;  %v2436_v38 = vor.u32 %v2435_v50, %v2432_v31  ;;  %v7712_v60 = vrot.slane %v2425_v36, 5  ;;  %v6543_v50 = vld [vmem:[%s9314_s1 + $0x150] sm:$0xff]   ;;  %v7729_v19 = vrot.slane %v2457_v34, 5 }
  0xb3   : > { %6300 = vmatpush3.bf16.msra.mxu0 %v7602_v12  ;;  %v7697_v12 = vld [vmem:[%s6643_s22 + $0xac] sm:$0xf]  ;;  %v2473_v36 = vshll.u32 %v7705_v5, 16 }
  0xb4   : > { %6172 = vmatmul.mubr.bf16.gmra.mxu1 %v6526_v61  ;;  %6301 = vmatprep.subr.bf16.mxu0 %v6536_v59  ;;  %9378 = vst [vmem:[#allocation11_spill] sm:$0xff] %v7697_v12  ;;  %v2356_v61 = vsel %vm6684_vm2, %v7604_v0, %v7606_v29  ;;  %v2446_v25 = vor.u32 %v2445_v7, %v7685_v21  ;;  %v2463_v48 = vshll.u32 %v7697_v12, 16  ;;  %v6533_v0 = vld [vmem:[%s6643_s22 + $0x54] sm:$0xff]   ;;  %v7719_v29 = vrot.slane %v2422_v41, 4 }
  0xb5   : > { %6175 = vmatprep.mubr.bf16.mxu1 %v6529_v39  ;;  %6252 = vmatpush3.bf16.msra.mxu1 %v6531_v6  ;;  %v6544_v6 = vld [vmem:[%s9314_s1 + $0x190] sm:$0xff]   ;;  %v7721_v7 = vrot.slane %v2449_v51, 5  ;;  %v7723_v39 = vrot.slane %v2454_v56, 4  ;;  %v2467_v2 = vshrl.u32 %v7697_v12, 16  ;;  %v7738_v41 = vrot.slane %v2436_v38, 4 }
  0xb6   : > { %6253 = vmatprep.subr.bf16.mxu1 %v6535_v55  ;;  %v7740_v31 = vrot.slane %v2446_v25, 4  ;;  %v5437_v56 = vld [vmem:[%s6643_s22 + $0xb4] sm:$0xf]  ;;  %v7744_v12 = vld [vmem:[%s6643_s22 + $0xb8] sm:$0xf]  ;;  %v6547_v25 = vld [vmem:[%s9314_s1 + $0x148] sm:$0xff]  }
  0xb7   : > { %6302 = vmatpush3.bf16.msra.mxu0 %v6536_v59  ;;  %v9379_v59 = vsel %vm6684_vm2, %v7542_v47, %v7520_v22  ;;  %9380 = vst [vmem:[#allocation12_spill] sm:$0xff] %v7744_v12  ;;  %v2370_v22 = vsel %vm6684_vm2, %v7619_v10, %v7548_v58  ;;  %v7756_v47 = vrot.slane %v2463_v48, 5  ;;  %v5440_v38 = vld [vmem:[%s6643_s22 + $0xc0] sm:$0xf]  ;;  %v2380_v58 = vsel %vm6684_vm2, %v7627_v16, %v7621_v52  ;;  %v7783_v48 = vld [vmem:[%s6643_s22 + $0xc4] sm:$0xf] }
  0xb8   : > { %6303 = vmatprep.subr.bf16.mxu0 %v6540_v14  ;;  %v5466_v51 = vcombine.low %v9379_v59, %v2332_v26  ;;  %v2478_v26 = vshrl.u32 %v5437_v56, 16  ;;  %v2394_v10 = vsel %vm6684_vm2, %v7692_v15, %v7636_v20  ;;  %9383 = vst [vmem:[#allocation14_spill] sm:$0xff] %v7783_v48  ;;  %v7786_v52 = vld [vmem:[%s6643_s22 + $0xc8] sm:$0x1]  ;;  %v2511_v59 = vshll.u32 %v7783_v48, 16 }
  0xb9   : > { %6224 = vmatmul.mubr.bf16.gmra.mxu0 %v7644_v44  ;;  %6254 = vmatpush3.bf16.msra.mxu1 %v6535_v55  ;;  %v9381_v44 = vsel %vm6684_vm2, %v7594_v3, %v7532_v54  ;;  %v2469_v55 = vrot.slane %v2467_v2, 4  ;;  %v2481_v54 = vshll.u32 %v5437_v56, 16  ;;  %v2487_v3 = vshll.u32 %v7744_v12, 16 }
  0xba   : > { %6227 = vmatprep.mubr.bf16.mxu0 %v7647_v53  ;;  %v5467_v34 = vcombine.low %v9381_v44, %v2356_v61  ;;  %6255 = vmatprep.subr.bf16.mxu1 %v6539_v30  ;;  %v6548_v53 = vld [vmem:[%s9314_s1 + $0x188] sm:$0xff]   ;;  %v2491_v61 = vshrl.u32 %v7744_v12, 16  ;;  %v2480_v16 = vrot.slane %v2478_v26, 4  ;;  %v9384_v56 = vrot.slane %v7191_v33, 5 }
  0xbb   : > { %6304 = vmatpush3.bf16.msra.mxu0 %v6540_v14  ;;  %v2404_v14 = vsel %vm6684_vm2, %v7708_v8, %v7694_v23  ;;  %v2483_v20 = vrot.slane %v2481_v54, 5  ;;  %v7788_v15 = vrot.slane %v2487_v3, 5  ;;  %v2502_v23 = vshrl.u32 %v5440_v38, 16  ;;  %v6534_v3 = vld [vmem:[%s6643_s22 + $0x60] sm:$0xff]  }
  0xbc   : > { %6176 = vmatmul.mubr.bf16.gmra.mxu1 %v6530_v49  ;;  %6305 = vmatprep.subr.bf16.mxu0 %v6544_v6  ;;  %v7780_v49 = vld [vmem:[%s6643_s22 + $0xbc] sm:$0x1]  ;;  %v2493_v2 = vrot.slane %v2491_v61, 4  ;;  %v2505_v8 = vshll.u32 %v5440_v38, 16  ;;  %v7793_v44 = vrot.slane %v9384_v56, 4  ;;  %v7798_v26 = vrot.slane %v2473_v36, 5 }
  0xbd   : > { %9382 = vst [vmem:[#allocation13_spill] sm:$0xff] %v7780_v49  ;;  %6179 = vmatprep.mubr.bf16.mxu1 %v6533_v0  ;;  %6256 = vmatpush3.bf16.msra.mxu1 %v6539_v30  ;;  %v2460_v0 = vor.u32 %v7729_v19, %v7723_v39  ;;  %v2470_v30 = vor.u32 %v2469_v55, %v7756_v47  ;;  %v2515_v54 = vshrl.u32 %v7783_v48, 16  ;;  %v2497_v61 = vshll.u32 %v7780_v49, 16  ;;  %v6537_v39 = vld [vmem:[%s6643_s22 + $0x6c] sm:$0xff]   ;;  %v7818_v49 = vld [vmem:[%s6643_s22 + $0x18] sm:$0xe] }
  0xbe   : > { %6257 = vmatprep.subr.bf16.mxu1 %v6543_v50  ;;  %v2504_v38 = vrot.slane %v2502_v23, 4  ;;  %v2507_v12 = vrot.slane %v2505_v8, 5  ;;  %v7803_v56 = vrot.slane %v2511_v59, 5  ;;  %v2484_v19 = vor.u32 %v2483_v20, %v2480_v16  ;;  %v6551_v23 = vld [vmem:[%s9314_s1 + $0x140] sm:$0xff]   ;;  %v7815_v59 = vld [vmem:[%s6643_s22 + $0xc] sm:$0xe] }
  0xbf   : > { %6306 = vmatpush3.bf16.msra.mxu0 %v6544_v6  ;;  %v6552_v6 = vld [vmem:[%s9314_s1 + $0x180] sm:$0xff]   ;;  %v2494_v36 = vor.u32 %v2493_v2, %v7788_v15  ;;  %v2517_v55 = vrot.slane %v2515_v54, 4  ;;  %v2521_v48 = vshll.u32 %v7786_v52, 16  ;;  %v5468_v16 = vcombine.low %v2370_v22, %v2380_v58 }
  0xc0   : > { %6307 = vmatprep.subr.bf16.mxu0 %v6548_v53  ;;  %v2508_v8 = vor.u32 %v2507_v12, %v2504_v38  ;;  %v5469_v20 = vcombine.low %v2394_v10, %v2404_v14  ;;  %v7826_v2 = vrot.slane %v2460_v0, 4  ;;  %v7828_v12 = vrot.slane %v2470_v30, 4  ;;  %v6538_v10 = vld [vmem:[%s6643_s22 + $0x78] sm:$0xff]   ;;  %v6541_v38 = vld [vmem:[%s6643_s22 + $0x84] sm:$0xff]  }
  0xc1   : > { %6228 = vmatmul.mubr.bf16.gmra.mxu0 %v5466_v51  ;;  %6258 = vmatpush3.bf16.msra.mxu1 %v6543_v50  ;;  %v7823_v50 = vld [vmem:[%s9314_s1 + $0x238] sm:$0xff]   ;;  %v2518_v51 = vor.u32 %v2517_v55, %v7803_v56  ;;  %v7837_v54 = vrot.slane %v2494_v36, 4  ;;  %v7839_v22 = vrot.slane %v2497_v61, 5  ;;  %v7845_v0 = vrot.slane %v2521_v48, 5  ;;  %v5486_v61 = vld [vmem:[%s6643_s22 + $0x30] sm:$0xe] }
  0xc2   : > { %6231 = vmatprep.mubr.bf16.mxu0 %v5467_v34  ;;  %6259 = vmatprep.subr.bf16.mxu1 %v6547_v25  ;;  %v7833_v34 = vld [vmem:[%s9314_s1 + $0x1f8] sm:$0xff]   ;;  %v7843_v14 = vrot.slane %v2508_v8, 4  ;;  %v2916_v30 = vrot.slane %v7265_v43, 5  ;;  %v9385_v36 = vld [vmem:[#allocation3_spill] sm:$0xff]  ;;  %v5502_v48 = vrot.slane %v5486_v61, 9  ;;  %v9388_v61 = vld [vmem:[#allocation4_spill] sm:$0xff] }
  0xc3   : > { %6308 = vmatpush3.bf16.msra.mxu0 %v6548_v53  ;;  %v7835_v53 = vrot.slane %v2484_v19, 4  ;;  %v9386_v8 = vld [vmem:[#allocation6_spill] sm:$0xff]  ;;  %v2937_v19 = vrot.slane %v7348_v1, 5  ;;  %v2452_v1 = vsel %vm6684_vm2, %v7740_v31, %v7721_v7  ;;  %v2951_v31 = vrot.slane %v7439_v42, 5 }
  0xc4   : > { %6180 = vmatmul.mubr.bf16.gmra.mxu1 %v6534_v3  ;;  %6309 = vmatprep.subr.bf16.mxu0 %v6552_v6  ;;  %v2934_v58 = vrot.slane %v9386_v8, 5  ;;  %v9387_v3 = vld [vmem:[#allocation5_spill] sm:$0xff] }
  0xc5   : > { %6183 = vmatprep.mubr.bf16.mxu1 %v6537_v39  ;;  %6260 = vmatpush3.bf16.msra.mxu1 %v6547_v25  ;;  %v7850_v25 = vrot.slane %v2518_v51, 4  ;;  %v2920_v39 = vrot.slane %v7282_v62, 5  ;;  %v2418_v51 = vsel %vm6684_vm2, %v7710_v13, %v7642_v37  ;;  %v2941_v55 = vrot.slane %v9387_v3, 5  ;;  %v5487_v13 = vld [vmem:[%s6643_s22 + $0x3c] sm:$0xe] }
  0xc6   : > { %6261 = vmatprep.subr.bf16.mxu1 %v6551_v23  ;;  %v7872_v8 = vsel %vm6995_vm5, %v5502_v48, %v2934_v58  ;;  %v2936_v37 = vrot.slane %v2934_v58, 4  ;;  %v5503_v3 = vrot.slane %v5487_v13, 9  ;;  %v6542_v48 = vld [vmem:[%s6643_s22 + $0x90] sm:$0xff]   ;;  %v2958_v13 = vrot.slane %v7459_v35, 5 }
  0xc7   : > { %6310 = vmatpush3.bf16.msra.mxu0 %v6552_v6  ;;  %v2428_v6 = vsel %vm6684_vm2, %v7719_v29, %v7712_v60  ;;  %v2442_v60 = vsel %vm6684_vm2, %v7738_v41, %v7685_v21  ;;  %v2943_v29 = vrot.slane %v2941_v55, 4  ;;  %v2948_v21 = vrot.slane %v7398_v40, 5 }
  0xc8   : > { %6391 = vmatprep.subr.bf16.mxu0 %v7823_v50  ;;  %v7886_v58 = vsel %vm6995_vm5, %v2936_v37, %v2937_v19  ;;  %v5471_v19 = vcombine.low %v2442_v60, %v2452_v1  ;;  %v7901_v40 = vsel %vm6995_vm5, %v5503_v3, %v2941_v55  ;;  %v2466_v37 = vsel %vm6684_vm2, %v7826_v2, %v7756_v47  ;;  %v5489_v55 = vld [vmem:[%s6643_s22 + $0x54] sm:$0xe] }
  0xc9   : > { %6232 = vmatmul.mubr.bf16.gmra.mxu0 %v5468_v16  ;;  %6262 = vmatpush3.bf16.msra.mxu1 %v6551_v23  ;;  %v2930_v16 = vrot.slane %v9388_v61, 5  ;;  %v2944_v23 = vrot.slane %v7377_v46, 5  ;;  %v5534_v41 = vcombine.low %v7872_v8, %v7886_v58  ;;  %v5488_v46 = vld [vmem:[%s6643_s22 + $0x48] sm:$0xe]  ;;  %v2476_v47 = vsel %vm6684_vm2, %v7828_v12, %v7798_v26  ;;  %v6562_v8 = vld [vmem:[%s6643_s22 + $0x54] sm:$0xff]  }
  0xca   : > { %6235 = vmatprep.mubr.bf16.mxu0 %v5469_v20  ;;  %6343 = vmatprep.subr.bf16.mxu1 %v7833_v34  ;;  %v5470_v20 = vcombine.low %v2418_v51, %v2428_v6  ;;  %v2950_v51 = vrot.slane %v2948_v21, 4  ;;  %v6545_v6 = vld [vmem:[%s6643_s22 + $0x9c] sm:$0xff]   ;;  %v2962_v3 = vrot.slane %v7463_v32, 5  ;;  %v2490_v35 = vsel %vm6684_vm2, %v7835_v53, %v7788_v15 }
  0xcb   : > { %v7893_v7 = vsel %vm6995_vm5, %v2943_v29, %v2944_v23  ;;  %v5505_v29 = vrot.slane %v5489_v55, 9  ;;  %v5490_v23 = vld [vmem:[%s6643_s22 + $0x60] sm:$0xe]  ;;  %v2965_v26 = vrot.slane %v7511_v17, 5  ;;  %v2500_v12 = vsel %vm6684_vm2, %v7837_v54, %v7839_v22 }
  0xcc   : > { %6184 = vmatmul.mubr.bf16.gmra.mxu1 %v6538_v10  ;;  %v2955_v10 = vrot.slane %v7433_v11, 5  ;;  %v5535_v42 = vcombine.low %v7901_v40, %v7893_v7  ;;  %v7916_v60 = vsel %vm6995_vm5, %v2950_v51, %v2951_v31  ;;  %v2969_v15 = vrot.slane %v7503_v9, 5  ;;  %v5716_v7 = vld [vmem:[%s6643_s22 + $0x24] sm:$0xe] }
  0xcd   : > { %6187 = vmatprep.mubr.bf16.mxu1 %v6541_v38  ;;  %v5504_v38 = vrot.slane %v5488_v46, 9  ;;  %v2964_v46 = vrot.slane %v2962_v3, 4  ;;  %v5472_v53 = vcombine.low %v2466_v37, %v2476_v47  ;;  %v2972_v9 = vrot.slane %v7524_v63, 5  ;;  %v5492_v37 = vld [vmem:[%s6643_s22 + $0x78] sm:$0xe] }
  0xce   : > { %v2957_v1 = vrot.slane %v2955_v10, 4  ;;  %v7943_v32 = vsel %vm6995_vm5, %v5505_v29, %v2955_v10  ;;  %v2971_v10 = vrot.slane %v2969_v15, 4  ;;  %v2976_v55 = vrot.slane %v7528_v45, 5 }
  0xcf   : > { %v7912_v11 = vsel %vm6995_vm5, %v5504_v38, %v2948_v21  ;;  %v5506_v21 = vrot.slane %v5490_v23, 9  ;;  %v7955_v54 = vsel %vm6995_vm5, %v2964_v46, %v2965_v26  ;;  %v5473_v38 = vcombine.low %v2490_v35, %v2500_v12 }
  0xd0   : > { %v7971_v47 = vsel %vm6995_vm5, %v2971_v10, %v2972_v9  ;;  %v5508_v63 = vrot.slane %v5492_v37, 9  ;;  %v2983_v29 = vrot.slane %v7571_v4, 5  ;;  %v2978_v45 = vrot.slane %v2976_v55, 4  ;;  %v6553_v9 = vld [vmem:[%s6643_s22 + $0x18] sm:$0xff]  }
  0xd1   : > { %6236 = vmatmul.mubr.bf16.gmra.mxu0 %v5470_v20  ;;  %v7934_v20 = vsel %vm6995_vm5, %v2957_v1, %v2958_v13  ;;  %v7950_v17 = vsel %vm6995_vm5, %v5506_v21, %v2962_v3  ;;  %v2979_v1 = vrot.slane %v7535_v27, 5  ;;  %v2986_v27 = vrot.slane %v7597_v18, 5  ;;  %v5493_v21 = vld [vmem:[%s6643_s22 + $0x84] sm:$0xe]  ;;  %v9393_v37 = vld [vmem:[#allocation9_spill] sm:$0xff] }
  0xd2   : > { %6239 = vmatprep.mubr.bf16.mxu0 %v5471_v19  ;;  %v5491_v19 = vld [vmem:[%s6643_s22 + $0x6c] sm:$0xe]  ;;  %v2514_v3 = vsel %vm6684_vm2, %v7843_v14, %v7803_v56  ;;  %v7983_v35 = vsel %vm6995_vm5, %v5508_v63, %v2976_v55  ;;  %v2524_v4 = vsel %vm6684_vm2, %v7850_v25, %v7845_v0  ;;  %v5509_v26 = vrot.slane %v5493_v21, 9  ;;  %v9391_v0 = vld [vmem:[#allocation7_spill] sm:$0xff] }
  0xd3   : > { %v5507_v22 = vrot.slane %v5491_v19, 9  ;;  %v7992_v18 = vsel %vm6995_vm5, %v2978_v45, %v2979_v1  ;;  %v2985_v12 = vrot.slane %v2983_v29, 4  ;;  %v9389_v46 = vrot.slane %v7191_v33, 5  ;;  %v5494_v19 = vld [vmem:[%s6643_s22 + $0x90] sm:$0xe]  ;;  %v6565_v63 = vld [vmem:[%s6643_s22 + $0x60] sm:$0xff]  }
  0xd4   : > { %6188 = vmatmul.mubr.bf16.gmra.mxu1 %v6542_v48  ;;  %v6546_v48 = vld [vmem:[%s6643_s22 + $0xa8] sm:$0xff]   ;;  %v9390_v56 = vrot.slane %v7815_v59, 9  ;;  %v2990_v25 = vrot.slane %v9391_v0, 5  ;;  %v8009_v33 = vsel %vm6995_vm5, %v5509_v26, %v2983_v29  ;;  %v2997_v55 = vrot.slane %v9393_v37, 5 }
  0xd5   : > { %6191 = vmatprep.mubr.bf16.mxu1 %v6545_v6  ;;  %v6549_v6 = vld [vmem:[%s6643_s22 + $0xb4] sm:$0xff]   ;;  %v7967_v13 = vsel %vm6995_vm5, %v5507_v22, %v2969_v15  ;;  %v5485_v15 = vld [vmem:[%s6643_s22 + $0x24] sm:$0xe]  ;;  %v9392_v22 = vld [vmem:[#allocation8_spill] sm:$0xff]  ;;  %v8013_v59 = vsel %vm6995_vm5, %v2985_v12, %v2986_v27  ;;  %v5474_v1 = vcombine.low %v2514_v3, %v2524_v4  ;;  %v2917_v29 = vsel %vm6995_vm5, %v7793_v44, %v2916_v30 }
  0xd6   : > { %v2914_v14 = vsel %vm6995_vm5, %v9390_v56, %v9389_v46  ;;  %v2993_v10 = vrot.slane %v9392_v22, 5  ;;  %v2992_v45 = vrot.slane %v2990_v25, 4  ;;  %v6550_v46 = vld [vmem:[%s6643_s22 + $0xc0] sm:$0xff]   ;;  %v2922_v27 = vrot.slane %v2920_v39, 4  ;;  %v5495_v3 = vld [vmem:[%s6643_s22 + $0x9c] sm:$0xe] }
  0xd7   : > { %v2999_v4 = vrot.slane %v2997_v55, 4  ;;  %v5511_v12 = vrot.slane %v5495_v3, 9  ;;  %v9395_v56 = vld [vmem:[#allocation11_spill] sm:$0xff]  ;;  %v5531_v22 = vcombine.low %v2914_v14, %v2917_v29  ;;  %v9399_v29 = vrot.slane %v7818_v49, 9  ;;  %v8157_v44 = vld [vmem:[%s6643_s22 + $0x34] sm:$0xf] }
  0xd8   : > { %v8034_v26 = vsel %vm6995_vm5, %v2992_v45, %v2993_v10  ;;  %v3004_v43 = vrot.slane %v9395_v56, 5  ;;  %v5496_v0 = vld [vmem:[%s6643_s22 + $0xa8] sm:$0xe]  ;;  %v3838_v40 = vshll.u32 %v8157_v44, 16 }
  0xd9   : > { %6240 = vmatmul.mubr.bf16.gmra.mxu0 %v5472_v53  ;;  %v8047_v10 = vsel %vm6995_vm5, %v5511_v12, %v2997_v55  ;;  %v5497_v55 = vld [vmem:[%s6643_s22 + $0xb4] sm:$0xe] }
  0xda   : > { %6243 = vmatprep.mubr.bf16.mxu0 %v5473_v38  ;;  %v5510_v38 = vrot.slane %v5494_v19, 9  ;;  %v5501_v19 = vrot.slane %v5485_v15, 9  ;;  %v3006_v37 = vrot.slane %v3004_v43, 4  ;;  %v9396_v15 = vrot.slane %v9385_v36, 5 }
  0xdb   : > { %v5513_v56 = vrot.slane %v5497_v55, 9 }
  0xdc   : > { %6192 = vmatmul.mubr.bf16.gmra.mxu1 %v6546_v48  ;;  %v9394_v48 = vld [vmem:[#allocation10_spill] sm:$0xff]  ;;  %v2929_v45 = vrot.slane %v9396_v15, 4  ;;  %v9401_v62 = vmov %v9396_v15  ;;  %v3021_v15 = vrot.slane %v7786_v52, 5  ;;  %v5633_v52 = vld [vmem:[%s6643_s22 + $0x30] sm:$0xf] }
  0xdd   : > { %6195 = vmatprep.mubr.bf16.mxu1 %v6549_v6  ;;  %v3000_v21 = vrot.slane %v9394_v48, 5  ;;  %v8029_v6 = vsel %vm6995_vm5, %v5510_v38, %v2990_v25  ;;  %v3007_v25 = vrot.slane %v7705_v5, 5  ;;  %v5512_v38 = vrot.slane %v5496_v0, 9 }
  0xde   : > { %v9400_v0 = vrot.slane %v7296_v24, 5  ;;  %v2928_v49 = vsel %vm6995_vm5, %v5501_v19, %v9401_v62  ;;  %v2931_v24 = vsel %vm6995_vm5, %v2929_v45, %v2930_v16  ;;  %v8127_v62 = vld [vmem:[%s6643_s22 + $0x28] sm:$0xf] }
  0xdf   : > { %v8041_v30 = vsel %vm6995_vm5, %v2999_v4, %v3000_v21  ;;  %v9397_v21 = vld [vmem:[#allocation12_spill] sm:$0xff]  ;;  %v8056_v5 = vsel %vm6995_vm5, %v5512_v38, %v3004_v43  ;;  %v8060_v14 = vsel %vm6995_vm5, %v3006_v37, %v3007_v25  ;;  %v2921_v4 = vsel %vm6995_vm5, %v9399_v29, %v2920_v39  ;;  %v5498_v38 = vld [vmem:[%s6643_s22 + $0xc0] sm:$0xe] }
  0xe0   : > { %v3011_v3 = vrot.slane %v9397_v21, 5  ;;  %v2924_v25 = vsel %vm6995_vm5, %v2922_v27, %v9400_v0  ;;  %v9402_v39 = vld [vmem:[#allocation14_spill] sm:$0xff]  ;;  %v5514_v19 = vrot.slane %v5498_v38, 9  ;;  %v6560_v21 = vld [vmem:[%s9314_s1 + $0x230] sm:$0xff]   ;;  %v5533_v55 = vcombine.low %v2928_v49, %v2931_v24  ;;  %v5630_v0 = vld [vmem:[%s6643_s22 + $0x24] sm:$0xf] }
  0xe1   : > { %6244 = vmatmul.mubr.bf16.gmra.mxu0 %v5474_v1  ;;  %v3018_v37 = vrot.slane %v9402_v39, 5  ;;  %v5532_v16 = vcombine.low %v2921_v4, %v2924_v25  ;;  %v6559_v29 = vld [vmem:[%s9314_s1 + $0x1f0] sm:$0xff]   ;;  %v6558_v49 = vld [vmem:[%s6643_s22 + $0x3c] sm:$0xff]   ;;  %v3805_v38 = vshrl.u32 %v5630_v0, 16  ;;  %v6561_v39 = vld [vmem:[%s6643_s22 + $0x48] sm:$0xff]   ;;  %v3814_v24 = vshll.u32 %v8127_v62, 16 }
  0xe2   : > { %6311 = vmatprep.mubr.bf16.mxu0 %v6553_v9  ;;  %v9398_v9 = vld [vmem:[#allocation13_spill] sm:$0xff]  ;;  %v3013_v43 = vrot.slane %v3011_v3, 4  ;;  %v8091_v27 = vsel %vm6995_vm5, %v5513_v56, %v3011_v3  ;;  %v6564_v56 = vld [vmem:[%s9314_s1 + $0x228] sm:$0xff]  }
  0xe3   : > { %v3014_v1 = vrot.slane %v9398_v9, 5  ;;  %v3020_v61 = vrot.slane %v3018_v37, 4  ;;  %v8104_v45 = vsel %vm6995_vm5, %v5514_v19, %v3018_v37  ;;  %v5627_v3 = vld [vmem:[%s6643_s22 + $0x18] sm:$0xf]  ;;  %v6563_v37 = vld [vmem:[%s9314_s1 + $0x1e8] sm:$0xff]   ;;  %v3807_v12 = vrot.slane %v3805_v38, 4 }
  0xe4   : > { %6196 = vmatmul.mubr.bf16.gmra.mxu1 %v6550_v46  ;;  %v6554_v46 = vld [vmem:[%s6643_s22 + $0x24] sm:$0xff]   ;;  %v3784_v25 = vshll.u32 %v5627_v3, 16  ;;  %v5629_v19 = vld [vmem:[%s6643_s22 + $0x20] sm:$0x1]  ;;  %v3829_v38 = vshrl.u32 %v5633_v52, 16 }
  0xe5   : > { %6263 = vmatprep.mubr.bf16.mxu1 %v5531_v22  ;;  %v6557_v22 = vld [vmem:[%s6643_s22 + $0x30] sm:$0xff]   ;;  %v8095_v36 = vsel %vm6995_vm5, %v3013_v43, %v3014_v1  ;;  %v8109_v9 = vsel %vm6995_vm5, %v3020_v61, %v3021_v15  ;;  %v8112_v1 = vld [vmem:[%s6643_s22 + $0x1c] sm:$0xf]  ;;  %v3781_v43 = vshrl.u32 %v5627_v3, 16  ;;  %v3808_v15 = vshll.u32 %v5630_v0, 16 }
  0xe6   : > { %v4552_v4 = vrot.slane %v8112_v1, 5  ;;  %v8147_v0 = vld [vmem:[%s6643_s22 + $0x2c] sm:$0x1] }
  0xe7   : > { %v3783_v61 = vrot.slane %v3781_v43, 4  ;;  %v3810_v48 = vrot.slane %v3808_v15, 5  ;;  %v6567_v43 = vld [vmem:[%s9314_s1 + $0x1e0] sm:$0xff]  }
  0xe9   : > { %6312 = vmatmul.mubr.bf16.vlgmr.msra.gmra.mxu0 %v6554_v46  ;;  %v3794_v46 = vshrl.u32 %v8112_v1, 16 }
  0xea   : > { %6392 = vmatpush3.bf16.msra.mxu0 %v7823_v50  ;;  %6315 = vmatprep.mubr.bf16.mxu0 %v6557_v22  ;;  %v3790_v50 = vshll.u32 %v8112_v1, 16  ;;  %v3818_v22 = vshrl.u32 %v8127_v62, 16 }
  0xeb   : > { %6393 = vmatprep.subr.bf16.mxu0 %v6560_v21 }
  0xec   : > { %6264 = vmatmul.mubr.bf16.vlgmr.msra.gmra.mxu1 %v5532_v16  ;;  %v5715_v16 = vld [vmem:[%s6643_s22 + $0x18] sm:$0xe]  ;;  %v8142_v3 = vrot.slane %v3790_v50, 5  ;;  %v3800_v50 = vshll.u32 %v5629_v19, 16  ;;  %v3820_v1 = vrot.slane %v3818_v22, 4 }
  0xed   : > { %6344 = vmatpush3.bf16.msra.mxu1 %v7833_v34  ;;  %6267 = vmatprep.mubr.bf16.mxu1 %v5533_v55  ;;  %v6568_v34 = vld [vmem:[%s9314_s1 + $0x220] sm:$0xff]   ;;  %v3796_v55 = vrot.slane %v3794_v46, 4  ;;  %v8154_v46 = vrot.slane %v3814_v24, 5  ;;  %v6572_v24 = vld [vmem:[%s9314_s1 + $0x218] sm:$0xff]  }
  0xee   : > { %6345 = vmatprep.subr.bf16.mxu1 %v6559_v29  ;;  %6394 = vmatpush3.bf16.msra.mxu0 %v6560_v21  ;;  %v3786_v21 = vrot.slane %v3784_v25, 5 }
  0xef   : > { %6395 = vmatprep.subr.bf16.mxu0 %v6564_v56  ;;  %v3797_v22 = vor.u32 %v3796_v55, %v8142_v3  ;;  %v3821_v55 = vor.u32 %v3820_v1, %v8154_v46 }
  0xf1   : > { %6316 = vmatmul.mubr.bf16.gmra.mxu0 %v6558_v49  ;;  %6346 = vmatpush3.bf16.msra.mxu1 %v6559_v29  ;;  %v5731_v49 = vrot.slane %v5715_v16, 9  ;;  %v4555_v29 = vrot.slane %v5629_v19, 5  ;;  %v4554_v19 = vrot.slane %v4552_v4, 4  ;;  %v3824_v16 = vshll.u32 %v8147_v0, 16 }
  0xf2   : > { %6319 = vmatprep.mubr.bf16.mxu0 %v6561_v39  ;;  %6347 = vmatprep.subr.bf16.mxu1 %v6563_v37  ;;  %v3832_v39 = vshll.u32 %v5633_v52, 16  ;;  %v4559_v52 = vrot.slane %v8127_v62, 5  ;;  %v3842_v62 = vshrl.u32 %v8157_v44, 16 }
  0xf3   : > { %6396 = vmatpush3.bf16.msra.mxu0 %v6564_v56  ;;  %v3787_v56 = vor.u32 %v3786_v21, %v3783_v61  ;;  %v6571_v61 = vld [vmem:[%s9314_s1 + $0x1d8] sm:$0xff]   ;;  %v8180_v21 = vrot.slane %v3800_v50, 5  ;;  %v6576_v50 = vld [vmem:[%s9314_s1 + $0x210] sm:$0xff]  }
  0xf4   : > { %6268 = vmatmul.mubr.bf16.gmra.mxu1 %v5534_v41  ;;  %6397 = vmatprep.subr.bf16.mxu0 %v6568_v34  ;;  %v3811_v41 = vor.u32 %v3810_v48, %v3807_v12  ;;  %v3831_v48 = vrot.slane %v3829_v38, 4  ;;  %v3834_v12 = vrot.slane %v3832_v39, 5  ;;  %v8207_v38 = vld [vmem:[%s6643_s22 + $0x40] sm:$0xf]  ;;  %v4561_v51 = vrot.slane %v4559_v52, 4 }
  0xf5   : > { %6271 = vmatprep.mubr.bf16.mxu1 %v5535_v42  ;;  %6348 = vmatpush3.bf16.msra.mxu1 %v6563_v37  ;;  %v8187_v42 = vsel %vm6995_vm5, %v5731_v49, %v4552_v4  ;;  %v5636_v37 = vld [vmem:[%s6643_s22 + $0x3c] sm:$0xf]  ;;  %v8196_v1 = vrot.slane %v3787_v56, 4  ;;  %v8202_v4 = vsel %vm6995_vm5, %v4554_v19, %v4555_v29  ;;  %v8204_v49 = vrot.slane %v3824_v16, 5  ;;  %v6575_v56 = vld [vmem:[%s9314_s1 + $0x1d0] sm:$0xff]  }
  0xf6   : > { %v8152_v25 = vpop.f32.mrf.mxu0  ;;  %v8162_v15 = vpop.f32.mrf.mxu1  ;;  %6349 = vmatprep.subr.bf16.mxu1 %v6567_v43  ;;  %v8214_v23 = vrot.slane %v3811_v41, 4  ;;  %v4562_v29 = vrot.slane %v8147_v0, 5  ;;  %v3822_v19 = vrot.slane %v3821_v55, 4  ;;  %v8218_v16 = vld [vmem:[%s6643_s22 + $0x38] sm:$0x1]  ;;  %v3856_v31 = vshll.u32 %v5636_v37, 16 }
  0xf7   : > { %9403 = vst [vmem:[#allocation3_spill] sm:$0xff] %v8162_v15  ;;  %6398 = vmatpush3.bf16.msra.mxu0 %v6568_v34  ;;  %v8198_v34 = vrot.slane %v3797_v22, 4  ;;  %v5732_v22 = vrot.slane %v5716_v7, 9  ;;  %v3835_v2 = vor.u32 %v3834_v12, %v3831_v48  ;;  %v5717_v41 = vld [vmem:[%s6643_s22 + $0x30] sm:$0xe]  ;;  %v3862_v7 = vshll.u32 %v8207_v38, 16 }
  0xf8   : > { %v8173_v58 = vpop.f32.mrf.mxu0  ;;  %v8191_v53 = vpop.f32.mrf.mxu1  ;;  %6399 = vmatprep.subr.bf16.mxu0 %v6572_v24  ;;  %v3866_v0 = vshrl.u32 %v8207_v38, 16  ;;  %v9407_v12 = vcombine.low %v7943_v32, %v7934_v20  ;;  %v8263_v20 = vsel %vm6995_vm5, %v4561_v51, %v4562_v29  ;;  %v3848_v32 = vshll.u32 %v8218_v16, 16  ;;  %v8281_v29 = vld [vmem:[%s6643_s22 + $0x44] sm:$0x1]  ;;  %v5718_v15 = vld [vmem:[%s6643_s22 + $0x3c] sm:$0xe] }
  0xf9   : > { %9404 = vst [vmem:[#allocation6_spill] sm:$0xff] %v8191_v53  ;;  %6320 = vmatmul.mubr.bf16.gmra.mxu0 %v6562_v8  ;;  %6350 = vmatpush3.bf16.msra.mxu1 %v6567_v43  ;;  %v8220_v8 = vrot.slane %v3838_v40, 5  ;;  %v3853_v43 = vshrl.u32 %v5636_v37, 16  ;;  %v8222_v53 = vrot.slane %v3842_v62, 4  ;;  %v3793_v40 = vsel %vm6684_vm2, %v8196_v1, %v8142_v3  ;;  %v6566_v62 = vld [vmem:[%s6643_s22 + $0x6c] sm:$0xff]   ;;  %v6569_v37 = vld [vmem:[%s6643_s22 + $0x78] sm:$0xff]  }
  0xfa   : > { %v8209_v39 = vpop.f32.mrf.mxu0  ;;  %6323 = vmatprep.mubr.bf16.mxu0 %v6565_v63  ;;  %6351 = vmatprep.subr.bf16.mxu1 %v6571_v61  ;;  %v9405_v63 = vcombine.low %v7912_v11, %v7916_v60  ;;  %v8230_v55 = vpop.f32.mrf.mxu1  ;;  %v3803_v48 = vsel %vm6684_vm2, %v8198_v34, %v8180_v21  ;;  %v4566_v60 = vrot.slane %v8157_v44, 5  ;;  %v3817_v3 = vsel %vm6684_vm2, %v8214_v23, %v8154_v46  ;;  %v5639_v44 = vld [vmem:[%s6643_s22 + $0x48] sm:$0xf]  ;;  %v8274_v34 = vld [vmem:[%s6643_s22 + $0x4c] sm:$0xf] }
  0xfb   : > { %6400 = vmatpush3.bf16.msra.mxu0 %v6572_v24  ;;  %9406 = vst [vmem:[#allocation5_spill] sm:$0xff] %v8230_v55  ;;  %v6580_v24 = vld [vmem:[%s9314_s1 + $0x208] sm:$0xff]   ;;  %v8259_v21 = vsel %vm6995_vm5, %v5732_v22, %v4559_v52  ;;  %v3827_v23 = vsel %vm6684_vm2, %v3822_v19, %v8204_v49  ;;  %v5733_v46 = vrot.slane %v5717_v41, 9  ;;  %v3855_v1 = vrot.slane %v3853_v43, 4  ;;  %v6583_v43 = vld [vmem:[%s9314_s1 + $0x1c0] sm:$0xff]  }
  0xfc   : > { %6272 = vmatmul.mubr.bf16.gmra.mxu1 %v9405_v63  ;;  %6401 = vmatprep.subr.bf16.mxu0 %v6576_v50  ;;  %v8251_v63 = vpop.f32.mrf.mxu0  ;;  %v3858_v52 = vrot.slane %v3856_v31, 5  ;;  %v8276_v51 = vrot.slane %v3835_v2, 4  ;;  %v3845_v22 = vor.u32 %v8222_v53, %v8220_v8  ;;  %v3868_v11 = vrot.slane %v3866_v0, 4  ;;  %v8285_v55 = vpop.f32.mrf.mxu1  ;;  %v6584_v31 = vld [vmem:[%s9314_s1 + $0x200] sm:$0xff]  }
  0xfd   : > { %6275 = vmatprep.mubr.bf16.mxu1 %v9407_v12  ;;  %6352 = vmatpush3.bf16.msra.mxu1 %v6571_v61  ;;  %9408 = vst [vmem:[#allocation4_spill] sm:$0xff] %v8251_v63  ;;  %v6579_v61 = vld [vmem:[%s9314_s1 + $0x1c8] sm:$0xff]   ;;  %v8283_v12 = vrot.slane %v3862_v7, 5  ;;  %9409 = vst [vmem:[#allocation7_spill] sm:$0xff] %v8285_v55  ;;  %v4568_v49 = vrot.slane %v4566_v60, 4  ;;  %v3877_v2 = vshrl.u32 %v5639_v44, 16  ;;  %v8296_v41 = vcombine.low %v3793_v40, %v3803_v48 }
  0xfe   : > { %6353 = vmatprep.subr.bf16.mxu1 %v6575_v56  ;;  %v3880_v19 = vshll.u32 %v5639_v44, 16  ;;  %v3890_v0 = vshrl.u32 %v8274_v34, 16  ;;  %v8304_v44 = vrot.slane %v3848_v32, 5  ;;  %v3872_v55 = vshll.u32 %v8281_v29, 16  ;;  %v5642_v40 = vld [vmem:[%s6643_s22 + $0x54] sm:$0xf] }
  0xff   : > { %6402 = vmatpush3.bf16.msra.mxu0 %v6576_v50  ;;  %v4569_v50 = vrot.slane %v8218_v16, 5  ;;  %v3886_v16 = vshll.u32 %v8274_v34, 16  ;;  %v4573_v32 = vrot.slane %v8207_v38, 5  ;;  %v9413_v38 = vcombine.low %v7967_v13, %v7971_v47  ;;  %v6570_v7 = vld [vmem:[%s6643_s22 + $0x84] sm:$0xff]   ;;  %v6573_v48 = vld [vmem:[%s6643_s22 + $0x90] sm:$0xff]  }
 0x100   : > { %6403 = vmatprep.subr.bf16.mxu0 %v6580_v24 }
 0x101   : > { %6324 = vmatmul.mubr.bf16.gmra.mxu0 %v6566_v62  ;;  %v8291_v53 = vpop.f32.mrf.mxu0  ;;  %6354 = vmatpush3.bf16.msra.mxu1 %v6575_v56  ;;  %v8302_v62 = vcombine.low %v3817_v3, %v3827_v23  ;;  %v3859_v56 = vor.u32 %v3858_v52, %v3855_v1  ;;  %v3869_v3 = vor.u32 %v3868_v11, %v8283_v12  ;;  %v8320_v23 = vld [vmem:[%s6643_s22 + $0x58] sm:$0xf]  ;;  %v8327_v52 = vrot.slane %v3845_v22, 4 }
 0x102   : > { %9410 = vst [vmem:[#allocation8_spill] sm:$0xff] %v8291_v53  ;;  %6327 = vmatprep.mubr.bf16.mxu0 %v6569_v37  ;;  %6355 = vmatprep.subr.bf16.mxu1 %v6579_v61  ;;  %v8315_v37 = vsel %vm6995_vm5, %v5733_v46, %v4566_v60  ;;  %v9411_v1 = vcombine.low %v7950_v17, %v7955_v54  ;;  %v3879_v46 = vrot.slane %v3877_v2, 4  ;;  %v3882_v11 = vrot.slane %v3880_v19, 5  ;;  %v5641_v2 = vld [vmem:[%s6643_s22 + $0x50] sm:$0x1] }
 0x103   : > { %6404 = vmatpush3.bf16.msra.mxu0 %v6580_v24  ;;  %v8325_v24 = vpop.f32.mrf.mxu1  ;;  %v8331_v60 = vsel %vm6995_vm5, %v4568_v49, %v4569_v50  ;;  %v8338_v17 = vpop.f32.mrf.mxu0  ;;  %v5734_v54 = vrot.slane %v5718_v15, 9  ;;  %v3892_v22 = vrot.slane %v3890_v0, 4  ;;  %v3860_v49 = vrot.slane %v3859_v56, 4  ;;  %v5645_v56 = vld [vmem:[%s6643_s22 + $0x60] sm:$0xf] }
 0x104   : > { %6276 = vmatmul.mubr.bf16.gmra.mxu1 %v9411_v1  ;;  %9412 = vst [vmem:[#allocation9_spill] sm:$0xff] %v8325_v24  ;;  %6405 = vmatprep.subr.bf16.mxu0 %v6584_v31  ;;  %9414 = vst [vmem:[#allocation10_spill] sm:$0xff] %v8338_v17  ;;  %v8340_v1 = vrot.slane %v3886_v16, 5  ;;  %v3901_v24 = vshrl.u32 %v5642_v40, 16  ;;  %v3874_v50 = vrot.slane %v3872_v55, 5  ;;  %v3904_v19 = vshll.u32 %v5642_v40, 16 }
 0x105   : > { %6279 = vmatprep.mubr.bf16.mxu1 %v9413_v38  ;;  %6356 = vmatpush3.bf16.msra.mxu1 %v6579_v61  ;;  %v3910_v53 = vshll.u32 %v8320_v23, 16  ;;  %v3870_v13 = vrot.slane %v3869_v3, 4  ;;  %v4575_v47 = vrot.slane %v4573_v32, 4  ;;  %v4576_v38 = vrot.slane %v8281_v29, 5  ;;  %v8346_v61 = vpop.f32.mrf.mxu1  ;;  %v8356_v40 = vpop.f32.mrf.mxu0 }
 0x106   : > { %6357 = vmatprep.subr.bf16.mxu1 %v6583_v43  ;;  %v3914_v15 = vshrl.u32 %v8320_v23, 16  ;;  %9415 = vst [vmem:[#allocation11_spill] sm:$0xff] %v8346_v61  ;;  %v3851_v16 = vsel %vm6684_vm2, %v8327_v52, %v8304_v44  ;;  %v3883_v0 = vor.u32 %v3882_v11, %v3879_v46  ;;  %v3893_v29 = vor.u32 %v3892_v22, %v8340_v1  ;;  %v5719_v61 = vld [vmem:[%s6643_s22 + $0x48] sm:$0xe] }
 0x107   : > { %6406 = vmatpush3.bf16.msra.mxu0 %v6584_v31  ;;  %v4580_v31 = vrot.slane %v8274_v34, 5  ;;  %v3896_v3 = vshll.u32 %v5641_v2, 16  ;;  %v3903_v17 = vrot.slane %v3901_v24, 4  ;;  %v3906_v63 = vrot.slane %v3904_v19, 5  ;;  %v8381_v11 = vpop.f32.mrf.mxu1 }
 0x108   : > { %v3865_v44 = vsel %vm6684_vm2, %v3860_v49, %v8283_v12  ;;  %v8365_v34 = vsel %vm6995_vm5, %v5734_v54, %v4573_v32  ;;  %v3875_v52 = vsel %vm6684_vm2, %v3870_v13, %v3874_v50  ;;  %v8373_v24 = vsel %vm6995_vm5, %v4575_v47, %v4576_v38  ;;  %9417 = vst [vmem:[#allocation12_spill] sm:$0xff] %v8381_v11  ;;  %v8384_v50 = vld [vmem:[%s6643_s22 + $0x64] sm:$0xf]  ;;  %v6574_v13 = vld [vmem:[%s6643_s22 + $0x9c] sm:$0xff]   ;;  %v8390_v47 = vpop.f32.mrf.mxu0 }
 0x109   : > { %6328 = vmatmul.mubr.bf16.gmra.mxu0 %v6570_v7  ;;  %6358 = vmatpush3.bf16.msra.mxu1 %v6583_v43  ;;  %v8367_v7 = vrot.slane %v3910_v53, 5  ;;  %v3916_v43 = vrot.slane %v3914_v15, 4  ;;  %v3925_v46 = vshrl.u32 %v5645_v56, 16  ;;  %v3928_v12 = vshll.u32 %v5645_v56, 16  ;;  %v6577_v56 = vld [vmem:[%s6643_s22 + $0xa8] sm:$0xff]  }
 0x10a   : > { %6331 = vmatprep.mubr.bf16.mxu0 %v6573_v48  ;;  %v8376_v48 = vld [vmem:[%s6643_s22 + $0x5c] sm:$0x1]  ;;  %v9416_v32 = vcombine.low %v7983_v35, %v7992_v18  ;;  %v3884_v53 = vrot.slane %v3883_v0, 4  ;;  %v5735_v54 = vrot.slane %v5719_v61, 9  ;;  %v4582_v22 = vrot.slane %v4580_v31, 4 }
 0x10b   : > { %v4583_v49 = vrot.slane %v5641_v2, 5  ;;  %v9418_v19 = vcombine.low %v8009_v33, %v8013_v59  ;;  %v3894_v38 = vrot.slane %v3893_v29, 4  ;;  %v3898_v15 = vrot.slane %v3896_v3, 5  ;;  %v5720_v0 = vld [vmem:[%s6643_s22 + $0x54] sm:$0xe]  ;;  %v8408_v29 = vpop.f32.mrf.mxu1 }
 0x10c   : > { %6280 = vmatmul.mubr.bf16.gmra.mxu1 %v9416_v32  ;;  %v3907_v35 = vor.u32 %v3906_v63, %v3903_v17  ;;  %v4587_v18 = vrot.slane %v8320_v23, 5  ;;  %v3917_v61 = vor.u32 %v3916_v43, %v8367_v7  ;;  %v3920_v2 = vshll.u32 %v8376_v48, 16  ;;  %9420 = vst [vmem:[#allocation13_spill] sm:$0xff] %v8408_v29  ;;  %v5721_v63 = vld [vmem:[%s6643_s22 + $0x60] sm:$0xe] }
 0x10d   : > { %6283 = vmatprep.mubr.bf16.mxu1 %v9418_v19  ;;  %v3927_v32 = vrot.slane %v3925_v46, 4  ;;  %v3930_v55 = vrot.slane %v3928_v12, 5  ;;  %v9419_v33 = vsel %vm6684_vm2, %v8276_v51, %v8220_v8  ;;  %v3934_v23 = vshll.u32 %v8384_v50, 16 }
 0x10e   : > { %v8402_v59 = vcombine.low %v9419_v33, %v3851_v16  ;;  %v3938_v17 = vshrl.u32 %v8384_v50, 16  ;;  %v8410_v3 = vcombine.low %v3865_v44, %v3875_v52  ;;  %v3889_v43 = vsel %vm6684_vm2, %v3884_v53, %v8340_v1  ;;  %v5648_v16 = vld [vmem:[%s6643_s22 + $0x6c] sm:$0xf]  ;;  %v8428_v33 = vld [vmem:[%s6643_s22 + $0x70] sm:$0xf] }
 0x10f   : > { %v8417_v8 = vsel %vm6995_vm5, %v5735_v54, %v4580_v31  ;;  %v8421_v51 = vsel %vm6995_vm5, %v4582_v22, %v4583_v49  ;;  %v3908_v44 = vrot.slane %v3907_v35, 4  ;;  %v5736_v52 = vrot.slane %v5720_v0, 9  ;;  %v5647_v54 = vld [vmem:[%s6643_s22 + $0x68] sm:$0x1] }
 0x110   : > { %v4589_v12 = vrot.slane %v4587_v18, 4  ;;  %v4590_v19 = vrot.slane %v8376_v48, 5  ;;  %v3899_v1 = vsel %vm6684_vm2, %v3894_v38, %v3898_v15  ;;  %v3918_v31 = vrot.slane %v3917_v61, 4 }
 0x111   : > { %6332 = vmatmul.mubr.bf16.gmra.mxu0 %v6574_v13  ;;  %v8424_v46 = vpop.f32.mrf.mxu0  ;;  %v3922_v53 = vrot.slane %v3920_v2, 5  ;;  %v3931_v22 = vor.u32 %v3930_v55, %v3927_v32  ;;  %v8433_v49 = vrot.slane %v3934_v23, 5  ;;  %v3940_v13 = vrot.slane %v3938_v17, 4  ;;  %v6578_v32 = vld [vmem:[%s6643_s22 + $0xb4] sm:$0xff]  }
 0x112   : > { %9421 = vst [vmem:[#allocation14_spill] sm:$0xff] %v8424_v46  ;;  %6335 = vmatprep.mubr.bf16.mxu0 %v6577_v56  ;;  %v3949_v35 = vshrl.u32 %v5648_v16, 16  ;;  %v3952_v0 = vshll.u32 %v5648_v16, 16  ;;  %v9422_v48 = vcombine.low %v8029_v6, %v8034_v26  ;;  %v4594_v15 = vrot.slane %v8384_v50, 5  ;;  %v5723_v46 = vld [vmem:[%s6643_s22 + $0x78] sm:$0xe] }
 0x113   : > { %v3958_v55 = vshll.u32 %v8428_v33, 16  ;;  %v3962_v61 = vshrl.u32 %v8428_v33, 16  ;;  %v9424_v2 = vcombine.low %v8047_v10, %v8041_v30  ;;  %v8450_v6 = vpop.f32.mrf.mxu0  ;;  %v8452_v26 = vcombine.low %v3889_v43, %v3899_v1  ;;  %v5651_v30 = vld [vmem:[%s6643_s22 + $0x78] sm:$0xf]  ;;  %v6581_v10 = vld [vmem:[%s6643_s22 + $0xc0] sm:$0xff]  }
 0x114   : > { %6284 = vmatmul.mubr.bf16.gmra.mxu1 %v9422_v48  ;;  %9425 = vst [vmem:[#allocation16_spill] sm:$0xff] %v8450_v6  ;;  %v3913_v23 = vsel %vm6684_vm2, %v3908_v44, %v8367_v7  ;;  %v8459_v50 = vsel %vm6995_vm5, %v5736_v52, %v4587_v18  ;;  %v8463_v17 = vsel %vm6995_vm5, %v4589_v12, %v4590_v19  ;;  %v8469_v48 = vrot.slane %v3931_v22, 4  ;;  %v8476_v44 = vld [vmem:[%s6643_s22 + $0x74] sm:$0x1]  ;;  %v8533_v6 = vld [vmem:[%s6643_s22 + $0x8c] sm:$0x1] }
 0x115   : > { %6287 = vmatprep.mubr.bf16.mxu1 %v9424_v2  ;;  %v3923_v16 = vsel %vm6684_vm2, %v3918_v31, %v3922_v53  ;;  %v3944_v43 = vshll.u32 %v5647_v54, 16  ;;  %v5737_v1 = vrot.slane %v5721_v63, 9  ;;  %v8472_v2 = vld [vmem:[%s6643_s22 + $0x7c] sm:$0xf]  ;;  %v3941_v7 = vor.u32 %v3940_v13, %v8433_v49  ;;  %v8482_v22 = vpop.f32.mrf.mxu0  ;;  %v5654_v63 = vld [vmem:[%s6643_s22 + $0x84] sm:$0xf] }
 0x116   : > { %v8439_v56 = vpop.f32.mrf.mxu1  ;;  %v4597_v18 = vrot.slane %v5647_v54, 5  ;;  %v3951_v52 = vrot.slane %v3949_v35, 4  ;;  %v3954_v12 = vrot.slane %v3952_v0, 5  ;;  %v4596_v38 = vrot.slane %v4594_v15, 4  ;;  %9427 = vst [vmem:[#allocation18_spill] sm:$0xff] %v8482_v22 }
 0x117   : > { %9423 = vst [vmem:[#allocation15_spill] sm:$0xff] %v8439_v56  ;;  %v8480_v56 = vrot.slane %v3958_v55, 5  ;;  %v3964_v31 = vrot.slane %v3962_v61, 4  ;;  %v3973_v53 = vshrl.u32 %v5651_v30, 16  ;;  %v5722_v54 = vld [vmem:[%s6643_s22 + $0x6c] sm:$0xe]  ;;  %v8495_v61 = vsel %vm6995_vm5, %v5737_v1, %v4594_v15 }
 0x118   : > { %v8478_v19 = vpop.f32.mrf.mxu1  ;;  %v3976_v13 = vshll.u32 %v5651_v30, 16  ;;  %v3982_v35 = vshll.u32 %v8472_v2, 16  ;;  %v3986_v0 = vshrl.u32 %v8472_v2, 16  ;;  %v8491_v55 = vrot.slane %v3944_v43, 5  ;;  %v6582_v1 = vld [vmem:[%s6643_s22 + $0xcc] sm:$0xff]  }
 0x119   : > { %9426 = vst [vmem:[#allocation17_spill] sm:$0xff] %v8478_v19  ;;  %6336 = vmatmul.mubr.bf16.gmra.mxu0 %v6578_v32  ;;  %v8489_v19 = vcombine.low %v3913_v23, %v3923_v16  ;;  %v3968_v32 = vshll.u32 %v8476_v44, 16  ;;  %v8503_v29 = vrot.slane %v3941_v7, 4  ;;  %v4601_v23 = vrot.slane %v8428_v33, 5  ;;  %v8507_v16 = vld [vmem:[%s6643_s22 + $0x88] sm:$0xf] }
 0x11a   : > { %6339 = vmatprep.mubr.bf16.mxu0 %v6581_v10  ;;  %v3955_v10 = vor.u32 %v3954_v12, %v3951_v52  ;;  %v9429_v15 = vcombine.low %v8056_v5, %v8060_v14  ;;  %v8512_v43 = vpop.f32.mrf.mxu1  ;;  %v8517_v11 = vsel %vm6995_vm5, %v4596_v38, %v4597_v18  ;;  %v3965_v30 = vor.u32 %v3964_v31, %v8480_v56  ;;  %v8520_v12 = vpop.f32.mrf.mxu0  ;;  %v8526_v5 = vld [vmem:[%s6643_s22 + $0x80] sm:$0x1] }
 0x11b   : > { %9428 = vst [vmem:[#allocation19_spill] sm:$0xff] %v8489_v19  ;;  %9430 = vst [vmem:[#allocation20_spill] sm:$0xff] %v8512_v43  ;;  %v5738_v7 = vrot.slane %v5722_v54, 9  ;;  %v3975_v52 = vrot.slane %v3973_v53, 4  ;;  %v9432_v33 = vcombine.low %v8091_v27, %v8095_v36  ;;  %v3978_v14 = vrot.slane %v3976_v13, 5 }
 0x11c   : > { %6288 = vmatmul.mubr.bf16.gmra.mxu1 %v9429_v15  ;;  %9431 = vst [vmem:[#allocation21_spill] sm:$0xff] %v8520_v12  ;;  %v8528_v15 = vrot.slane %v3982_v35, 5  ;;  %v3988_v43 = vrot.slane %v3986_v0, 4  ;;  %v3997_v22 = vshrl.u32 %v5654_v63, 16  ;;  %v3970_v38 = vrot.slane %v3968_v32, 5 }
 0x11d   : > { %6291 = vmatprep.mubr.bf16.mxu1 %v9432_v33  ;;  %v4604_v18 = vrot.slane %v8476_v44, 5  ;;  %v4000_v31 = vshll.u32 %v5654_v63, 16  ;;  %v4006_v53 = vshll.u32 %v8507_v16, 16  ;;  %v3956_v54 = vrot.slane %v3955_v10, 4  ;;  %v8536_v33 = vpop.f32.mrf.mxu1 }
 0x11e   : > { %v4603_v12 = vrot.slane %v4601_v23, 4  ;;  %v3999_v27 = vrot.slane %v3997_v22, 4  ;;  %v4010_v36 = vshrl.u32 %v8507_v16, 16  ;;  %v3966_v13 = vrot.slane %v3965_v30, 4 }
 0x11f   : > { %v3992_v35 = vshll.u32 %v8526_v5, 16  ;;  %v4002_v0 = vrot.slane %v4000_v31, 5  ;;  %v8539_v32 = vrot.slane %v4006_v53, 5  ;;  %v3979_v63 = vor.u32 %v3978_v14, %v3975_v52  ;;  %v5724_v53 = vld [vmem:[%s6643_s22 + $0x84] sm:$0xe] }
 0x120   : > { %v8541_v44 = vpop.f32.mrf.mxu0  ;;  %v3989_v10 = vor.u32 %v3988_v43, %v8528_v15  ;;  %v4608_v22 = vrot.slane %v8472_v2, 5  ;;  %v4012_v19 = vrot.slane %v4010_v36, 4  ;;  %v9433_v30 = vcombine.low %v8187_v42, %v8202_v4 }
 0x121   : > { %6340 = vmatmul.mubr.bf16.gmra.mxu0 %v6582_v1  ;;  %v3947_v31 = vsel %vm6684_vm2, %v8503_v29, %v8491_v55  ;;  %v8557_v52 = vsel %vm6995_vm5, %v5738_v7, %v4601_v23  ;;  %v4016_v43 = vshll.u32 %v8533_v6, 16  ;;  %v3961_v42 = vsel %vm6684_vm2, %v3956_v54, %v8480_v56  ;;  %v5657_v55 = vld [vmem:[%s6643_s22 + $0x90] sm:$0xf] }
 0x122   : > { %6407 = vmatprep.mubr.bf16.mxu0 %v9433_v30  ;;  %v8560_v2 = vpop.f32.mrf.mxu0  ;;  %v4003_v4 = vor.u32 %v4002_v0, %v3999_v27  ;;  %v4013_v14 = vor.u32 %v4012_v19, %v8539_v32  ;;  %v4615_v29 = vrot.slane %v8507_v16, 5  ;;  %v9435_v23 = vcombine.low %v8104_v45, %v8109_v9 }
 0x123   : > { %v3971_v7 = vsel %vm6684_vm2, %v3966_v13, %v3970_v38  ;;  %v8578_v56 = vsel %vm6995_vm5, %v4603_v12, %v4604_v18  ;;  %v3994_v54 = vrot.slane %v3992_v35, 5  ;;  %v5739_v19 = vrot.slane %v5723_v46, 9  ;;  %v8587_v13 = vld [vmem:[%s6643_s22 + $0x94] sm:$0xf] }
 0x124   : > { %v8569_v36 = vpop.f32.mrf.mxu1  ;;  %6292 = vmatmul.mubr.bf16.gmra.mxu1 %v9435_v23  ;;  %v8580_v27 = vpop.f32.mrf.mxu0  ;;  %v3980_v16 = vrot.slane %v3979_v63, 4  ;;  %v3990_v0 = vrot.slane %v3989_v10, 4  ;;  %v4610_v30 = vrot.slane %v4608_v22, 4  ;;  %v4611_v1 = vrot.slane %v8526_v5, 5 }
 0x125   : > { %9434 = vst [vmem:[#allocation22_spill] sm:$0xff] %v8569_v36  ;;  %6359 = vmatprep.mubr.bf16.mxu1 %v8296_v41  ;;  %v4018_v9 = vrot.slane %v4016_v43, 5  ;;  %v5740_v38 = vrot.slane %v5724_v53, 9  ;;  %v4021_v12 = vshrl.u32 %v5657_v55, 16  ;;  %v4024_v18 = vshll.u32 %v5657_v55, 16 }
 0x126   : > { %v8584_v45 = vpop.f32.mrf.mxu1  ;;  %v8589_v35 = vpop.f32.mrf.mxu0  ;;  %v4004_v46 = vrot.slane %v4003_v4, 4  ;;  %v4014_v23 = vrot.slane %v4013_v14, 4  ;;  %v4617_v41 = vrot.slane %v4615_v29, 4  ;;  %v4618_v63 = vrot.slane %v8533_v6, 5  ;;  %v8610_v55 = vld [vmem:[%s6643_s22 + $0x98] sm:$0x1] }
 0x127   : > { %9436 = vst [vmem:[#allocation23_spill] sm:$0xff] %v8584_v45  ;;  %v9438_v5 = vsel %vm6684_vm2, %v8469_v48, %v8433_v49  ;;  %v8601_v53 = vcombine.low %v3961_v42, %v3971_v7  ;;  %v8607_v14 = vsel %vm6995_vm5, %v5739_v19, %v4608_v22  ;;  %v3985_v49 = vsel %vm6684_vm2, %v3980_v16, %v8528_v15  ;;  %v5660_v42 = vld [vmem:[%s6643_s22 + $0x9c] sm:$0xf]  ;;  %v8627_v7 = vld [vmem:[%s6643_s22 + $0xa0] sm:$0xf] }
 0x128   : > { %v8592_v10 = vpop.f32.mrf.mxu1  ;;  %v8599_v43 = vcombine.low %v9438_v5, %v3947_v31  ;;  %v6121_v6 = vpop.f32.mrf.mxu0  ;;  %v3995_v48 = vsel %vm6684_vm2, %v3990_v0, %v3994_v54  ;;  %v8622_v31 = vsel %vm6995_vm5, %v4610_v30, %v4611_v1  ;;  %v4030_v22 = vshll.u32 %v8587_v13, 16  ;;  %v8714_v36 = vld [vmem:[%s6643_s22 + $0xb0] sm:$0x1] }
 0x129   : > { %9437 = vst [vmem:[#allocation24_spill] sm:$0xff] %v8592_v10  ;;  %v9439_v10 = vcombine.low %v8259_v21, %v8263_v20  ;;  %v9441_v21 = vcombine.low %v8315_v37, %v8331_v60  ;;  %v8636_v20 = vsel %vm6995_vm5, %v5740_v38, %v4615_v29  ;;  %v4023_v15 = vrot.slane %v4021_v12, 4  ;;  %v8651_v38 = vld [vmem:[%s6643_s22 + $0x90] sm:$0xe] }
 0x12a   : > { %v8629_v19 = vpop.f32.mrf.mxu1  ;;  %v4026_v54 = vrot.slane %v4024_v18, 5  ;;  %v4034_v1 = vshrl.u32 %v8587_v13, 16  ;;  %v1547_v16 = vpop.f32.mrf.mxu0  ;;  %v4009_v0 = vsel %vm6684_vm2, %v4004_v46, %v8539_v32  ;;  %v4019_v30 = vsel %vm6684_vm2, %v4014_v23, %v4018_v9 }
 0x12b   : > { %6408 = vmatmul.mubr.bf16.vlgmr.msra.gmra.mxu0 %v9439_v10  ;;  %9440 = vst [vmem:[#allocation25_spill] sm:$0xff] %v8629_v19  ;;  %v8646_v37 = vsel %vm6995_vm5, %v4617_v41, %v4618_v63  ;;  %v4040_v60 = vshll.u32 %v8610_v55, 16  ;;  %v4045_v12 = vshrl.u32 %v5660_v42, 16  ;;  %v4048_v18 = vshll.u32 %v5660_v42, 16 }
 0x12c   : > { %6411 = vmatprep.mubr.bf16.mxu0 %v9441_v21  ;;  %v6073_v29 = vpop.f32.mrf.mxu1  ;;  %6360 = vmatmul.mubr.bf16.vlgmr.msra.gmra.mxu1 %v8302_v62  ;;  %v4054_v10 = vshll.u32 %v8627_v7, 16  ;;  %v4058_v32 = vshrl.u32 %v8627_v7, 16  ;;  %v6122_v46 = vpop.f32.mrf.mxu0  ;;  %v8657_v23 = vcombine.low %v3985_v49, %v3995_v48  ;;  %v8661_v41 = vrot.slane %v4030_v22, 5  ;;  %v8675_v62 = vld [vmem:[%s6643_s22 + $0xa4] sm:$0x1] }
 0x12d   : > { %v1103_v9 = vadd.f32 %v6073_v29, %v8152_v25  ;;  %6363 = vmatprep.mubr.bf16.mxu1 %v8402_v59  ;;  %v8663_v5 = vcombine.low %v4009_v0, %v4019_v30  ;;  %v4027_v21 = vor.u32 %v4026_v54, %v4023_v15  ;;  %v4036_v25 = vrot.slane %v4034_v1, 4  ;;  %v5663_v29 = vld [vmem:[%s6643_s22 + $0xa8] sm:$0xf]  ;;  %v8680_v15 = vld [vmem:[%s6643_s22 + $0xac] sm:$0xf] }
 0x12e   : > { %v1094_v63 = vpop.f32.mrf.mxu1  ;;  %v1550_v49 = vpop.f32.mrf.mxu0  ;;  %v8671_v48 = vrot.slane %v4040_v60, 5  ;;  %v5741_v22 = vrot.slane %v8651_v38, 9  ;;  %v4047_v30 = vrot.slane %v4045_v12, 4  ;;  %v4050_v19 = vrot.slane %v4048_v18, 5 }
 0x12f   : > { %v8668_v4 = vadd.f32 %v6121_v6, %v1103_v9  ;;  %v1095_v59 = vadd.f32 %v1094_v63, %v8173_v58  ;;  %v8677_v45 = vrot.slane %v4054_v10, 5  ;;  %v4060_v42 = vrot.slane %v4058_v32, 4  ;;  %v9447_v63 = vld [vmem:[#allocation4_spill] sm:$0xff] }
 0x130   : > { %v6074_v0 = vpop.f32.mrf.mxu1  ;;  %v6125_v6 = vpop.f32.mrf.mxu0  ;;  %v9444_v1 = vcombine.low %v8365_v34, %v8373_v24  ;;  %v4069_v60 = vshrl.u32 %v5663_v29, 16  ;;  %v4072_v38 = vshll.u32 %v5663_v29, 16  ;;  %v9445_v12 = vcombine.low %v8417_v8, %v8421_v51 }
 0x131   : > { %9442 = vst [vmem:[#allocation26_spill] sm:$0xff] %v8668_v4  ;;  %v8682_v54 = vadd.f32 %v1547_v16, %v1095_v59  ;;  %v1106_v58 = vadd.f32 %v6074_v0, %v8209_v39  ;;  %v8691_v18 = vrot.slane %v4027_v21, 4  ;;  %v4037_v16 = vor.u32 %v4036_v25, %v8661_v41  ;;  %v5726_v59 = vld [vmem:[%s6643_s22 + $0x9c] sm:$0xe] }
 0x132   : > { %v1097_v9 = vpop.f32.mrf.mxu1  ;;  %v4622_v10 = vrot.slane %v8587_v13, 5  ;;  %v4064_v39 = vshll.u32 %v8675_v62, 16  ;;  %v1563_v24 = vpop.f32.mrf.mxu0  ;;  %v4625_v29 = vrot.slane %v8610_v55, 5  ;;  %v4078_v0 = vshll.u32 %v8680_v15, 16 }
 0x133   : > { %9443 = vst [vmem:[#allocation27_spill] sm:$0xff] %v8682_v54  ;;  %6412 = vmatmul.mubr.bf16.gmra.mxu0 %v9444_v1  ;;  %v8696_v32 = vadd.f32 %v6122_v46, %v1106_v58  ;;  %v1098_v34 = vadd.f32 %v1097_v9, %v9447_v63  ;;  %v4051_v51 = vor.u32 %v4050_v19, %v4047_v30  ;;  %v4629_v13 = vrot.slane %v8627_v7, 5  ;;  %v9448_v58 = vld [vmem:[#allocation8_spill] sm:$0xff]  ;;  %v9449_v7 = vld [vmem:[#allocation10_spill] sm:$0xff] }
 0x134   : > { %6415 = vmatprep.mubr.bf16.mxu0 %v9445_v12  ;;  %v6077_v8 = vpop.f32.mrf.mxu1  ;;  %6364 = vmatmul.mubr.bf16.gmra.mxu1 %v8410_v3  ;;  %v4061_v21 = vor.u32 %v4060_v42, %v8677_v45  ;;  %v4082_v46 = vshrl.u32 %v8680_v15, 16  ;;  %v6126_v9 = vpop.f32.mrf.mxu0  ;;  %v4071_v55 = vrot.slane %v4069_v60, 4  ;;  %v4074_v12 = vrot.slane %v4072_v38, 5 }
 0x135   : > { %9446 = vst [vmem:[#allocation28_spill] sm:$0xff] %v8696_v32  ;;  %v8706_v25 = vadd.f32 %v1550_v49, %v1098_v34  ;;  %v1119_v1 = vadd.f32 %v6077_v8, %v9448_v58  ;;  %6367 = vmatprep.mubr.bf16.mxu1 %v8452_v26  ;;  %v4038_v32 = vrot.slane %v4037_v16, 4  ;;  %v4624_v3 = vrot.slane %v4622_v10, 4 }
 0x136   : > { %v1110_v63 = vpop.f32.mrf.mxu1  ;;  %v4066_v19 = vrot.slane %v4064_v39, 5  ;;  %v5742_v30 = vrot.slane %v5726_v59, 9  ;;  %v1566_v4 = vpop.f32.mrf.mxu0  ;;  %v8716_v49 = vrot.slane %v4078_v0, 5  ;;  %v4084_v34 = vrot.slane %v4082_v46, 4 }
 0x137   : > { %v8710_v42 = vadd.f32 %v6125_v6, %v1119_v1  ;;  %v1111_v54 = vadd.f32 %v1110_v63, %v9449_v7  ;;  %v4052_v58 = vrot.slane %v4051_v51, 4  ;;  %v4062_v26 = vrot.slane %v4061_v21, 4 }
 0x138   : > { %v6078_v8 = vpop.f32.mrf.mxu1  ;;  %v4631_v60 = vrot.slane %v4629_v13, 4  ;;  %v4632_v38 = vrot.slane %v8675_v62, 5  ;;  %v6129_v39 = vpop.f32.mrf.mxu0  ;;  %v9450_v59 = vcombine.low %v8459_v50, %v8463_v17  ;;  %v8727_v0 = vsel %vm6995_vm5, %v5741_v22, %v4622_v10  ;;  %v5727_v22 = vld [vmem:[%s6643_s22 + $0xa8] sm:$0xe] }
 0x139   : > { %v8719_v16 = vadd.f32 %v1563_v24, %v1111_v54  ;;  %v1122_v6 = vadd.f32 %v6078_v8, %v8356_v40  ;;  %v4075_v51 = vor.u32 %v4074_v12, %v4071_v55  ;;  %v9451_v21 = vcombine.low %v8495_v61, %v8517_v11 }
 0x13a   : > { %v1113_v46 = vpop.f32.mrf.mxu1  ;;  %v4033_v40 = vsel %vm6684_vm2, %v8691_v18, %v8661_v41  ;;  %v4043_v50 = vsel %vm6684_vm2, %v4038_v32, %v8671_v48  ;;  %v8741_v17 = vsel %vm6995_vm5, %v4624_v3, %v4625_v29  ;;  %v4088_v62 = vshll.u32 %v8714_v36, 16  ;;  %v1579_v61 = vpop.f32.mrf.mxu0  ;;  %v5666_v18 = vld [vmem:[%s6643_s22 + $0xb4] sm:$0xf]  ;;  %v9452_v48 = vld [vmem:[#allocation19_spill] sm:$0xff]  ;;  %v8770_v3 = vld [vmem:[%s6643_s22 + $0xb8] sm:$0xf] }
 0x13b   : > { %6416 = vmatmul.mubr.bf16.gmra.mxu0 %v9450_v59  ;;  %v8745_v54 = vadd.f32 %v6126_v9, %v1122_v6  ;;  %v1114_v11 = vadd.f32 %v1113_v46, %v8390_v47  ;;  %v4085_v10 = vor.u32 %v4084_v34, %v8716_v49  ;;  %v4636_v41 = vrot.slane %v8680_v15, 5  ;;  %v9453_v9 = vld [vmem:[#allocation14_spill] sm:$0xff] }
 0x13c   : > { %6419 = vmatprep.mubr.bf16.mxu0 %v9451_v21  ;;  %v6081_v24 = vpop.f32.mrf.mxu1  ;;  %6368 = vmatmul.mubr.bf16.gmra.mxu1 %v9452_v48  ;;  %v4057_v32 = vsel %vm6684_vm2, %v4052_v58, %v8677_v45  ;;  %v4067_v29 = vsel %vm6684_vm2, %v4062_v26, %v4066_v19  ;;  %v8759_v47 = vsel %vm6995_vm5, %v5742_v30, %v4629_v13  ;;  %v6130_v12 = vpop.f32.mrf.mxu0  ;;  %v4076_v63 = vrot.slane %v4075_v51, 4  ;;  %v9454_v58 = vld [vmem:[#allocation16_spill] sm:$0xff]  ;;  %v9458_v48 = vld [vmem:[#allocation21_spill] sm:$0xff] }
 0x13d   : > { %v8763_v1 = vsel %vm6995_vm5, %v4631_v60, %v4632_v38  ;;  %v8765_v15 = vadd.f32 %v1566_v4, %v1114_v11  ;;  %v1135_v55 = vadd.f32 %v6081_v24, %v9453_v9  ;;  %6371 = vmatprep.mubr.bf16.mxu1 %v8599_v43  ;;  %v5743_v45 = vrot.slane %v5727_v22, 9 }
 0x13e   : > { %v1126_v19 = vpop.f32.mrf.mxu1  ;;  %v4090_v7 = vrot.slane %v4088_v62, 5  ;;  %v4639_v13 = vrot.slane %v8714_v36, 5  ;;  %v4093_v30 = vshrl.u32 %v5666_v18, 16  ;;  %v4096_v34 = vshll.u32 %v5666_v18, 16  ;;  %v1582_v26 = vpop.f32.mrf.mxu0 }
 0x13f   : > { %v8773_v8 = vadd.f32 %v6129_v39, %v1135_v55  ;;  %v1127_v4 = vadd.f32 %v1126_v19, %v9454_v58  ;;  %v4086_v60 = vrot.slane %v4085_v10, 4  ;;  %v4638_v38 = vrot.slane %v4636_v41, 4  ;;  %v9455_v39 = vld [vmem:[#allocation18_spill] sm:$0xff] }
 0x140   : > { %v6082_v43 = vpop.f32.mrf.mxu1  ;;  %v8776_v6 = vcombine.low %v4033_v40, %v4043_v50  ;;  %v5773_v59 = vcombine.low %v8727_v0, %v8741_v17  ;;  %v8780_v51 = vcombine.low %v4057_v32, %v4067_v29  ;;  %v4102_v36 = vshll.u32 %v8770_v3, 16  ;;  %v6133_v62 = vpop.f32.mrf.mxu0  ;;  %v5669_v50 = vld [vmem:[%s6643_s22 + $0xc0] sm:$0xf]  ;;  %v8794_v17 = vld [vmem:[%s6643_s22 + $0xc4] sm:$0xf] }
 0x141   : > { %v8783_v46 = vadd.f32 %v1579_v61, %v1127_v4  ;;  %v1138_v21 = vadd.f32 %v6082_v43, %v9455_v39  ;;  %v9456_v22 = vcombine.low %v8557_v52, %v8578_v56  ;;  %v5774_v40 = vcombine.low %v8759_v47, %v8763_v1  ;;  %v9463_v47 = vld [vmem:[#allocation7_spill] sm:$0xff] }
 0x142   : > { %v4106_v0 = vshrl.u32 %v8770_v3, 16  ;;  %v1129_v11 = vpop.f32.mrf.mxu1  ;;  %v9457_v61 = vcombine.low %v8607_v14, %v8622_v31  ;;  %v4081_v52 = vsel %vm6684_vm2, %v4076_v63, %v8716_v49  ;;  %v8804_v56 = vsel %vm6995_vm5, %v5743_v45, %v4636_v41  ;;  %v1595_v29 = vpop.f32.mrf.mxu0  ;;  %v8816_v31 = vld [vmem:[%s6643_s22 + $0xbc] sm:$0x1]  ;;  %v5728_v49 = vld [vmem:[%s6643_s22 + $0xb4] sm:$0xe] }
 0x143   : > { %6420 = vmatmul.mubr.bf16.gmra.mxu0 %v9456_v22  ;;  %v4095_v10 = vrot.slane %v4093_v30, 4  ;;  %v4098_v18 = vrot.slane %v4096_v34, 5  ;;  %v8806_v24 = vadd.f32 %v6130_v12, %v1138_v21  ;;  %v1130_v32 = vadd.f32 %v1129_v11, %v9458_v48  ;;  %v8838_v21 = vld [vmem:[%s6643_s22 + $0xc8] sm:$0x1] }
 0x144   : > { %6423 = vmatprep.mubr.bf16.mxu0 %v9457_v61  ;;  %v4091_v9 = vsel %vm6684_vm2, %v4086_v60, %v4090_v7  ;;  %v8813_v14 = vsel %vm6995_vm5, %v4638_v38, %v4639_v13  ;;  %v6085_v55 = vpop.f32.mrf.mxu1  ;;  %6372 = vmatmul.mubr.bf16.gmra.mxu1 %v8601_v53  ;;  %v8820_v41 = vrot.slane %v4102_v36, 5  ;;  %v4117_v12 = vshrl.u32 %v5669_v50, 16  ;;  %v6134_v30 = vpop.f32.mrf.mxu0 }
 0x145   : > { %v4120_v63 = vshll.u32 %v5669_v50, 16  ;;  %v4126_v45 = vshll.u32 %v8794_v17, 16  ;;  %v8823_v19 = vadd.f32 %v1582_v26, %v1130_v32  ;;  %v1151_v7 = vadd.f32 %v6085_v55, %v8541_v44  ;;  %6375 = vmatprep.mubr.bf16.mxu1 %v8657_v23 }
 0x146   : > { %v4108_v13 = vrot.slane %v4106_v0, 4  ;;  %v4130_v34 = vshrl.u32 %v8794_v17, 16  ;;  %v1142_v58 = vpop.f32.mrf.mxu1  ;;  %v4099_v4 = vor.u32 %v4098_v18, %v4095_v10  ;;  %v4112_v53 = vshll.u32 %v8816_v31, 16  ;;  %v1598_v44 = vpop.f32.mrf.mxu0  ;;  %v5672_v10 = vld [vmem:[%s6643_s22 + $0xcc] sm:$0xf] }
 0x147   : > { %v5744_v60 = vrot.slane %v5728_v49, 9  ;;  %v4643_v38 = vrot.slane %v8770_v3, 5  ;;  %v8830_v43 = vadd.f32 %v6133_v62, %v1151_v7  ;;  %v1143_v26 = vadd.f32 %v1142_v58, %v8560_v2  ;;  %v5729_v49 = vld [vmem:[%s6643_s22 + $0xc0] sm:$0xe] }
 0x148   : > { %v8833_v36 = vcombine.low %v4081_v52, %v4091_v9  ;;  %v5775_v23 = vcombine.low %v8804_v56, %v8813_v14  ;;  %v6086_v39 = vpop.f32.mrf.mxu1  ;;  %v4119_v22 = vrot.slane %v4117_v12, 4  ;;  %v4122_v0 = vrot.slane %v4120_v63, 5  ;;  %v6137_v11 = vpop.f32.mrf.mxu0  ;;  %v8860_v9 = vld [vmem:[%s6643_s22 + $0xd0] sm:$0xf] }
 0x149   : > { %v8840_v50 = vrot.slane %v4126_v45, 5  ;;  %v4132_v3 = vrot.slane %v4130_v34, 4  ;;  %v8842_v62 = vadd.f32 %v1595_v29, %v1143_v26  ;;  %v1154_v2 = vadd.f32 %v6086_v39, %v8580_v27 }
 0x14a   : > { %v9459_v61 = vcombine.low %v8636_v20, %v8646_v37  ;;  %v4109_v52 = vor.u32 %v4108_v13, %v8820_v41  ;;  %v4646_v56 = vrot.slane %v8816_v31, 5  ;;  %v1145_v18 = vpop.f32.mrf.mxu1  ;;  %v8851_v48 = vrot.slane %v4099_v4, 4  ;;  %v1611_v14 = vpop.f32.mrf.mxu0 }
 0x14b   : > { %v8853_v32 = vrot.slane %v4112_v53, 5  ;;  %v8857_v27 = vsel %vm6995_vm5, %v5744_v60, %v4643_v38  ;;  %v4645_v29 = vrot.slane %v4643_v38, 4  ;;  %v8862_v20 = vadd.f32 %v6134_v30, %v1154_v2  ;;  %v9460_v30 = vld [vmem:[#allocation3_spill] sm:$0xff] }
 0x14c   : > { %6424 = vmatmul.mubr.bf16.gmra.mxu0 %v9459_v61  ;;  %v1146_v37 = vadd.f32 %v1145_v18, %v8589_v35  ;;  %v4136_v31 = vshll.u32 %v8838_v21, 16  ;;  %v6089_v55 = vpop.f32.mrf.mxu1  ;;  %6376 = vmatmul.mubr.bf16.gmra.mxu1 %v8663_v5  ;;  %v4123_v12 = vor.u32 %v4122_v0, %v4119_v22  ;;  %v4133_v63 = vor.u32 %v4132_v3, %v8840_v50  ;;  %v6138_v58 = vpop.f32.mrf.mxu0 }
 0x14d   : > { %6427 = vmatprep.mubr.bf16.mxu0 %v5773_v59  ;;  %v4650_v59 = vrot.slane %v8794_v17, 5  ;;  %v4141_v45 = vshrl.u32 %v5672_v10, 16  ;;  %v4144_v7 = vshll.u32 %v5672_v10, 16  ;;  %v1167_v34 = vadd.f32 %v6089_v55, %v9460_v30  ;;  %6379 = vmatprep.mubr.bf16.mxu1 %v8776_v6 }
 0x14e   : > { %v8870_v13 = vadd.f32 %v1598_v44, %v1146_v37  ;;  %v4150_v35 = vshll.u32 %v8860_v9, 16  ;;  %v4154_v4 = vshrl.u32 %v8860_v9, 16  ;;  %v1158_v17 = vpop.f32.mrf.mxu1  ;;  %v4110_v53 = vrot.slane %v4109_v52, 4  ;;  %v9461_v44 = vld [vmem:[#allocation6_spill] sm:$0xff]  ;;  %v1614_v22 = vpop.f32.mrf.mxu0  ;;  %v9462_v37 = vld [vmem:[#allocation5_spill] sm:$0xff] }
 0x14f   : > { %v4647_v5 = vsel %vm6995_vm5, %v4645_v29, %v4646_v56  ;;  %v5745_v60 = vrot.slane %v5729_v49, 9  ;;  %v4653_v38 = vrot.slane %v8838_v21, 5  ;;  %v8879_v26 = vadd.f32 %v6137_v11, %v1167_v34  ;;  %v5674_v21 = vld [vmem:[%s6643_s22 + $0xd4] sm:$0x1] }
 0x150   : > { %v1159_v39 = vadd.f32 %v1158_v17, %v9461_v44  ;;  %v4138_v0 = vrot.slane %v4136_v31, 5  ;;  %v4652_v6 = vrot.slane %v4650_v59, 4  ;;  %v6090_v3 = vpop.f32.mrf.mxu1  ;;  %v4124_v2 = vrot.slane %v4123_v12, 4 }
 0x151   : > { %v4134_v61 = vrot.slane %v4133_v63, 4  ;;  %v4143_v10 = vrot.slane %v4141_v45, 4  ;;  %v4146_v18 = vrot.slane %v4144_v7, 5  ;;  %v1170_v56 = vadd.f32 %v6090_v3, %v9462_v37  ;;  %v6141_v29 = vpop.f32.mrf.mxu0  ;;  %v5730_v7 = vld [vmem:[%s6643_s22 + $0xcc] sm:$0xe] }
 0x152   : > { %v8882_v52 = vadd.f32 %v1611_v14, %v1159_v39  ;;  %v8889_v11 = vrot.slane %v4150_v35, 5  ;;  %v4156_v31 = vrot.slane %v4154_v4, 4  ;;  %v1161_v49 = vpop.f32.mrf.mxu1  ;;  %v4105_v14 = vsel %vm6684_vm2, %v8851_v48, %v8820_v41 }
 0x153   : > { %v4115_v55 = vsel %vm6684_vm2, %v4110_v53, %v8853_v32  ;;  %v4657_v12 = vrot.slane %v8860_v9, 5  ;;  %v8899_v63 = vadd.f32 %v6138_v58, %v1170_v56  ;;  %v1162_v1 = vadd.f32 %v1161_v49, %v9463_v47  ;;  %v9464_v58 = vld [vmem:[#allocation9_spill] sm:$0xff] }
 0x154   : > { %6428 = vmatmul.mubr.bf16.gmra.mxu0 %v5774_v40  ;;  %v1627_v40 = vpop.f32.mrf.mxu0  ;;  %v4651_v45 = vsel %vm6995_vm5, %v5745_v60, %v4650_v59  ;;  %v6093_v30 = vpop.f32.mrf.mxu1  ;;  %6380 = vmatmul.mubr.bf16.gmra.mxu1 %v8780_v51  ;;  %v5776_v41 = vcombine.low %v8857_v27, %v4647_v5  ;;  %v4129_v48 = vsel %vm6684_vm2, %v4124_v2, %v8840_v50  ;;  %v4160_v9 = vshll.u32 %v5674_v21, 16  ;;  %v9467_v49 = vld [vmem:[#allocation13_spill] sm:$0xff] }
 0x155   : > { %6431 = vmatprep.mubr.bf16.mxu0 %v5775_v23  ;;  %v4654_v23 = vsel %vm6995_vm5, %v4652_v6, %v4653_v38  ;;  %v4147_v32 = vor.u32 %v4146_v18, %v4143_v10  ;;  %v8912_v34 = vadd.f32 %v1614_v22, %v1162_v1  ;;  %v1183_v35 = vadd.f32 %v6093_v30, %v9464_v58  ;;  %v9465_v38 = vld [vmem:[#allocation11_spill] sm:$0xff]  ;;  %v9466_v10 = vld [vmem:[#allocation12_spill] sm:$0xff] }
 0x156   : > { %v6142_v59 = vpop.f32.mrf.mxu0  ;;  %6383 = vmatprep.mubr.bf16.mxu1 %v8833_v36  ;;  %v4139_v4 = vsel %vm6684_vm2, %v4134_v61, %v4138_v0  ;;  %v4157_v51 = vor.u32 %v4156_v31, %v8889_v11  ;;  %v1174_v17 = vpop.f32.mrf.mxu1  ;;  %v5777_v27 = vcombine.low %v4651_v45, %v4654_v23  ;;  %v5746_v53 = vrot.slane %v5730_v7, 9  ;;  %v9468_v45 = vld [vmem:[#allocation15_spill] sm:$0xff] }
 0x157   : > { %v4659_v5 = vrot.slane %v4657_v12, 4  ;;  %v4660_v60 = vrot.slane %v5674_v21, 5  ;;  %v8919_v50 = vadd.f32 %v6141_v29, %v1183_v35  ;;  %v1175_v44 = vadd.f32 %v1174_v17, %v9465_v38  ;;  %v9471_v38 = vld [vmem:[#allocation22_spill] sm:$0xff] }
 0x158   : > { %v1630_v39 = vpop.f32.mrf.mxu0  ;;  %v6094_v22 = vpop.f32.mrf.mxu1  ;;  %v5704_v6 = vcombine.low %v4105_v14, %v4115_v55  ;;  %v5705_v3 = vcombine.low %v4129_v48, %v4139_v4  ;;  %v4148_v2 = vrot.slane %v4147_v32, 4  ;;  %v4158_v18 = vrot.slane %v4157_v51, 4  ;;  %v9469_v48 = vld [vmem:[#allocation17_spill] sm:$0xff] }
 0x159   : > { %v8922_v36 = vadd.f32 %v1627_v40, %v1175_v44  ;;  %v1186_v0 = vadd.f32 %v6094_v22, %v9466_v10  ;;  %v4162_v37 = vrot.slane %v4160_v9, 5  ;;  %v4658_v29 = vsel %vm6995_vm5, %v5746_v53, %v4657_v12 }
 0x15a   : > { %v6145_v61 = vpop.f32.mrf.mxu0  ;;  %v1177_v56 = vpop.f32.mrf.mxu1  ;;  %v4661_v21 = vsel %vm6995_vm5, %v4659_v5, %v4660_v60  ;;  %v4153_v1 = vsel %vm6684_vm2, %v4148_v2, %v8889_v11  ;;  %v9470_v11 = vld [vmem:[#allocation20_spill] sm:$0xff] }
 0x15b   : > { %v8929_v31 = vadd.f32 %v6142_v59, %v1186_v0  ;;  %v1178_v14 = vadd.f32 %v1177_v56, %v9467_v49  ;;  %v4163_v57 = vsel %vm6684_vm2, %v4158_v18, %v4162_v37  ;;  %v5778_v12 = vcombine.low %v4658_v29, %v4661_v21  ;;  %v9473_v18 = vld [vmem:[#allocation24_spill] sm:$0xff]  ;;  %v9474_v21 = vld [vmem:[#allocation25_spill] sm:$0xff] }
 0x15c   : > { %6432 = vmatmul.mubr.bf16.gmra.mxu0 %v5776_v41  ;;  %v1643_v55 = vpop.f32.mrf.mxu0  ;;  %v6097_v47 = vpop.f32.mrf.mxu1  ;;  %6384 = vmatmul.mubr.bf16.gmra.mxu1 %v5704_v6  ;;  %v5706_v35 = vcombine.low %v4153_v1, %v4163_v57  ;;  %v9475_v1 = vld [vmem:[#allocation26_spill] sm:$0xff] }
 0x15d   : > { %6435 = vmatprep.mubr.bf16.mxu0 %v5777_v27  ;;  %v8935_v40 = vadd.f32 %v1630_v39, %v1178_v14  ;;  %v1199_v23 = vadd.f32 %v6097_v47, %v9468_v45  ;;  %6387 = vmatprep.mubr.bf16.mxu1 %v5705_v3  ;;  %v9472_v3 = vld [vmem:[#allocation23_spill] sm:$0xff] }
 0x15e   : > { %v6146_v7 = vpop.f32.mrf.mxu0  ;;  %v1190_v30 = vpop.f32.mrf.mxu1 }
 0x15f   : > { %v8940_v41 = vadd.f32 %v6145_v61, %v1199_v23  ;;  %v1191_v32 = vadd.f32 %v1190_v30, %v9469_v48 }
 0x160   : > { %v1646_v9 = vpop.f32.mrf.mxu0  ;;  %v6098_v58 = vpop.f32.mrf.mxu1 }
 0x161   : > { %v8943_v59 = vadd.f32 %v1643_v55, %v1191_v32  ;;  %v1202_v4 = vadd.f32 %v6098_v58, %v9470_v11  ;;  %v9477_v58 = vld [vmem:[#allocation28_spill] sm:$0xff] }
 0x162   : > { %v6149_v51 = vpop.f32.mrf.mxu0  ;;  %v1193_v17 = vpop.f32.mrf.mxu1 }
 0x163   : > { %v8946_v27 = vadd.f32 %v6146_v7, %v1202_v4  ;;  %v1194_v28 = vadd.f32 %v1193_v17, %v8536_v33 }
 0x164   : > { %6436 = vmatmul.mubr.bf16.gmra.mxu0 %v5778_v12  ;;  %v1659_v53 = vpop.f32.mrf.mxu0  ;;  %v6101_v5 = vpop.f32.mrf.mxu1  ;;  %6388 = vmatmul.mubr.bf16.gmra.mxu1 %v5706_v35  ;;  %v9476_v12 = vld [vmem:[#allocation27_spill] sm:$0xff] }
 0x165   : > { %v8949_v60 = vadd.f32 %v1646_v9, %v1194_v28  ;;  %v1215_v44 = vadd.f32 %v6101_v5, %v9471_v38 }
 0x166   : > { %v6150_v39 = vpop.f32.mrf.mxu0  ;;  %v1206_v22 = vpop.f32.mrf.mxu1 }
 0x167   : > { %v8952_v6 = vadd.f32 %v6149_v51, %v1215_v44  ;;  %v1207_v2 = vadd.f32 %v1206_v22, %v9472_v3 }
 0x168   : > { %v1662_v10 = vpop.f32.mrf.mxu0  ;;  %v6102_v0 = vpop.f32.mrf.mxu1 }
 0x169   : > { %v8955_v61 = vadd.f32 %v1659_v53, %v1207_v2  ;;  %v1218_v37 = vadd.f32 %v6102_v0, %v9473_v18 }
 0x16a   : > { %v6217_v33 = vpop.f32.mrf.mxu0  ;;  %v1209_v56 = vpop.f32.mrf.mxu1 }
 0x16b   : > { %v8958_v29 = vadd.f32 %v6150_v39, %v1218_v37  ;;  %v1210_v49 = vadd.f32 %v1209_v56, %v9474_v21 }
 0x16c   : > { %v2688_v14 = vpop.f32.mrf.mxu0  ;;  %v6169_v55 = vpop.f32.mrf.mxu1 }
 0x16d   : > { %v8961_v47 = vadd.f32 %v1662_v10, %v1210_v49  ;;  %v2063_v45 = vadd.f32 %v6169_v55, %v9475_v1 }
 0x16e   : > { %v6218_v23 = vpop.f32.mrf.mxu0  ;;  %v1934_v7 = vpop.f32.mrf.mxu1 }
 0x16f   : > { %v8964_v57 = vadd.f32 %v6217_v33, %v2063_v45  ;;  %v2061_v30 = vadd.f32 %v1934_v7, %v9476_v12 }
 0x170   : > { %v2691_v48 = vpop.f32.mrf.mxu0  ;;  %v6170_v32 = vpop.f32.mrf.mxu1 }
 0x171   : > { %v8967_v9 = vadd.f32 %v2688_v14, %v2061_v30  ;;  %v2064_v35 = vadd.f32 %v6170_v32, %v9477_v58 }
 0x172   : > { %v6221_v11 = vpop.f32.mrf.mxu0  ;;  %v1937_v4 = vpop.f32.mrf.mxu1 }
 0x173   : > { %v8970_v51 = vadd.f32 %v6218_v23, %v2064_v35  ;;  %v2062_v17 = vadd.f32 %v1937_v4, %v8706_v25 }
 0x174   : > { %v2704_v28 = vpop.f32.mrf.mxu0  ;;  %v6173_v53 = vpop.f32.mrf.mxu1 }
 0x175   : > { %v8973_v5 = vadd.f32 %v2691_v48, %v2062_v17  ;;  %v2067_v38 = vadd.f32 %v6173_v53, %v8710_v42 }
 0x176   : > { %v6222_v44 = vpop.f32.mrf.mxu0  ;;  %v1950_v39 = vpop.f32.mrf.mxu1 }
 0x177   : > { %v8976_v22 = vadd.f32 %v6221_v11, %v2067_v38  ;;  %v2065_v3 = vadd.f32 %v1950_v39, %v8719_v16 }
 0x178   : > { %v2707_v2 = vpop.f32.mrf.mxu0  ;;  %v6174_v10 = vpop.f32.mrf.mxu1 }
 0x179   : > { %v8979_v0 = vadd.f32 %v2704_v28, %v2065_v3  ;;  %v2068_v18 = vadd.f32 %v6174_v10, %v8745_v54 }
 0x17a   : > { %v6225_v37 = vpop.f32.mrf.mxu0  ;;  %v1953_v25 = vpop.f32.mrf.mxu1 }
 0x17b   : > { %v8982_v33 = vadd.f32 %v6222_v44, %v2068_v18  ;;  %v2066_v56 = vadd.f32 %v1953_v25, %v8765_v15 }
 0x17c   : > { %v2720_v21 = vpop.f32.mrf.mxu0  ;;  %v6177_v42 = vpop.f32.mrf.mxu1 }
 0x17d   : > { %v8985_v49 = vadd.f32 %v2707_v2, %v2066_v56  ;;  %v2071_v14 = vadd.f32 %v6177_v42, %v8773_v8 }
 0x17e   : > { %v6226_v55 = vpop.f32.mrf.mxu0  ;;  %v1966_v16 = vpop.f32.mrf.mxu1 }
 0x17f   : > { %v8988_v1 = vadd.f32 %v6225_v37, %v2071_v14  ;;  %v2069_v45 = vadd.f32 %v1966_v16, %v8783_v46 }
 0x180   : > { %v2723_v23 = vpop.f32.mrf.mxu0  ;;  %v6178_v54 = vpop.f32.mrf.mxu1 }
 0x181   : > { %v8991_v7 = vadd.f32 %v2720_v21, %v2069_v45  ;;  %v2072_v12 = vadd.f32 %v6178_v54, %v8806_v24 }
 0x182   : > { %v6229_v30 = vpop.f32.mrf.mxu0  ;;  %v1969_v15 = vpop.f32.mrf.mxu1 }
 0x183   : > { %v8994_v48 = vadd.f32 %v6226_v55, %v2072_v12  ;;  %v2070_v32 = vadd.f32 %v1969_v15, %v8823_v19 }
 0x184   : > { %v2736_v58 = vpop.f32.mrf.mxu0  ;;  %v6181_v8 = vpop.f32.mrf.mxu1 }
 0x185   : > { %v8997_v35 = vadd.f32 %v2723_v23, %v2070_v32  ;;  %v2075_v11 = vadd.f32 %v6181_v8, %v8830_v43 }
 0x186   : > { %v6230_v4 = vpop.f32.mrf.mxu0  ;;  %v1982_v46 = vpop.f32.mrf.mxu1 }
 0x187   : > { %v9000_v17 = vadd.f32 %v6229_v30, %v2075_v11  ;;  %v2073_v28 = vadd.f32 %v1982_v46, %v8842_v62 }
 0x188   : > { %v2739_v53 = vpop.f32.mrf.mxu0  ;;  %v6182_v24 = vpop.f32.mrf.mxu1 }
 0x189   : > { %v9003_v38 = vadd.f32 %v2736_v58, %v2073_v28  ;;  %v2076_v44 = vadd.f32 %v6182_v24, %v8862_v20 }
 0x18a   : > { %v6233_v39 = vpop.f32.mrf.mxu0  ;;  %v1985_v19 = vpop.f32.mrf.mxu1 }
 0x18b   : > { %v9006_v3 = vadd.f32 %v6230_v4, %v2076_v44  ;;  %v2074_v2 = vadd.f32 %v1985_v19, %v8870_v13 }
 0x18c   : > { %v2752_v10 = vpop.f32.mrf.mxu0  ;;  %v6185_v43 = vpop.f32.mrf.mxu1 }
 0x18d   : > { %v9009_v18 = vadd.f32 %v2739_v53, %v2074_v2  ;;  %v2079_v37 = vadd.f32 %v6185_v43, %v8879_v26 }
 0x18e   : > { %v6234_v25 = vpop.f32.mrf.mxu0  ;;  %v1998_v62 = vpop.f32.mrf.mxu1 }
 0x18f   : > { %v9012_v56 = vadd.f32 %v6233_v39, %v2079_v37  ;;  %v2077_v21 = vadd.f32 %v1998_v62, %v8882_v52 }
 0x190   : > { %v2755_v42 = vpop.f32.mrf.mxu0  ;;  %v6186_v20 = vpop.f32.mrf.mxu1 }
 0x191   : > { %v9015_v14 = vadd.f32 %v2752_v10, %v2077_v21  ;;  %v2080_v55 = vadd.f32 %v6186_v20, %v8899_v63 }
 0x192   : > { %v6237_v16 = vpop.f32.mrf.mxu0  ;;  %v2001_v13 = vpop.f32.mrf.mxu1 }
 0x193   : > { %v9018_v45 = vadd.f32 %v6234_v25, %v2080_v55  ;;  %v2078_v23 = vadd.f32 %v2001_v13, %v8912_v34 }
 0x194   : > { %v2768_v54 = vpop.f32.mrf.mxu0  ;;  %v6189_v26 = vpop.f32.mrf.mxu1 }
 0x195   : > { %9478 = vst [vmem:[#allocation4_spill] sm:$0xff] %v9018_v45  ;;  %v9021_v12 = vadd.f32 %v2755_v42, %v2078_v23  ;;  %v2083_v30 = vadd.f32 %v6189_v26, %v8919_v50 }
 0x196   : > { %v6238_v15 = vpop.f32.mrf.mxu0  ;;  %v2014_v52 = vpop.f32.mrf.mxu1 }
 0x197   : > { %9479 = vst [vmem:[#allocation8_spill] sm:$0xff] %v9021_v12  ;;  %v9024_v32 = vadd.f32 %v6237_v16, %v2083_v30  ;;  %v2081_v58 = vadd.f32 %v2014_v52, %v8922_v36 }
 0x198   : > { %v2771_v8 = vpop.f32.mrf.mxu0  ;;  %v6190_v63 = vpop.f32.mrf.mxu1 }
 0x199   : > { %9480 = vst [vmem:[#allocation10_spill] sm:$0xff] %v9024_v32  ;;  %v9027_v11 = vadd.f32 %v2768_v54, %v2081_v58  ;;  %v2084_v4 = vadd.f32 %v6190_v63, %v8929_v31 }
 0x19a   : > { %v6241_v46 = vpop.f32.mrf.mxu0  ;;  %v2017_v34 = vpop.f32.mrf.mxu1 }
 0x19b   : > { %9481 = vst [vmem:[#allocation19_spill] sm:$0xff] %v9027_v11  ;;  %v9030_v28 = vadd.f32 %v6238_v15, %v2084_v4  ;;  %v2082_v53 = vadd.f32 %v2017_v34, %v8935_v40 }
 0x19c   : > { %v2784_v24 = vpop.f32.mrf.mxu0  ;;  %v6193_v50 = vpop.f32.mrf.mxu1 }
 0x19d   : > { %9482 = vst [vmem:[#allocation14_spill] sm:$0xff] %v9030_v28  ;;  %v9033_v44 = vadd.f32 %v2771_v8, %v2082_v53  ;;  %v2087_v39 = vadd.f32 %v6193_v50, %v8940_v41 }
 0x19e   : > { %v6242_v19 = vpop.f32.mrf.mxu0  ;;  %v2030_v36 = vpop.f32.mrf.mxu1 }
 0x19f   : > { %9483 = vst [vmem:[#allocation16_spill] sm:$0xff] %v9033_v44  ;;  %v9036_v2 = vadd.f32 %v6241_v46, %v2087_v39  ;;  %v2085_v10 = vadd.f32 %v2030_v36, %v8943_v59 }
 0x1a0   : > { %v2787_v43 = vpop.f32.mrf.mxu0  ;;  %v6194_v31 = vpop.f32.mrf.mxu1 }
 0x1a1   : > { %9484 = vst [vmem:[#allocation18_spill] sm:$0xff] %v9036_v2  ;;  %v9039_v37 = vadd.f32 %v2784_v24, %v2085_v10  ;;  %v2088_v25 = vadd.f32 %v6194_v31, %v8946_v27 }
 0x1a2   : > { %v6245_v62 = vpop.f32.mrf.mxu0  ;;  %v2033_v40 = vpop.f32.mrf.mxu1 }
 0x1a3   : > { %9485 = vst [vmem:[#allocation21_spill] sm:$0xff] %v9039_v37  ;;  %v9042_v21 = vadd.f32 %v6242_v19, %v2088_v25  ;;  %v2086_v42 = vadd.f32 %v2033_v40, %v8949_v60 }
 0x1a4   : > { %v2800_v20 = vpop.f32.mrf.mxu0  ;;  %v6197_v41 = vpop.f32.mrf.mxu1 }
 0x1a5   : > { %9486 = vst [vmem:[#allocation3_spill] sm:$0xff] %v9042_v21  ;;  %v9045_v55 = vadd.f32 %v2787_v43, %v2086_v42  ;;  %v2091_v16 = vadd.f32 %v6197_v41, %v8952_v6 }
 0x1a6   : > { %v6246_v13 = vpop.f32.mrf.mxu0  ;;  %v2046_v59 = vpop.f32.mrf.mxu1 }
 0x1a7   : > { %9487 = vst [vmem:[#allocation6_spill] sm:$0xff] %v9045_v55  ;;  %v9048_v23 = vadd.f32 %v6245_v62, %v2091_v16  ;;  %v2089_v54 = vadd.f32 %v2046_v59, %v8955_v61 }
 0x1a8   : > { %v2803_v26 = vpop.f32.mrf.mxu0  ;;  %v6198_v27 = vpop.f32.mrf.mxu1 }
 0x1a9   : > { %9488 = vst [vmem:[#allocation5_spill] sm:$0xff] %v9048_v23  ;;  %v9051_v30 = vadd.f32 %v2800_v20, %v2089_v54  ;;  %v2092_v15 = vadd.f32 %v6198_v27, %v8958_v29 }
 0x1aa   : > { %v9054_v52 = vpop.f32.mrf.mxu0  ;;  %v2049_v60 = vpop.f32.mrf.mxu1 }
 0x1ab   : > { %9489 = vst [vmem:[#allocation7_spill] sm:$0xff] %v9051_v30  ;;  %v9056_v58 = vadd.f32 %v6246_v13, %v2092_v15  ;;  %v2090_v8 = vadd.f32 %v2049_v60, %v8961_v47 }
 0x1ac   : > { %v9059_v6 = vpop.f32.mrf.mxu0  ;;  %v6265_v63 = vpop.f32.mrf.mxu1 }
 0x1ad   : > { %9490 = vst [vmem:[#allocation9_spill] sm:$0xff] %v9056_v58  ;;  %v9061_v4 = vadd.f32 %v2803_v26, %v2090_v8 }
 0x1ae   : > { %v9063_v46 = vpop.f32.mrf.mxu0  ;;  %v3186_v61 = vpop.f32.mrf.mxu1 }
 0x1af   : > { %9491 = vst [vmem:[#allocation11_spill] sm:$0xff] %v9061_v4 }
 0x1b0   : > { %v9065_v34 = vpop.f32.mrf.mxu0  ;;  %v6266_v53 = vpop.f32.mrf.mxu1 }
 0x1b2   : > { %v9067_v24 = vpop.f32.mrf.mxu0  ;;  %v9069_v29 = vpop.f32.mrf.mxu1 }
 0x1b4   : > { %v9071_v50 = vpop.f32.mrf.mxu0  ;;  %v9073_v39 = vpop.f32.mrf.mxu1 }
 0x1b6   : > { %v9075_v47 = vpop.f32.mrf.mxu0  ;;  %v9077_v19 = vpop.f32.mrf.mxu1 }
 0x1b8   : > { %v9079_v36 = vpop.f32.mrf.mxu0  ;;  %v9081_v10 = vpop.f32.mrf.mxu1 }
 0x1ba   : > { %v9083_v43 = vpop.f32.mrf.mxu0  ;;  %v9085_v31 = vpop.f32.mrf.mxu1 }
 0x1bc   : > { %v9087_v25 = vpop.f32.mrf.mxu0  ;;  %v9089_v62 = vpop.f32.mrf.mxu1 }
 0x1be   : > { %v9091_v40 = vpop.f32.mrf.mxu0  ;;  %v9093_v42 = vpop.f32.mrf.mxu1 }
 0x1c0   : > { %v9095_v20 = vpop.f32.mrf.mxu0  ;;  %v9097_v41 = vpop.f32.mrf.mxu1 }
 0x1c2   : > { %v9099_v16 = vpop.f32.mrf.mxu0  ;;  %v9101_v13 = vpop.f32.mrf.mxu1 }
 0x1c4   : > { %v9103_v59 = vpop.f32.mrf.mxu0  ;;  %v9105_v54 = vpop.f32.mrf.mxu1 }
 0x1c6   : > { %v9107_v26 = vpop.f32.mrf.mxu0  ;;  %v9109_v27 = vpop.f32.mrf.mxu1 }
 0x1c8   : > { %v9111_v15 = vpop.f32.mrf.mxu0  ;;  %v9113_v60 = vpop.f32.mrf.mxu1 }
 0x1ca   : > { %v9115_v8 = vpop.f32.mrf.mxu0  ;;  %v9117_v4 = vpop.f32.mrf.mxu1 }
 0x1cc   : > { %v9119_v58 = vpop.f32.mrf.mxu0  ;;  %v9121_v30 = vpop.f32.mrf.mxu1 }
 0x1cd   : > { %9492 = vst [vmem:[#allocation12_spill] sm:$0xff] %v9119_v58 }
 0x1ce   : > { %v9123_v23 = vpop.f32.mrf.mxu0  ;;  %v9125_v55 = vpop.f32.mrf.mxu1 }
 0x1cf   : > { %9493 = vst [vmem:[#allocation13_spill] sm:$0xff] %v9123_v23 }
 0x1d0   : > { %v9127_v21 = vpop.f32.mrf.mxu0  ;;  %v9129_v37 = vpop.f32.mrf.mxu1 }
 0x1d1   : > { %9494 = vst [vmem:[#allocation15_spill] sm:$0xff] %v9127_v21  ;;  %9495 = vst [vmem:[#allocation17_spill] sm:$0xff] %v9129_v37 }
 0x1d2   : > { %v9131_v2 = vpop.f32.mrf.mxu0  ;;  %v9133_v44 = vpop.f32.mrf.mxu1 }
 0x1d3   : > { %9496 = vst [vmem:[#allocation20_spill] sm:$0xff] %v9131_v2  ;;  %9497 = vst [vmem:[#allocation22_spill] sm:$0xff] %v9133_v44 }
 0x1d4   : > { %v9135_v28 = vpop.f32.mrf.mxu0  ;;  %v9137_v11 = vpop.f32.mrf.mxu1 }
 0x1d5   : > { %9498 = vst [vmem:[#allocation23_spill] sm:$0xff] %v9135_v28  ;;  %9499 = vst [vmem:[#allocation24_spill] sm:$0xff] %v9137_v11 }
 0x1d6   : > { %v9139_v32 = vpop.f32.mrf.mxu0  ;;  %v9141_v12 = vpop.f32.mrf.mxu1 }
 0x1d7   : > { %9500 = vst [vmem:[#allocation25_spill] sm:$0xff] %v9139_v32  ;;  %9501 = vst [vmem:[#allocation26_spill] sm:$0xff] %v9141_v12 }
 0x1d8   : > { %v9143_v58 = vpop.f32.mrf.mxu0  ;;  %v9145_v23 = vpop.f32.mrf.mxu1 }
 0x1d9   : > { %9502 = vst [vmem:[#allocation27_spill] sm:$0xff] %v9143_v58  ;;  %9503 = vst [vmem:[#allocation28_spill] sm:$0xff] %v9145_v23 }
 0x1da   : > { %v9147_v45 = vpop.f32.mrf.mxu0  ;;  %v9149_v21 = vpop.f32.mrf.mxu1 }
 0x1db   : > { %9504 = vst [vmem:[#allocation29_spill] sm:$0xff] %v9147_v45  ;;  %9505 = vst [vmem:[#allocation30_spill] sm:$0xff] %v9149_v21 }
 0x1dc   : > { %v9151_v37 = vpop.f32.mrf.mxu0  ;;  %v9153_v2 = vpop.f32.mrf.mxu1 }
 0x1dd   : > { %9506 = vst [vmem:[#allocation31_spill] sm:$0xff] %v9151_v37  ;;  %9507 = vst [vmem:[#allocation32_spill] sm:$0xff] %v9153_v2 }
 0x1de   : > { %v9155_v44 = vpop.f32.mrf.mxu0  ;;  %v9157_v28 = vpop.f32.mrf.mxu1 }
 0x1df   : > { %9508 = vst [vmem:[#allocation33_spill] sm:$0xff] %v9155_v44  ;;  %9509 = vst [vmem:[#allocation34_spill] sm:$0xff] %v9157_v28  ;;  %v3315_v44 = vadd.f32 %v6265_v63, %v8964_v57  ;;  %v3314_v57 = vadd.f32 %v9069_v29, %v8973_v5 }
 0x1e0   : > { %v9159_v11 = vpop.f32.mrf.mxu0  ;;  %v9161_v32 = vpop.f32.mrf.mxu1 }
 0x1e1   : > { %9510 = vst [vmem:[#allocation35_spill] sm:$0xff] %v9159_v11  ;;  %9511 = vst [vmem:[#allocation36_spill] sm:$0xff] %v9161_v32  ;;  %v3313_v11 = vadd.f32 %v3186_v61, %v8967_v9  ;;  %v3319_v61 = vadd.f32 %v9073_v39, %v8976_v22 }
 0x1e2   : > { %v9163_v12 = vpop.f32.mrf.mxu0  ;;  %v9165_v58 = vpop.f32.mrf.mxu1 }
 0x1e3   : > { %9512 = vst [vmem:[#allocation37_spill] sm:$0xff] %v9163_v12  ;;  %9513 = vst [vmem:[#allocation38_spill] sm:$0xff] %v9165_v58  ;;  %v3702_v58 = vadd.f32 %v9054_v52, %v3315_v44 }
 0x1e4   : > { %v9167_v23 = vpop.f32.mrf.mxu0  ;;  %v9169_v45 = vpop.f32.mrf.mxu1 }
 0x1e5   : > { %9514 = vst [vmem:[#allocation39_spill] sm:$0xff] %v9167_v23  ;;  %9515 = vst [vmem:[#allocation40_spill] sm:$0xff] %v9169_v45  ;;  %v3316_v23 = vadd.f32 %v6266_v53, %v8970_v51 }
 0x1e6   : > { %v9171_v21 = vpop.f32.mrf.mxu0  ;;  %v9173_v37 = vpop.f32.mrf.mxu1 }
 0x1e7   : > { %9516 = vst [vmem:[#allocation41_spill] sm:$0xff] %v9171_v21  ;;  %9517 = vst [vmem:[#allocation42_spill] sm:$0xff] %v9173_v37  ;;  %v3700_v37 = vadd.f32 %v9059_v6, %v3313_v11  ;;  %v3703_v9 = vadd.f32 %v9063_v46, %v3316_v23  ;;  %v3317_v11 = vadd.f32 %v9077_v19, %v8979_v0 }
 0x1e8   : > { %v9176_v2 = vpop.f32.mrf.mxu0  ;;  %v9178_v28 = vpop.f32.mrf.mxu1  ;;  %v3706_v23 = vadd.f32 %v9067_v24, %v3319_v61  ;;  %v3318_v46 = vadd.f32 %v9085_v31, %v8985_v49  ;;  %v3323_v24 = vadd.f32 %v9089_v62, %v8988_v1 }
 0x1e9   : > { %9518 = vst [vmem:[#allocation43_spill] sm:$0xff] %v9176_v2  ;;  %9519 = vst [vmem:[#allocation44_spill] sm:$0xff] %v9178_v28  ;;  %v3704_v0 = vadd.f32 %v9071_v50, %v3317_v11  ;;  %v3324_v11 = vadd.f32 %v9097_v41, %v8994_v48 }
 0x1ea   : > { %v9181_v12 = vpop.f32.mrf.mxu1  ;;  %v3705_v50 = vadd.f32 %v9079_v36, %v3318_v46  ;;  %v3710_v62 = vadd.f32 %v9083_v43, %v3323_v24  ;;  %v3327_v24 = vadd.f32 %v9105_v54, %v9000_v17 }
 0x1eb   : > { %v6409_v32 = vpop.f32.mrf.mxu0  ;;  %9520 = vst [vmem:[#allocation45_spill] sm:$0xff] %v9181_v12  ;;  %v3701_v12 = vadd.f32 %v9065_v34, %v3314_v57 }
 0x1ec   : > { %v6361_v21 = vpop.f32.mrf.mxu1 }
 0x1ed   : > { %v4825_v45 = vpop.f32.mrf.mxu0  ;;  %v4456_v63 = vadd.f32 %v6361_v21, %v3702_v58 }
 0x1ee   : > { %v4327_v28 = vpop.f32.mrf.mxu1 }
 0x1ef   : > { %v6410_v2 = vpop.f32.mrf.mxu0  ;;  %v4954_v44 = vadd.f32 %v6409_v32, %v4456_v63  ;;  %v4454_v52 = vadd.f32 %v4327_v28, %v3700_v37  ;;  %v3320_v37 = vadd.f32 %v9081_v10, %v8982_v33 }
 0x1f0   : > { %v6362_v53 = vpop.f32.mrf.mxu1 }
 0x1f1   : > { %v4828_v51 = vpop.f32.mrf.mxu0  ;;  %4986 = vst [vmem:[%s6638_s19 + $0x10] sm:$0xff] %v4954_v44  ;;  %v4952_v5 = vadd.f32 %v4825_v45, %v4454_v52  ;;  %v4457_v21 = vadd.f32 %v6362_v53, %v3703_v9  ;;  %v3707_v49 = vadd.f32 %v9075_v47, %v3320_v37  ;;  %v5055_v9 = vmul.f32 %v4954_v44, %v4954_v44 }
 0x1f2   : > { %v4330_v6 = vpop.f32.mrf.mxu1  ;;  %v3321_v53 = vadd.f32 %v9093_v42, %v8991_v7 }
 0x1f3   : > { %v6413_v58 = vpop.f32.mrf.mxu0  ;;  %4984 = vst [vmem:[%s6638_s19] sm:$0xff] %v4952_v5  ;;  %v4955_v22 = vadd.f32 %v6410_v2, %v4457_v21  ;;  %v4455_v32 = vadd.f32 %v4330_v6, %v3701_v12  ;;  %v5053_v2 = vmul.f32 %v4952_v5, %v4952_v5 }
 0x1f4   : > { %v6365_v34 = vpop.f32.mrf.mxu1  ;;  %v3708_v46 = vadd.f32 %v9087_v25, %v3321_v53 }
 0x1f5   : > { %v4841_v28 = vpop.f32.mrf.mxu0  ;;  %4987 = vst [vmem:[%s6638_s19 + $0x18] sm:$0xff] %v4955_v22  ;;  %v4953_v45 = vadd.f32 %v4828_v51, %v4455_v32  ;;  %v4460_v29 = vadd.f32 %v6365_v34, %v3706_v23  ;;  %v5056_v21 = vmul.f32 %v4955_v22, %v4955_v22  ;;  %v3322_v23 = vadd.f32 %v9101_v13, %v8997_v35 }
 0x1f6   : > { %v4343_v12 = vpop.f32.mrf.mxu1  ;;  %v3711_v34 = vadd.f32 %v9091_v40, %v3324_v11  ;;  %v3326_v11 = vadd.f32 %v9117_v4, %v9009_v18 }
 0x1f7   : > { %v6414_v39 = vpop.f32.mrf.mxu0  ;;  %4985 = vst [vmem:[%s6638_s19 + $0x8] sm:$0xff] %v4953_v45  ;;  %v5016_v19 = vadd.f32 %v4953_v45, %v4952_v5  ;;  %v5054_v57 = vmul.f32 %v4953_v45, %v4953_v45  ;;  %v4958_v33 = vadd.f32 %v6413_v58, %v4460_v29  ;;  %v4458_v10 = vadd.f32 %v4343_v12, %v3704_v0 }
 0x1f8   : > { %v6366_v31 = vpop.f32.mrf.mxu1 }
 0x1f9   : > { %v4844_v63 = vpop.f32.mrf.mxu0  ;;  %v5017_v61 = vadd.f32 %v5016_v19, %v4954_v44  ;;  %v5085_v52 = vadd.f32 %v5054_v57, %v5053_v2  ;;  %4990 = vst [vmem:[%s6638_s19 + $0x30] sm:$0xff] %v4958_v33  ;;  %v4956_v51 = vadd.f32 %v4841_v28, %v4458_v10  ;;  %v4461_v5 = vadd.f32 %v6366_v31, %v3707_v49 }
 0x1fa   : > { %v4346_v47 = vpop.f32.mrf.mxu1  ;;  %v3325_v2 = vadd.f32 %v9109_v27, %v9003_v38  ;;  %v5059_v40 = vmul.f32 %v4958_v33, %v4958_v33  ;;  %v3328_v49 = vadd.f32 %v9113_v60, %v9006_v3 }
 0x1fb   : > { %v6417_v1 = vpop.f32.mrf.mxu0  ;;  %v5086_v58 = vadd.f32 %v5085_v52, %v5055_v9  ;;  %4988 = vst [vmem:[%s6638_s19 + $0x20] sm:$0xff] %v4956_v51  ;;  %v5018_v36 = vadd.f32 %v5017_v61, %v4955_v22  ;;  %v4459_v44 = vadd.f32 %v4346_v47, %v3705_v50  ;;  %v5057_v43 = vmul.f32 %v4956_v51, %v4956_v51 }
 0x1fc   : > { %v4959_v32 = vadd.f32 %v6414_v39, %v4461_v5  ;;  %v6369_v28 = vpop.f32.mrf.mxu1  ;;  %v3709_v39 = vadd.f32 %v9095_v20, %v3322_v23  ;;  %v3714_v61 = vadd.f32 %v9099_v16, %v3327_v24  ;;  %v3715_v53 = vadd.f32 %v9107_v26, %v3328_v49  ;;  %v9528_v49 = vld [vmem:[#allocation24_spill] sm:$0xff] }
 0x1fd   : > { %v4857_v6 = vpop.f32.mrf.mxu0  ;;  %v5019_v7 = vadd.f32 %v5018_v36, %v4956_v51  ;;  %v5087_v42 = vadd.f32 %v5086_v58, %v5056_v21  ;;  %v4957_v37 = vadd.f32 %v4844_v63, %v4459_v44  ;;  %v4464_v48 = vadd.f32 %v6369_v28, %v3710_v62 }
 0x1fe   : > { %4991 = vst [vmem:[%s6638_s19 + $0x38] sm:$0xff] %v4959_v32  ;;  %v4359_v22 = vpop.f32.mrf.mxu1  ;;  %v5060_v20 = vmul.f32 %v4959_v32, %v4959_v32  ;;  %v3331_v5 = vadd.f32 %v9121_v30, %v9012_v56  ;;  %v3713_v28 = vadd.f32 %v9111_v15, %v3326_v11  ;;  %v9533_v11 = vld [vmem:[#allocation28_spill] sm:$0xff] }
 0x1ff   : > { %v6418_v41 = vpop.f32.mrf.mxu0  ;;  %v5088_v0 = vadd.f32 %v5087_v42, %v5057_v43  ;;  %4989 = vst [vmem:[%s6638_s19 + $0x28] sm:$0xff] %v4957_v37  ;;  %v5020_v45 = vadd.f32 %v5019_v7, %v4957_v37  ;;  %v5058_v29 = vmul.f32 %v4957_v37, %v4957_v37  ;;  %v4962_v35 = vadd.f32 %v6417_v1, %v4464_v48  ;;  %v9521_v42 = vld [vmem:[#allocation4_spill] sm:$0xff]  ;;  %v9522_v37 = vld [vmem:[#allocation17_spill] sm:$0xff] }
 0x200   : > { %v4462_v25 = vadd.f32 %v4359_v22, %v3708_v46  ;;  %v6370_v12 = vpop.f32.mrf.mxu1  ;;  %v3718_v7 = vadd.f32 %v9115_v8, %v3331_v5  ;;  %v3332_v48 = vadd.f32 %v9522_v37, %v9521_v42 }
 0x201   : > { %v4860_v13 = vpop.f32.mrf.mxu0  ;;  %v5021_v19 = vadd.f32 %v5020_v45, %v4958_v33  ;;  %v5089_v57 = vadd.f32 %v5088_v0, %v5058_v29  ;;  %4994 = vst [vmem:[%s6638_s19 + $0x50] sm:$0xff] %v4962_v35  ;;  %v4465_v10 = vadd.f32 %v6370_v12, %v3711_v34  ;;  %v3712_v33 = vadd.f32 %v9103_v59, %v3325_v2  ;;  %v9523_v0 = vld [vmem:[#allocation12_spill] sm:$0xff] }
 0x202   : > { %v4960_v50 = vadd.f32 %v4857_v6, %v4462_v25  ;;  %v4362_v31 = vpop.f32.mrf.mxu1  ;;  %v3329_v6 = vadd.f32 %v9125_v55, %v9015_v14  ;;  %v5063_v26 = vmul.f32 %v4962_v35, %v4962_v35  ;;  %v9524_v29 = vld [vmem:[#allocation8_spill] sm:$0xff] }
 0x203   : > { %v6421_v63 = vpop.f32.mrf.mxu0  ;;  %v5090_v17 = vadd.f32 %v5089_v57, %v5059_v40  ;;  %v5022_v54 = vadd.f32 %v5021_v19, %v4959_v32  ;;  %v4963_v9 = vadd.f32 %v6418_v41, %v4465_v10  ;;  %v4463_v38 = vadd.f32 %v4362_v31, %v3709_v39  ;;  %v9526_v40 = vld [vmem:[#allocation13_spill] sm:$0xff] }
 0x204   : > { %4992 = vst [vmem:[%s6638_s19 + $0x40] sm:$0xff] %v4960_v50  ;;  %v6373_v52 = vpop.f32.mrf.mxu1  ;;  %v5061_v1 = vmul.f32 %v4960_v50, %v4960_v50  ;;  %v3716_v45 = vadd.f32 %v9523_v0, %v3329_v6  ;;  %v3719_v19 = vadd.f32 %v9526_v40, %v3332_v48  ;;  %v9542_v40 = vld [vmem:[#allocation21_spill] sm:$0xff] }
 0x205   : > { %v4873_v27 = vpop.f32.mrf.mxu0  ;;  %v5023_v51 = vadd.f32 %v5022_v54, %v4960_v50  ;;  %v5091_v62 = vadd.f32 %v5090_v17, %v5060_v20  ;;  %4995 = vst [vmem:[%s6638_s19 + $0x58] sm:$0xff] %v4963_v9  ;;  %v4961_v3 = vadd.f32 %v4860_v13, %v4463_v38  ;;  %v4468_v16 = vadd.f32 %v6373_v52, %v3714_v61  ;;  %v9529_v61 = vld [vmem:[#allocation15_spill] sm:$0xff] }
 0x206   : > { %v4375_v47 = vpop.f32.mrf.mxu1  ;;  %v5064_v14 = vmul.f32 %v4963_v9, %v4963_v9  ;;  %v9530_v52 = vld [vmem:[#allocation19_spill] sm:$0xff] }
 0x207   : > { %v6422_v60 = vpop.f32.mrf.mxu0  ;;  %v5092_v21 = vadd.f32 %v5091_v62, %v5061_v1  ;;  %4993 = vst [vmem:[%s6638_s19 + $0x48] sm:$0xff] %v4961_v3  ;;  %v5024_v59 = vadd.f32 %v5023_v51, %v4961_v3  ;;  %v5062_v58 = vmul.f32 %v4961_v3, %v4961_v3  ;;  %v4466_v36 = vadd.f32 %v4375_v47, %v3712_v33  ;;  %v9531_v51 = vld [vmem:[#allocation26_spill] sm:$0xff] }
 0x208   : > { %v4966_v23 = vadd.f32 %v6421_v63, %v4468_v16  ;;  %v6374_v43 = vpop.f32.mrf.mxu1  ;;  %v9527_v63 = vld [vmem:[#allocation10_spill] sm:$0xff]  ;;  %v3333_v1 = vadd.f32 %v9531_v51, %v9530_v52 }
 0x209   : > { %v4876_v44 = vpop.f32.mrf.mxu0  ;;  %v5025_v18 = vadd.f32 %v5024_v59, %v4962_v35  ;;  %v5093_v4 = vadd.f32 %v5092_v21, %v5062_v58  ;;  %v4964_v32 = vadd.f32 %v4873_v27, %v4466_v36  ;;  %v4469_v56 = vadd.f32 %v6374_v43, %v3715_v53  ;;  %v9525_v35 = vld [vmem:[#allocation22_spill] sm:$0xff]  ;;  %v9534_v58 = vld [vmem:[#allocation20_spill] sm:$0xff] }
 0x20a   : > { %4998 = vst [vmem:[%s6638_s19 + $0x70] sm:$0xff] %v4966_v23  ;;  %v4378_v41 = vpop.f32.mrf.mxu1  ;;  %v3330_v13 = vadd.f32 %v9525_v35, %v9524_v29  ;;  %v3335_v20 = vadd.f32 %v9528_v49, %v9527_v63  ;;  %v9532_v53 = vld [vmem:[#allocation14_spill] sm:$0xff]  ;;  %v5067_v16 = vmul.f32 %v4966_v23, %v4966_v23  ;;  %v9540_v29 = vld [vmem:[#allocation32_spill] sm:$0xff] }
 0x20b   : > { %v5094_v55 = vadd.f32 %v5093_v4, %v5063_v26  ;;  %4996 = vst [vmem:[%s6638_s19 + $0x60] sm:$0xff] %v4964_v32  ;;  %v5026_v46 = vadd.f32 %v5025_v18, %v4963_v9  ;;  %v4967_v34 = vadd.f32 %v6422_v60, %v4469_v56  ;;  %v4467_v15 = vadd.f32 %v4378_v41, %v3713_v28  ;;  %v9535_v56 = vld [vmem:[#allocation23_spill] sm:$0xff]  ;;  %v9536_v28 = vld [vmem:[#allocation16_spill] sm:$0xff]  ;;  %v9538_v41 = vld [vmem:[#allocation25_spill] sm:$0xff] }
 0x20c   : > { %v6425_v30 = vpop.f32.mrf.mxu0  ;;  %v6377_v8 = vpop.f32.mrf.mxu1  ;;  %v5065_v24 = vmul.f32 %v4964_v32, %v4964_v32  ;;  %v3717_v33 = vadd.f32 %v9529_v61, %v3330_v13  ;;  %v3336_v5 = vadd.f32 %v9533_v11, %v9532_v53  ;;  %v3722_v36 = vadd.f32 %v9534_v58, %v3335_v20  ;;  %v9544_v20 = vld [vmem:[#allocation3_spill] sm:$0xff]  ;;  %v9546_v61 = vld [vmem:[#allocation29_spill] sm:$0xff] }
 0x20d   : > { %v5027_v39 = vadd.f32 %v5026_v46, %v4964_v32  ;;  %v5095_v2 = vadd.f32 %v5094_v55, %v5064_v14  ;;  %4999 = vst [vmem:[%s6638_s19 + $0x78] sm:$0xff] %v4967_v34  ;;  %v4472_v25 = vadd.f32 %v6377_v8, %v3718_v7  ;;  %v4965_v57 = vadd.f32 %v4876_v44, %v4467_v15  ;;  %v9537_v7 = vld [vmem:[#allocation30_spill] sm:$0xff]  ;;  %v9547_v11 = vld [vmem:[#allocation31_spill] sm:$0xff] }
 0x20e   : > { %v4889_v22 = vpop.f32.mrf.mxu0  ;;  %v4391_v10 = vpop.f32.mrf.mxu1  ;;  %v5068_v43 = vmul.f32 %v4967_v34, %v4967_v34  ;;  %v3334_v42 = vadd.f32 %v9537_v7, %v9536_v28  ;;  %v3723_v14 = vadd.f32 %v9538_v41, %v3336_v5  ;;  %v9553_v41 = vld [vmem:[#allocation35_spill] sm:$0xff] }
 0x20f   : > { %v5096_v50 = vadd.f32 %v5095_v2, %v5065_v24  ;;  %v4970_v31 = vadd.f32 %v6425_v30, %v4472_v25  ;;  %v4470_v17 = vadd.f32 %v4391_v10, %v3716_v45  ;;  %4997 = vst [vmem:[%s6638_s19 + $0x68] sm:$0xff] %v4965_v57  ;;  %v5028_v9 = vadd.f32 %v5027_v39, %v4965_v57  ;;  %v9539_v45 = vld [vmem:[#allocation18_spill] sm:$0xff]  ;;  %v9541_v25 = vld [vmem:[#allocation27_spill] sm:$0xff] }
 0x210   : > { %v6426_v12 = vpop.f32.mrf.mxu0  ;;  %v5066_v38 = vmul.f32 %v4965_v57, %v4965_v57  ;;  %v6378_v27 = vpop.f32.mrf.mxu1  ;;  %v3720_v30 = vadd.f32 %v9535_v56, %v3333_v1  ;;  %v9552_v56 = vld [vmem:[#allocation40_spill] sm:$0xff] }
 0x211   : > { %5002 = vst [vmem:[%s6638_s19 + $0x90] sm:$0xff] %v4970_v31  ;;  %v4968_v62 = vadd.f32 %v4889_v22, %v4470_v17  ;;  %v4473_v3 = vadd.f32 %v6378_v27, %v3719_v19  ;;  %v5029_v47 = vadd.f32 %v5028_v9, %v4966_v23  ;;  %v9543_v19 = vld [vmem:[#allocation34_spill] sm:$0xff] }
 0x212   : > { %v4892_v54 = vpop.f32.mrf.mxu0  ;;  %v5097_v21 = vadd.f32 %v5096_v50, %v5066_v38  ;;  %v4394_v59 = vpop.f32.mrf.mxu1  ;;  %v3337_v57 = vadd.f32 %v9543_v19, %v9542_v40  ;;  %v9545_v50 = vld [vmem:[#allocation36_spill] sm:$0xff] }
 0x213   : > { %5000 = vst [vmem:[%s6638_s19 + $0x80] sm:$0xff] %v4968_v62  ;;  %v4971_v44 = vadd.f32 %v6426_v12, %v4473_v3  ;;  %v4471_v6 = vadd.f32 %v4394_v59, %v3717_v33  ;;  %v5030_v4 = vadd.f32 %v5029_v47, %v4967_v34  ;;  %v5069_v46 = vmul.f32 %v4968_v62, %v4968_v62  ;;  %v9549_v47 = vld [vmem:[#allocation38_spill] sm:$0xff] }
 0x214   : > { %v6429_v60 = vpop.f32.mrf.mxu0  ;;  %v5098_v18 = vadd.f32 %v5097_v21, %v5067_v16  ;;  %v6381_v32 = vpop.f32.mrf.mxu1  ;;  %v3339_v34 = vadd.f32 %v9540_v29, %v9539_v45  ;;  %v3721_v12 = vadd.f32 %v9541_v25, %v3334_v42  ;;  %v3340_v17 = vadd.f32 %v9545_v50, %v9544_v20  ;;  %v9548_v16 = vld [vmem:[#allocation6_spill] sm:$0xff]  ;;  %v9558_v25 = vld [vmem:[#allocation44_spill] sm:$0xff]  ;;  %v9559_v50 = vld [vmem:[#allocation39_spill] sm:$0xff] }
 0x215   : > { %5003 = vst [vmem:[%s6638_s19 + $0x98] sm:$0xff] %v4971_v44  ;;  %v4969_v23 = vadd.f32 %v4892_v54, %v4471_v6  ;;  %v4476_v37 = vadd.f32 %v6381_v32, %v3722_v36  ;;  %v5031_v55 = vadd.f32 %v5030_v4, %v4968_v62  ;;  %v5071_v54 = vmul.f32 %v4970_v31, %v4970_v31  ;;  %v9550_v36 = vld [vmem:[#allocation33_spill] sm:$0xff] }
 0x216   : > { %v4905_v26 = vpop.f32.mrf.mxu0  ;;  %v5099_v22 = vadd.f32 %v5098_v18, %v5068_v43  ;;  %v4407_v0 = vpop.f32.mrf.mxu1  ;;  %v3726_v33 = vadd.f32 %v9546_v61, %v3339_v34  ;;  %v5072_v62 = vmul.f32 %v4971_v44, %v4971_v44  ;;  %v3724_v5 = vadd.f32 %v9547_v11, %v3337_v57  ;;  %v9551_v32 = vld [vmem:[#allocation5_spill] sm:$0xff] }
 0x217   : > { %5001 = vst [vmem:[%s6638_s19 + $0x88] sm:$0xff] %v4969_v23  ;;  %v5070_v35 = vmul.f32 %v4969_v23, %v4969_v23  ;;  %v4974_v13 = vadd.f32 %v6429_v60, %v4476_v37  ;;  %v4474_v15 = vadd.f32 %v4407_v0, %v3720_v30  ;;  %v5032_v24 = vadd.f32 %v5031_v55, %v4969_v23  ;;  %v9554_v55 = vld [vmem:[#allocation7_spill] sm:$0xff] }
 0x218   : > { %v6430_v48 = vpop.f32.mrf.mxu0  ;;  %v5100_v39 = vadd.f32 %v5099_v22, %v5069_v46  ;;  %v6382_v2 = vpop.f32.mrf.mxu1  ;;  %v3338_v21 = vadd.f32 %v9549_v47, %v9548_v16  ;;  %v3727_v6 = vadd.f32 %v9550_v36, %v3340_v17  ;;  %v9555_v46 = vld [vmem:[#allocation42_spill] sm:$0xff] }
 0x219   : > { %5006 = vst [vmem:[%s6638_s19 + $0xb0] sm:$0xff] %v4974_v13  ;;  %v4972_v10 = vadd.f32 %v4905_v26, %v4474_v15  ;;  %v4477_v63 = vadd.f32 %v6382_v2, %v3723_v14  ;;  %v5033_v9 = vadd.f32 %v5032_v24, %v4970_v31  ;;  %v3341_v22 = vadd.f32 %v9555_v46, %v9554_v55  ;;  %v9557_v2 = vld [vmem:[#allocation9_spill] sm:$0xff] }
 0x21a   : > { %v4908_v8 = vpop.f32.mrf.mxu0  ;;  %v5101_v38 = vadd.f32 %v5100_v39, %v5070_v35  ;;  %v4410_v27 = vpop.f32.mrf.mxu1  ;;  %v3725_v14 = vadd.f32 %v9553_v41, %v3338_v21  ;;  %v5075_v34 = vmul.f32 %v4974_v13, %v4974_v13  ;;  %v9556_v39 = vld [vmem:[#allocation37_spill] sm:$0xff]  ;;  %v9563_v21 = vld [vmem:[#allocation43_spill] sm:$0xff] }
 0x21b   : > { %5004 = vst [vmem:[%s6638_s19 + $0xa0] sm:$0xff] %v4972_v10  ;;  %v4975_v52 = vadd.f32 %v6430_v48, %v4477_v63  ;;  %v4475_v51 = vadd.f32 %v4410_v27, %v3721_v12  ;;  %v5034_v60 = vadd.f32 %v5033_v9, %v4971_v44  ;;  %v5073_v43 = vmul.f32 %v4972_v10, %v4972_v10 }
 0x21c   : > { %v6433_v49 = vpop.f32.mrf.mxu0  ;;  %v5102_v3 = vadd.f32 %v5101_v38, %v5071_v54  ;;  %v6385_v53 = vpop.f32.mrf.mxu1  ;;  %v3343_v44 = vadd.f32 %v9552_v56, %v9551_v32  ;;  %v3344_v12 = vadd.f32 %v9558_v25, %v9557_v2  ;;  %v3728_v17 = vadd.f32 %v9559_v50, %v3341_v22  ;;  %v9560_v54 = vld [vmem:[#allocation11_spill] sm:$0xff] }
 0x21d   : > { %5007 = vst [vmem:[%s6638_s19 + $0xb8] sm:$0xff] %v4975_v52  ;;  %v4973_v31 = vadd.f32 %v4908_v8, %v4475_v51  ;;  %v4480_v59 = vadd.f32 %v6385_v53, %v3726_v33  ;;  %v5035_v26 = vadd.f32 %v5034_v60, %v4972_v10  ;;  %v5076_v57 = vmul.f32 %v4975_v52, %v4975_v52 }
 0x21e   : > { %v4921_v1 = vpop.f32.mrf.mxu0  ;;  %v5103_v18 = vadd.f32 %v5102_v3, %v5072_v62  ;;  %v4423_v4 = vpop.f32.mrf.mxu1  ;;  %v3730_v24 = vadd.f32 %v9556_v39, %v3343_v44  ;;  %v9562_v62 = vld [vmem:[#allocation41_spill] sm:$0xff] }
 0x21f   : > { %5005 = vst [vmem:[%s6638_s19 + $0xa8] sm:$0xff] %v4973_v31  ;;  %v5074_v30 = vmul.f32 %v4973_v31, %v4973_v31  ;;  %v4978_v28 = vadd.f32 %v6433_v49, %v4480_v59  ;;  %v4478_v7 = vadd.f32 %v4423_v4, %v3724_v5  ;;  %v5036_v37 = vadd.f32 %v5035_v26, %v4973_v31 }
 0x220   : > { %v6434_v58 = vpop.f32.mrf.mxu0  ;;  %v5104_v23 = vadd.f32 %v5103_v18, %v5073_v43  ;;  %v6386_v48 = vpop.f32.mrf.mxu1  ;;  %v3731_v3 = vadd.f32 %v9562_v62, %v3344_v12 }
 0x221   : > { %5010 = vst [vmem:[%s6638_s19 + $0xd0] sm:$0xff] %v4978_v28  ;;  %v4976_v0 = vadd.f32 %v4921_v1, %v4478_v7  ;;  %v4481_v45 = vadd.f32 %v6386_v48, %v3727_v6  ;;  %v5037_v35 = vadd.f32 %v5036_v37, %v4974_v13  ;;  %v9561_v13 = vld [vmem:[#allocation45_spill] sm:$0xff]  ;;  %v5079_v36 = vmul.f32 %v4978_v28, %v4978_v28 }
 0x222   : > { %v4924_v42 = vpop.f32.mrf.mxu0  ;;  %v5105_v15 = vadd.f32 %v5104_v23, %v5074_v30  ;;  %v4426_v8 = vpop.f32.mrf.mxu1  ;;  %v3342_v9 = vadd.f32 %v9561_v13, %v9560_v54 }
 0x223   : > { %5008 = vst [vmem:[%s6638_s19 + $0xc0] sm:$0xff] %v4976_v0  ;;  %v4979_v40 = vadd.f32 %v6434_v58, %v4481_v45  ;;  %v4479_v19 = vadd.f32 %v4426_v8, %v3725_v14  ;;  %v5038_v63 = vadd.f32 %v5037_v35, %v4975_v52  ;;  %v5077_v33 = vmul.f32 %v4976_v0, %v4976_v0 }
 0x224   : > { %v6437_v29 = vpop.f32.mrf.mxu0  ;;  %v5106_v10 = vadd.f32 %v5105_v15, %v5075_v34  ;;  %v6389_v49 = vpop.f32.mrf.mxu1  ;;  %v3729_v31 = vadd.f32 %v9563_v21, %v3342_v9 }
 0x225   : > { %5011 = vst [vmem:[%s6638_s19 + $0xd8] sm:$0xff] %v4979_v40  ;;  %v4977_v38 = vadd.f32 %v4924_v42, %v4479_v19  ;;  %v4484_v27 = vadd.f32 %v6389_v49, %v3730_v24  ;;  %v5039_v61 = vadd.f32 %v5038_v63, %v4976_v0  ;;  %v5080_v32 = vmul.f32 %v4979_v40, %v4979_v40 }
 0x226   : > { %v4937_v20 = vpop.f32.mrf.mxu0  ;;  %v5107_v51 = vadd.f32 %v5106_v10, %v5076_v57  ;;  %v4439_v1 = vpop.f32.mrf.mxu1  ;;  %v5122_v10 = vld [vmem:[#allocation2] sm:$0x3] }
 0x227   : > { %5009 = vst [vmem:[%s6638_s19 + $0xc8] sm:$0xff] %v4977_v38  ;;  %v5078_v52 = vmul.f32 %v4977_v38, %v4977_v38  ;;  %v4982_v60 = vadd.f32 %v6437_v29, %v4484_v27  ;;  %v4482_v53 = vadd.f32 %v4439_v1, %v3728_v17  ;;  %v5040_v5 = vadd.f32 %v5039_v61, %v4977_v38 }
 0x228   : > { %v5108_v11 = vadd.f32 %v5107_v51, %v5077_v33  ;;  %v6390_v16 = vpop.f32.mrf.mxu1  ;;  %v6438_v47 = vpop.f32.mrf.mxu0 }
 0x229   : > { %5014 = vst [vmem:[%s6638_s19 + $0xf0] sm:$0xff] %v4982_v60  ;;  %v4980_v59 = vadd.f32 %v4937_v20, %v4482_v53  ;;  %v4485_v58 = vadd.f32 %v6390_v16, %v3731_v3  ;;  %v5041_v6 = vadd.f32 %v5040_v5, %v4978_v28  ;;  %v5083_v55 = vmul.f32 %v4982_v60, %v4982_v60 }
 0x22a   : > { %v5109_v26 = vadd.f32 %v5108_v11, %v5078_v52  ;;  %v4442_v43 = vpop.f32.mrf.mxu1  ;;  %v4940_v30 = vpop.f32.mrf.mxu0 }
 0x22b   : > { %5012 = vst [vmem:[%s6638_s19 + $0xe0] sm:$0xff] %v4980_v59  ;;  %v4983_v18 = vadd.f32 %v6438_v47, %v4485_v58  ;;  %v4483_v4 = vadd.f32 %v4442_v43, %v3729_v31  ;;  %v5042_v44 = vadd.f32 %v5041_v6, %v4979_v40  ;;  %v5081_v23 = vmul.f32 %v4980_v59, %v4980_v59 }
 0x22c   : > { %v5110_v56 = vadd.f32 %v5109_v26, %v5079_v36 }
 0x22d   : > { %5015 = vst [vmem:[%s6638_s19 + $0xf8] sm:$0xff] %v4983_v18  ;;  %v4981_v7 = vadd.f32 %v4940_v30, %v4483_v4  ;;  %v5043_v42 = vadd.f32 %v5042_v44, %v4980_v59  ;;  %v5084_v22 = vmul.f32 %v4983_v18, %v4983_v18 }
 0x22e   : > { %v5111_v37 = vadd.f32 %v5110_v56, %v5080_v32 }
 0x22f   : > { %5013 = vst [vmem:[%s6638_s19 + $0xe8] sm:$0xff] %v4981_v7  ;;  %v5082_v48 = vmul.f32 %v4981_v7, %v4981_v7  ;;  %v5044_v14 = vadd.f32 %v5043_v42, %v4981_v7 }
 0x230   : > { %v5112_v41 = vadd.f32 %v5111_v37, %v5081_v23 }
 0x231   : > { %v5045_v28 = vadd.f32 %v5044_v14, %v4982_v60 }
 0x232   : > { %v5113_v46 = vadd.f32 %v5112_v41, %v5082_v48 }
 0x233   : > { %v5046_v0 = vadd.f32 %v5045_v28, %v4983_v18 }
 0x234   : > { %v5114_v45 = vadd.f32 %v5113_v46, %v5083_v55 }
 0x235   : > { %v5047_v29 = vrot.slane %v5046_v0, 4 }
 0x236   : > { %v5115_v34 = vadd.f32 %v5114_v45, %v5084_v22 }
 0x237   : > { %v5048_v35 = vadd.f32 %v5047_v29, %v5046_v0 }
 0x238   : > { %v5116_v15 = vrot.slane %v5115_v34, 4 }
 0x239   : > { %v5049_v8 = vrot.slane %v5048_v35, 2 }
 0x23a   : > { %v5117_v39 = vadd.f32 %v5116_v15, %v5115_v34 }
 0x23b   : > { %v5050_v24 = vadd.f32 %v5049_v8, %v5048_v35 }
 0x23c   : > { %v5118_v2 = vrot.slane %v5117_v39, 2 }
 0x23d   : > { %v5051_v25 = vrot.slane %v5050_v24, 1 }
 0x23e   : > { %v5119_v12 = vadd.f32 %v5118_v2, %v5117_v39 }
 0x23f   : > { %v5052_v19 = vadd.f32 %v5051_v25, %v5050_v24 }
 0x240   : > { %v5120_v40 = vrot.slane %v5119_v12, 1 }
 0x242   : > { %v5121_v57 = vadd.f32 %v5120_v40, %v5119_v12 }
 0x243   : > { %5130 = sbr.rel (%p5787_p5) target bundleno = 592 (0x250), region = 36 }
 0x244   : > { %v5124_v63 = vsel %vm5123_vm6, %v5052_v19, %v5121_v57 }
 0x245   : > { %v5125_v49 = vadd.f32 %v5124_v63, %v5122_v10 }
 0x247   : > { %5126 = vst [vmem:[#allocation2] sm:$0x3] %v5125_v49 }
 0x24e   : > { %v5131_v20 = vld [vmem:[#allocation2] sm:$0x3] }
 0x24f   : > { %5132 = vst [vmem:[%s9316_s3] sm:$0x3] %v5131_v20 }
 0x250 PF: > { %s14_s12 = sadd.s32 1, %s6600_s12  }
 0x251   : > { %p11_p6 = scmp.ge.s32.totalorder %s14_s12, 4  }
 0x253   :  { %13 = sbr.rel (!%p11_p6) target bundleno = 1 (0x1), region = 84 }

</bundles_post_ra>
